<compile_context>
chip_gen: v5e
topology: v5e:2x2
jax: 0.10.0
libtpu: 0.0.40
codegen_flags: <defaults>
</compile_context>

<pallas_src>
import math
import jax
import jax.numpy as jnp
from jax.experimental import pallas as pl
from jax.experimental.pallas import tpu as pltpu

# -------------------- model config (small, consistent with the module) ------
B_SZ = 2         # batch
T_SEQ = 128      # sequence length (block_size)
C_EMB = 128      # n_embd  (lane-dense: multiple of 128)
N_HEAD = 4       # n_head
HEAD_DIM = C_EMB // N_HEAD


def causal_attn_kernel(x_ref, w_attn_ref, b_attn_ref, w_proj_ref, b_proj_ref,
                       o_ref):
    # One batch element per grid step; whole working set fits in VMEM.
    x = x_ref[0].astype(jnp.bfloat16)                       # (T, C)
    T, C = x.shape

    # ---- qkv projection: bf16 operands into the MXU, f32 accumulation ----
    qkv = jnp.dot(x, w_attn_ref[...].astype(jnp.bfloat16),
                  preferred_element_type=jnp.float32)        # (T, 3C)
    qkv = qkv + b_attn_ref[...]                              # (1,3C) broadcast

    # Scale q-side (T, hd) instead of the (T, T) score matrix.
    scale = 1.0 / math.sqrt(HEAD_DIM)
    q = (qkv[:, 0 * C:1 * C] * scale).astype(jnp.bfloat16)
    k = qkv[:, 1 * C:2 * C].astype(jnp.bfloat16)
    v = qkv[:, 2 * C:3 * C].astype(jnp.bfloat16)

    # causal mask (row index >= col index), hoisted out of the head loop
    row = jax.lax.broadcasted_iota(jnp.int32, (T, T), 0)
    col = jax.lax.broadcasted_iota(jnp.int32, (T, T), 1)
    causal = row >= col

    # ---- per-head attention with the head-concat fused into c_proj ----
    w_proj_bf = w_proj_ref[...].astype(jnp.bfloat16)         # (C, C)
    y_proj = jnp.zeros((T, C), jnp.float32)
    for hd in range(N_HEAD):
        sl = slice(hd * HEAD_DIM, (hd + 1) * HEAD_DIM)
        s = jnp.dot(q[:, sl], k[:, sl].T,
                    preferred_element_type=jnp.float32)      # (T, T)
        s = jnp.where(causal, s, -jnp.inf)
        s = s - jnp.max(s, axis=-1, keepdims=True)           # diag always kept
        p = jnp.exp(s)                                        # exp(-inf) = 0
        # denominator >= 1 after max-subtraction -> approx EUP reciprocal safe
        p = p * pl.reciprocal(jnp.sum(p, axis=-1, keepdims=True), approx=True)
        o_h = jnp.dot(p.astype(jnp.bfloat16), v[:, sl],
                      preferred_element_type=jnp.float32)     # (T, hd)
        # fused "concat + output projection": o_h @ W_proj[rows_of_head]
        y_proj = y_proj + jnp.dot(o_h.astype(jnp.bfloat16), w_proj_bf[sl, :],
                                  preferred_element_type=jnp.float32)

    o_ref[0] = (y_proj + b_proj_ref[...]).astype(o_ref.dtype)


def causal_self_attention(x, params):
    B, T, C = x.shape
    w_attn, b_attn, w_proj, b_proj = params

    full = lambda shp: pl.BlockSpec(shp, lambda b: tuple(0 for _ in shp))
    return pl.pallas_call(
        causal_attn_kernel,
        out_shape=jax.ShapeDtypeStruct((B, T, C), x.dtype),
        grid_spec=pltpu.PrefetchScalarGridSpec(
            num_scalar_prefetch=0,
            grid=(B,),
            in_specs=[
                pl.BlockSpec((1, T, C), lambda b: (b, 0, 0)),   # x
                full(w_attn.shape), full(b_attn.shape),
                full(w_proj.shape), full(b_proj.shape),
            ],
            out_specs=pl.BlockSpec((1, T, C), lambda b: (b, 0, 0)),
        ),
        compiler_params=pltpu.CompilerParams(
            dimension_semantics=("parallel",)),
    )(x, w_attn, b_attn, w_proj, b_proj)


# -------------------- pure-JAX f32 reference (for validation) ---------------
def causal_self_attention_ref(x, params):
    w_attn, b_attn, w_proj, b_proj = params
    x = x.astype(jnp.float32)
    Bb, T, C = x.shape
    qkv = x @ w_attn + b_attn[0]
    q, k, v = jnp.split(qkv, 3, axis=-1)

    def heads(t):  # (B,T,C) -> (B,H,T,hd)
        return t.reshape(Bb, T, N_HEAD, HEAD_DIM).transpose(0, 2, 1, 3)

    q, k, v = heads(q), heads(k), heads(v)
    s = jnp.einsum('bhqd,bhkd->bhqk', q, k) / math.sqrt(HEAD_DIM)
    mask = jnp.tril(jnp.ones((T, T), bool))
    s = jnp.where(mask, s, -jnp.inf)
    p = jax.nn.softmax(s, axis=-1)
    y = jnp.einsum('bhqk,bhkd->bhqd', p, v).transpose(0, 2, 1, 3).reshape(Bb, T, C)
    return y @ w_proj + b_proj[0]


if __name__ == "__main__":
    key = jax.random.PRNGKey(0)
    ks = jax.random.split(key, 8)
    C = C_EMB
    std = 0.02
    params = (
        jax.random.normal(ks[0], (C, 3 * C), jnp.float32) * std,   # w_attn (in, out)
        jax.random.normal(ks[1], (1, 3 * C), jnp.float32) * std,   # b_attn
        jax.random.normal(ks[2], (C, C), jnp.float32) * std,       # w_proj (in, out)
        jax.random.normal(ks[3], (1, C), jnp.float32) * std,       # b_proj
    )

    x = jax.random.normal(ks[4], (B_SZ, T_SEQ, C_EMB), jnp.float32)

    out = causal_self_attention(x, params)
    out = jax.block_until_ready(out)

    ref = causal_self_attention_ref(x, params)
    assert out.shape == (B_SZ, T_SEQ, C_EMB)
    # bf16 MXU operands => relaxed tolerance vs. the f32 reference
    assert jnp.allclose(out, ref, atol=2e-2, rtol=2e-2), \
        f"max err {jnp.max(jnp.abs(out - ref))}"
    print("KERNEL_OK")
</pallas_src>

<mosaic_0001>
module attributes {stable_mosaic.version = 11 : i64} {
  func.func @causal_attn_kernel(%arg0: i32, %arg1: memref<1x128x128xf32, #tpu.memory_space<vmem>>, %arg2: memref<128x384xf32, #tpu.memory_space<vmem>>, %arg3: memref<1x384xf32, #tpu.memory_space<vmem>>, %arg4: memref<128x128xf32, #tpu.memory_space<vmem>>, %arg5: memref<1x128xf32, #tpu.memory_space<vmem>>, %arg6: memref<1x128x128xf32, #tpu.memory_space<vmem>>) attributes {dimension_semantics = [#tpu.dimension_semantics<parallel>], iteration_bounds = array<i64: 2>, scalar_prefetch = 0 : i64, scratch_operands = 0 : i64, tpu.core_type = #tpu.core_type<tc>, window_params = [{transform_indices = @transform_0, window_bounds = array<i64: 1, 128, 128>}, {pipeline_mode = #tpu.pipeline_mode<synchronous>, transform_indices = @transform_1, window_bounds = array<i64: 128, 384>}, {pipeline_mode = #tpu.pipeline_mode<synchronous>, transform_indices = @transform_2, window_bounds = array<i64: 1, 384>}, {pipeline_mode = #tpu.pipeline_mode<synchronous>, transform_indices = @transform_3, window_bounds = array<i64: 128, 128>}, {pipeline_mode = #tpu.pipeline_mode<synchronous>, transform_indices = @transform_4, window_bounds = array<i64: 1, 128>}, {transform_indices = @transform_5, window_bounds = array<i64: 1, 128, 128>}]} {
    %c0 = arith.constant 0 : index
    %c0_0 = arith.constant 0 : index
    %c0_1 = arith.constant 0 : index
    %0 = vector.load %arg1[%c0, %c0_0, %c0_1] : memref<1x128x128xf32, #tpu.memory_space<vmem>>, vector<1x128x128xf32>
    %1 = vector.shape_cast %0 : vector<1x128x128xf32> to vector<128x128xf32>
    %2 = arith.truncf %1 : vector<128x128xf32> to vector<128x128xbf16>
    %c0_2 = arith.constant 0 : index
    %c0_3 = arith.constant 0 : index
    %3 = vector.load %arg2[%c0_2, %c0_3] : memref<128x384xf32, #tpu.memory_space<vmem>>, vector<128x384xf32>
    %4 = arith.truncf %3 : vector<128x384xf32> to vector<128x384xbf16>
    %cst = arith.constant dense<0.000000e+00> : vector<128x384xf32>
    %5 = tpu.matmul %2, %4, %cst {dimension_numbers = #tpu.dot_dimension_numbers<[1], [0], [0], [1], [0, 0, 1, 1], [], []>} : vector<128x128xbf16>, vector<128x384xbf16>, vector<128x384xf32> -> vector<128x384xf32>
    %c0_4 = arith.constant 0 : index
    %c0_5 = arith.constant 0 : index
    %6 = vector.load %arg3[%c0_4, %c0_5] : memref<1x384xf32, #tpu.memory_space<vmem>>, vector<1x384xf32>
    %7 = vector.broadcast %6 : vector<1x384xf32> to vector<128x384xf32>
    %8 = arith.addf %5, %7 : vector<128x384xf32>
    %9 = vector.extract_strided_slice %8 {offsets = [0, 0], sizes = [128, 128], strides = [1, 1]} : vector<128x384xf32> to vector<128x128xf32>
    %cst_6 = arith.constant 0.176776692 : f32
    %10 = vector.broadcast %cst_6 : f32 to vector<128x128xf32>
    %11 = arith.mulf %9, %10 : vector<128x128xf32>
    %12 = arith.truncf %11 : vector<128x128xf32> to vector<128x128xbf16>
    %13 = vector.extract_strided_slice %8 {offsets = [0, 128], sizes = [128, 128], strides = [1, 1]} : vector<128x384xf32> to vector<128x128xf32>
    %14 = arith.truncf %13 : vector<128x128xf32> to vector<128x128xbf16>
    %15 = vector.extract_strided_slice %8 {offsets = [0, 256], sizes = [128, 128], strides = [1, 1]} : vector<128x384xf32> to vector<128x128xf32>
    %16 = arith.truncf %15 : vector<128x128xf32> to vector<128x128xbf16>
    %17 = tpu.iota {dimensions = array<i32: 0>} : vector<128x128xi32>
    %18 = tpu.iota {dimensions = array<i32: 1>} : vector<128x128xi32>
    %19 = arith.cmpi sge, %17, %18 : vector<128x128xi32>
    %c0_7 = arith.constant 0 : index
    %c0_8 = arith.constant 0 : index
    %20 = vector.load %arg4[%c0_7, %c0_8] : memref<128x128xf32, #tpu.memory_space<vmem>>, vector<128x128xf32>
    %21 = arith.truncf %20 : vector<128x128xf32> to vector<128x128xbf16>
    %cst_9 = arith.constant 0.000000e+00 : f32
    %22 = vector.broadcast %cst_9 : f32 to vector<128x128xf32>
    %23 = vector.extract_strided_slice %12 {offsets = [0, 0], sizes = [128, 32], strides = [1, 1]} : vector<128x128xbf16> to vector<128x32xbf16>
    %24 = vector.extract_strided_slice %14 {offsets = [0, 0], sizes = [128, 32], strides = [1, 1]} : vector<128x128xbf16> to vector<128x32xbf16>
    %25 = tpu.transpose %24, [1, 0] : vector<128x32xbf16> -> vector<32x128xbf16>
    %cst_10 = arith.constant dense<0.000000e+00> : vector<128x128xf32>
    %26 = tpu.matmul %23, %25, %cst_10 {dimension_numbers = #tpu.dot_dimension_numbers<[1], [0], [0], [1], [0, 0, 1, 1], [], []>} : vector<128x32xbf16>, vector<32x128xbf16>, vector<128x128xf32> -> vector<128x128xf32>
    %cst_11 = arith.constant 0xFF800000 : f32
    %27 = vector.broadcast %cst_11 : f32 to vector<128x128xf32>
    %28 = arith.select %19, %26, %27 : vector<128x128xi1>, vector<128x128xf32>
    %cst_12 = arith.constant dense<0xFF800000> : vector<128xf32>
    %29 = vector.multi_reduction <maximumf>, %28, %cst_12 [1] : vector<128x128xf32> to vector<128xf32>
    %30 = vector.shape_cast %29 : vector<128xf32> to vector<128x1xf32>
    %31 = vector.broadcast %30 : vector<128x1xf32> to vector<128x128xf32>
    %32 = arith.subf %28, %31 : vector<128x128xf32>
    %33 = math.exp %32 : vector<128x128xf32>
    %cst_13 = arith.constant dense<0.000000e+00> : vector<128xf32>
    %34 = vector.multi_reduction <add>, %33, %cst_13 [1] : vector<128x128xf32> to vector<128xf32>
    %35 = vector.shape_cast %34 : vector<128xf32> to vector<128x1xf32>
    %36 = tpu.reciprocal %35 {approx = true} : vector<128x1xf32> -> vector<128x1xf32>
    %37 = vector.broadcast %36 : vector<128x1xf32> to vector<128x128xf32>
    %38 = arith.mulf %33, %37 : vector<128x128xf32>
    %39 = arith.truncf %38 : vector<128x128xf32> to vector<128x128xbf16>
    %40 = vector.extract_strided_slice %16 {offsets = [0, 0], sizes = [128, 32], strides = [1, 1]} : vector<128x128xbf16> to vector<128x32xbf16>
    %cst_14 = arith.constant dense<0.000000e+00> : vector<128x32xf32>
    %41 = tpu.matmul %39, %40, %cst_14 {dimension_numbers = #tpu.dot_dimension_numbers<[1], [0], [0], [1], [0, 0, 1, 1], [], []>} : vector<128x128xbf16>, vector<128x32xbf16>, vector<128x32xf32> -> vector<128x32xf32>
    %42 = arith.truncf %41 : vector<128x32xf32> to vector<128x32xbf16>
    %43 = vector.extract_strided_slice %21 {offsets = [0, 0], sizes = [32, 128], strides = [1, 1]} : vector<128x128xbf16> to vector<32x128xbf16>
    %cst_15 = arith.constant dense<0.000000e+00> : vector<128x128xf32>
    %44 = tpu.matmul %42, %43, %cst_15 {dimension_numbers = #tpu.dot_dimension_numbers<[1], [0], [0], [1], [0, 0, 1, 1], [], []>} : vector<128x32xbf16>, vector<32x128xbf16>, vector<128x128xf32> -> vector<128x128xf32>
    %45 = arith.addf %22, %44 : vector<128x128xf32>
    %46 = vector.extract_strided_slice %12 {offsets = [0, 32], sizes = [128, 32], strides = [1, 1]} : vector<128x128xbf16> to vector<128x32xbf16>
    %47 = vector.extract_strided_slice %14 {offsets = [0, 32], sizes = [128, 32], strides = [1, 1]} : vector<128x128xbf16> to vector<128x32xbf16>
    %48 = tpu.transpose %47, [1, 0] : vector<128x32xbf16> -> vector<32x128xbf16>
    %cst_16 = arith.constant dense<0.000000e+00> : vector<128x128xf32>
    %49 = tpu.matmul %46, %48, %cst_16 {dimension_numbers = #tpu.dot_dimension_numbers<[1], [0], [0], [1], [0, 0, 1, 1], [], []>} : vector<128x32xbf16>, vector<32x128xbf16>, vector<128x128xf32> -> vector<128x128xf32>
    %cst_17 = arith.constant 0xFF800000 : f32
    %50 = vector.broadcast %cst_17 : f32 to vector<128x128xf32>
    %51 = arith.select %19, %49, %50 : vector<128x128xi1>, vector<128x128xf32>
    %cst_18 = arith.constant dense<0xFF800000> : vector<128xf32>
    %52 = vector.multi_reduction <maximumf>, %51, %cst_18 [1] : vector<128x128xf32> to vector<128xf32>
    %53 = vector.shape_cast %52 : vector<128xf32> to vector<128x1xf32>
    %54 = vector.broadcast %53 : vector<128x1xf32> to vector<128x128xf32>
    %55 = arith.subf %51, %54 : vector<128x128xf32>
    %56 = math.exp %55 : vector<128x128xf32>
    %cst_19 = arith.constant dense<0.000000e+00> : vector<128xf32>
    %57 = vector.multi_reduction <add>, %56, %cst_19 [1] : vector<128x128xf32> to vector<128xf32>
    %58 = vector.shape_cast %57 : vector<128xf32> to vector<128x1xf32>
    %59 = tpu.reciprocal %58 {approx = true} : vector<128x1xf32> -> vector<128x1xf32>
    %60 = vector.broadcast %59 : vector<128x1xf32> to vector<128x128xf32>
    %61 = arith.mulf %56, %60 : vector<128x128xf32>
    %62 = arith.truncf %61 : vector<128x128xf32> to vector<128x128xbf16>
    %63 = vector.extract_strided_slice %16 {offsets = [0, 32], sizes = [128, 32], strides = [1, 1]} : vector<128x128xbf16> to vector<128x32xbf16>
    %cst_20 = arith.constant dense<0.000000e+00> : vector<128x32xf32>
    %64 = tpu.matmul %62, %63, %cst_20 {dimension_numbers = #tpu.dot_dimension_numbers<[1], [0], [0], [1], [0, 0, 1, 1], [], []>} : vector<128x128xbf16>, vector<128x32xbf16>, vector<128x32xf32> -> vector<128x32xf32>
    %65 = arith.truncf %64 : vector<128x32xf32> to vector<128x32xbf16>
    %66 = vector.extract_strided_slice %21 {offsets = [32, 0], sizes = [32, 128], strides = [1, 1]} : vector<128x128xbf16> to vector<32x128xbf16>
    %cst_21 = arith.constant dense<0.000000e+00> : vector<128x128xf32>
    %67 = tpu.matmul %65, %66, %cst_21 {dimension_numbers = #tpu.dot_dimension_numbers<[1], [0], [0], [1], [0, 0, 1, 1], [], []>} : vector<128x32xbf16>, vector<32x128xbf16>, vector<128x128xf32> -> vector<128x128xf32>
    %68 = arith.addf %45, %67 : vector<128x128xf32>
    %69 = vector.extract_strided_slice %12 {offsets = [0, 64], sizes = [128, 32], strides = [1, 1]} : vector<128x128xbf16> to vector<128x32xbf16>
    %70 = vector.extract_strided_slice %14 {offsets = [0, 64], sizes = [128, 32], strides = [1, 1]} : vector<128x128xbf16> to vector<128x32xbf16>
    %71 = tpu.transpose %70, [1, 0] : vector<128x32xbf16> -> vector<32x128xbf16>
    %cst_22 = arith.constant dense<0.000000e+00> : vector<128x128xf32>
    %72 = tpu.matmul %69, %71, %cst_22 {dimension_numbers = #tpu.dot_dimension_numbers<[1], [0], [0], [1], [0, 0, 1, 1], [], []>} : vector<128x32xbf16>, vector<32x128xbf16>, vector<128x128xf32> -> vector<128x128xf32>
    %cst_23 = arith.constant 0xFF800000 : f32
    %73 = vector.broadcast %cst_23 : f32 to vector<128x128xf32>
    %74 = arith.select %19, %72, %73 : vector<128x128xi1>, vector<128x128xf32>
    %cst_24 = arith.constant dense<0xFF800000> : vector<128xf32>
    %75 = vector.multi_reduction <maximumf>, %74, %cst_24 [1] : vector<128x128xf32> to vector<128xf32>
    %76 = vector.shape_cast %75 : vector<128xf32> to vector<128x1xf32>
    %77 = vector.broadcast %76 : vector<128x1xf32> to vector<128x128xf32>
    %78 = arith.subf %74, %77 : vector<128x128xf32>
    %79 = math.exp %78 : vector<128x128xf32>
    %cst_25 = arith.constant dense<0.000000e+00> : vector<128xf32>
    %80 = vector.multi_reduction <add>, %79, %cst_25 [1] : vector<128x128xf32> to vector<128xf32>
    %81 = vector.shape_cast %80 : vector<128xf32> to vector<128x1xf32>
    %82 = tpu.reciprocal %81 {approx = true} : vector<128x1xf32> -> vector<128x1xf32>
    %83 = vector.broadcast %82 : vector<128x1xf32> to vector<128x128xf32>
    %84 = arith.mulf %79, %83 : vector<128x128xf32>
    %85 = arith.truncf %84 : vector<128x128xf32> to vector<128x128xbf16>
    %86 = vector.extract_strided_slice %16 {offsets = [0, 64], sizes = [128, 32], strides = [1, 1]} : vector<128x128xbf16> to vector<128x32xbf16>
    %cst_26 = arith.constant dense<0.000000e+00> : vector<128x32xf32>
    %87 = tpu.matmul %85, %86, %cst_26 {dimension_numbers = #tpu.dot_dimension_numbers<[1], [0], [0], [1], [0, 0, 1, 1], [], []>} : vector<128x128xbf16>, vector<128x32xbf16>, vector<128x32xf32> -> vector<128x32xf32>
    %88 = arith.truncf %87 : vector<128x32xf32> to vector<128x32xbf16>
    %89 = vector.extract_strided_slice %21 {offsets = [64, 0], sizes = [32, 128], strides = [1, 1]} : vector<128x128xbf16> to vector<32x128xbf16>
    %cst_27 = arith.constant dense<0.000000e+00> : vector<128x128xf32>
    %90 = tpu.matmul %88, %89, %cst_27 {dimension_numbers = #tpu.dot_dimension_numbers<[1], [0], [0], [1], [0, 0, 1, 1], [], []>} : vector<128x32xbf16>, vector<32x128xbf16>, vector<128x128xf32> -> vector<128x128xf32>
    %91 = arith.addf %68, %90 : vector<128x128xf32>
    %92 = vector.extract_strided_slice %12 {offsets = [0, 96], sizes = [128, 32], strides = [1, 1]} : vector<128x128xbf16> to vector<128x32xbf16>
    %93 = vector.extract_strided_slice %14 {offsets = [0, 96], sizes = [128, 32], strides = [1, 1]} : vector<128x128xbf16> to vector<128x32xbf16>
    %94 = tpu.transpose %93, [1, 0] : vector<128x32xbf16> -> vector<32x128xbf16>
    %cst_28 = arith.constant dense<0.000000e+00> : vector<128x128xf32>
    %95 = tpu.matmul %92, %94, %cst_28 {dimension_numbers = #tpu.dot_dimension_numbers<[1], [0], [0], [1], [0, 0, 1, 1], [], []>} : vector<128x32xbf16>, vector<32x128xbf16>, vector<128x128xf32> -> vector<128x128xf32>
    %cst_29 = arith.constant 0xFF800000 : f32
    %96 = vector.broadcast %cst_29 : f32 to vector<128x128xf32>
    %97 = arith.select %19, %95, %96 : vector<128x128xi1>, vector<128x128xf32>
    %cst_30 = arith.constant dense<0xFF800000> : vector<128xf32>
    %98 = vector.multi_reduction <maximumf>, %97, %cst_30 [1] : vector<128x128xf32> to vector<128xf32>
    %99 = vector.shape_cast %98 : vector<128xf32> to vector<128x1xf32>
    %100 = vector.broadcast %99 : vector<128x1xf32> to vector<128x128xf32>
    %101 = arith.subf %97, %100 : vector<128x128xf32>
    %102 = math.exp %101 : vector<128x128xf32>
    %cst_31 = arith.constant dense<0.000000e+00> : vector<128xf32>
    %103 = vector.multi_reduction <add>, %102, %cst_31 [1] : vector<128x128xf32> to vector<128xf32>
    %104 = vector.shape_cast %103 : vector<128xf32> to vector<128x1xf32>
    %105 = tpu.reciprocal %104 {approx = true} : vector<128x1xf32> -> vector<128x1xf32>
    %106 = vector.broadcast %105 : vector<128x1xf32> to vector<128x128xf32>
    %107 = arith.mulf %102, %106 : vector<128x128xf32>
    %108 = arith.truncf %107 : vector<128x128xf32> to vector<128x128xbf16>
    %109 = vector.extract_strided_slice %16 {offsets = [0, 96], sizes = [128, 32], strides = [1, 1]} : vector<128x128xbf16> to vector<128x32xbf16>
    %cst_32 = arith.constant dense<0.000000e+00> : vector<128x32xf32>
    %110 = tpu.matmul %108, %109, %cst_32 {dimension_numbers = #tpu.dot_dimension_numbers<[1], [0], [0], [1], [0, 0, 1, 1], [], []>} : vector<128x128xbf16>, vector<128x32xbf16>, vector<128x32xf32> -> vector<128x32xf32>
    %111 = arith.truncf %110 : vector<128x32xf32> to vector<128x32xbf16>
    %112 = vector.extract_strided_slice %21 {offsets = [96, 0], sizes = [32, 128], strides = [1, 1]} : vector<128x128xbf16> to vector<32x128xbf16>
    %cst_33 = arith.constant dense<0.000000e+00> : vector<128x128xf32>
    %113 = tpu.matmul %111, %112, %cst_33 {dimension_numbers = #tpu.dot_dimension_numbers<[1], [0], [0], [1], [0, 0, 1, 1], [], []>} : vector<128x32xbf16>, vector<32x128xbf16>, vector<128x128xf32> -> vector<128x128xf32>
    %114 = arith.addf %91, %113 : vector<128x128xf32>
    %c0_34 = arith.constant 0 : index
    %c0_35 = arith.constant 0 : index
    %115 = vector.load %arg5[%c0_34, %c0_35] : memref<1x128xf32, #tpu.memory_space<vmem>>, vector<1x128xf32>
    %116 = vector.broadcast %115 : vector<1x128xf32> to vector<128x128xf32>
    %117 = arith.addf %114, %116 : vector<128x128xf32>
    %c0_36 = arith.constant 0 : index
    %c0_37 = arith.constant 0 : index
    %c0_38 = arith.constant 0 : index
    %118 = vector.load %arg6[%c0_36, %c0_37, %c0_38] : memref<1x128x128xf32, #tpu.memory_space<vmem>>, vector<1x128x128xf32>
    %119 = vector.shape_cast %118 : vector<1x128x128xf32> to vector<128x128xf32>
    %120 = vector.shape_cast %117 : vector<128x128xf32> to vector<1x128x128xf32>
    tpu.vector_store %arg6[%c0_36, %c0_37, %c0_38], %120 {strides = array<i32>} : memref<1x128x128xf32, #tpu.memory_space<vmem>>, vector<1x128x128xf32>,
    return
  }
  func.func @transform_0(%arg0: i32) -> (i32, i32, i32) {
    %c0_i32 = arith.constant 0 : i32
    %c0_i32_0 = arith.constant 0 : i32
    %c0_i32_1 = arith.constant 0 : i32
    return %arg0, %c0_i32, %c0_i32_0 : i32, i32, i32
  }
  func.func @transform_1(%arg0: i32) -> (i32, i32) {
    %c0_i32 = arith.constant 0 : i32
    %c0_i32_0 = arith.constant 0 : i32
    %c0_i32_1 = arith.constant 0 : i32
    return %c0_i32, %c0_i32_0 : i32, i32
  }
  func.func @transform_2(%arg0: i32) -> (i32, i32) {
    %c0_i32 = arith.constant 0 : i32
    %c0_i32_0 = arith.constant 0 : i32
    %c0_i32_1 = arith.constant 0 : i32
    return %c0_i32, %c0_i32_0 : i32, i32
  }
  func.func @transform_3(%arg0: i32) -> (i32, i32) {
    %c0_i32 = arith.constant 0 : i32
    %c0_i32_0 = arith.constant 0 : i32
    %c0_i32_1 = arith.constant 0 : i32
    return %c0_i32, %c0_i32_0 : i32, i32
  }
  func.func @transform_4(%arg0: i32) -> (i32, i32) {
    %c0_i32 = arith.constant 0 : i32
    %c0_i32_0 = arith.constant 0 : i32
    %c0_i32_1 = arith.constant 0 : i32
    return %c0_i32, %c0_i32_0 : i32, i32
  }
  func.func @transform_5(%arg0: i32) -> (i32, i32, i32) {
    %c0_i32 = arith.constant 0 : i32
    %c0_i32_0 = arith.constant 0 : i32
    %c0_i32_1 = arith.constant 0 : i32
    return %arg0, %c0_i32, %c0_i32_0 : i32, i32, i32
  }
}

</mosaic_0001>

<bundles_post_ra>
// kernel: tpu_custom_call.1
= control target key start
LH: loop header
LB: loop body
LE: loop exit
PB: predicated region body
PF: predicated region fallthrough
CT: control target
= control target key end

     0   :  { %10 = vsyncpa [#allocation3], 0  ;;  %s5209_s0 = inlined_call_operand.hbm [shape: f32[2,128,128], index: 0, kind: input, shape index: {}]   ;;  %s5210_s1 = inlined_call_operand.hbm [shape: f32[128,384], index: 1, kind: input, shape index: {}]   ;;  %s5211_s2 = inlined_call_operand.hbm [shape: f32[1,384], index: 2, kind: input, shape index: {}]   ;;  %s5212_s3 = inlined_call_operand.hbm [shape: f32[128,128], index: 3, kind: input, shape index: {}]   ;;  %s5213_s4 = inlined_call_operand.vmem [shape: f32[1,128], index: 4, kind: input, shape index: {}]   ;;  %s5214_s5 = inlined_call_operand.hbm [shape: f32[2,128,128], index: 5, kind: output, shape index: {}]  }
   0x1   :  { %12 = vsyncpa [#allocation3 + $0x1], 0 }
   0x2   :  { %13 = vsyncpa [#allocation6], 0 }
   0x3   :  { %14 = vsyncpa [#allocation9], 0 }
   0x4   :  { %15 = vsyncpa [#allocation4], 0 }
   0x5   :  { %17 = vsyncpa [#allocation4 + $0x1], 0  ;;  %s3478_s18 = smov 0   ;;  %s3480_s19 = smov 0  }
   0x6   :  { %s3482_s20 = smov 0   ;;  %s3484_s21 = smov 0  }
   0x7 LB: > { %s3499_s22 = sadd.s32 4294967295, %s3434_s21   ;;  %s2787_s23 = sadd.s32 4294967294, %s3434_s21   ;;  %s3434_s21 = sphi %s3484_s21, %s5326_s21   ;;  %s3430_s20 = sphi %s3482_s20, %s5325_s20   ;;  %s3426_s19 = sphi %s3480_s19, %s5324_s19   ;;  %s3422_s18 = sphi %s3478_s18, %s5323_s18  }
   0x8   : > { %p43_p0 = scmp.ne.s32.totalorder %s3426_s19, %s3422_s18  ;;  %p44_p1 = scmp.eq.s32.totalorder %s3499_s22, 0 }
   0x9   : > { %p151_p2 = scmp.eq.s32.totalorder %s3499_s22, 1  ;;  %p157_p3 = scmp.eq.s32.totalorder %s2787_s23, 1 }
   0xa   : > { %p3508_p4 = por %p44_p1, %p43_p0  ;;  %p2788_p5 = scmp.ge.s32.totalorder %s3434_s21, 1 }
   0xb   : > { %p3513_p6 = por %p157_p3, %p43_p0  ;;  %p164_p7 = scmp.lt.s32.totalorder %s3434_s21, 3 }
   0xc   : > { %s175_s28 = sshll.u32 %s5210_s1, 4  ;;  %s3436_s30 = smov [#allocation5]   ;;  %s176_s28 = int_to_ptr.hbm [resolvable:$true] %s175_s28 }
   0xd   : > { %p3521_p8 = pnand %p2788_p5, %p164_p7  ;;  %s177_s6 = sshll.u32 %s3436_s30, 4  ;;  %s178_s6 = int_to_ptr.vmem [resolvable:$true] %s177_s6 }
   0xe   : > { %s190_s10 = sshll.u32 %s5211_s2, 4  ;;  %s3437_s11 = smov 384   ;;  %s191_s10 = int_to_ptr.hbm [resolvable:$true] %s190_s10 }
   0xf   : > { %p2913_p9 = pneg %p3521_p8  ;;  %s3438_s12 = smov 24  }
  0x10   : > { %s3439_s13 = smov [#allocation7]   ;;  %s201_s17 = sshll.u32 %s5212_s3, 4  ;;  %s202_s17 = int_to_ptr.hbm [resolvable:$true] %s201_s17 }
  0x11   : > { %p3529_p10 = pnand %p2913_p9, %p44_p1  ;;  %s192_s14 = sshll.u32 %s3439_s13, 4  ;;  %s193_s14 = int_to_ptr.vmem [resolvable:$true] %s192_s14 }
  0x12   : > { %s3440_s23 = smov [#allocation8]   ;;  %s5215_s27 = smov 128  }
  0x13   : > { %2916 = dma.hbm_to_vmem [thread:$0]  (!%p3529_p10), %s176_s28, 6144, %s178_s6, [#allocation6], %s3437_s11, %s3437_s11, %s3438_s12  }
  0x14   : > { %2919 = dma.hbm_to_vmem [thread:$0]  (!%p3529_p10), %s191_s10, 48, %s193_s14, [#allocation6]  }
  0x15   : > { %s203_s26 = sshll.u32 %s3440_s23, 4  ;;  %s3442_s28 = smov 8   ;;  %s204_s26 = int_to_ptr.vmem [resolvable:$true] %s203_s26 }
  0x16   : > { %2922 = dma.hbm_to_vmem [thread:$0]  (!%p3529_p10), %s202_s17, 2048, %s204_s26, [#allocation9], %s5215_s27, %s5215_s27, %s3442_s28  }
  0x17   : > { %s3550_s30 = sadd.s32 1, %s3434_s21   ;;  %s30_s8 = sadd.s32 1, %s3430_s20 }
  0x18   : > { %s27_s6 = ssub.s32 %s3434_s21, %s3550_s30  ;;  %p37_p13 = scmp.ne.s32.totalorder %s3430_s20, %s3426_s19 }
  0x19   : > { %p28_p12 = scmp.eq.s32.totalorder %s27_s6, 0  ;;  %p38_p0 = scmp.eq.s32.totalorder %s3434_s21, 0 }
  0x1a   : > { %p3563_p3 = por %p151_p2, %p37_p13  ;;  %p2934_p5 = scmp.lt.s32.totalorder %s3434_s21, 2 }
  0x1b   : > { %s3559_s9 = scalar_select %p28_p12, %s3430_s20, %s30_s8  }
  0x1c   : > { %s220_s7 = sand.u32 1, %s3430_s20   ;;  %s2871_s11 = sshll.u32 %s3434_s21, 7 }
  0x1d   : > { %p39_p7 = por %p38_p0, %p37_p13  ;;  %s2793_s12 = sshll.u32 %s220_s7, 7 }
  0x1e   : > { %s229_s15 = scalar_lea.hbm %s5209_s0, %s2871_s11  ;;  %s224_s17 = scalar_lea.vmem [#allocation2], %s2793_s12 }
  0x1f   : > { %s230_s16 = sshll.u32 %s229_s15, 4  ;;  %s232_s23 = sshll.u32 %s224_s17, 4  ;;  %s231_s16 = int_to_ptr.hbm [resolvable:$true] %s230_s16  ;;  %s233_s23 = int_to_ptr.vmem [resolvable:$true] %s232_s23 }
  0x20   : > { %p3573_p9 = pnand %p2934_p5, %p39_p7  ;;  %s221_s6 = scalar_lea.sflag [#allocation3], %s220_s7 }
  0x21   : > { %s3330_s8 = sshra.s32 %s231_s16, 4  ;;  %s3337_s12 = scalar_lea.hbm %s5209_s0, 256  ;;  %s3331_s8 = int_to_ptr.hbm [resolvable:$true] %s3330_s8 }
  0x22   : > { %s3332_s27 = scalar_lea.hbm %s3331_s8, 128  ;;  %p3334_p10 = pneg %p3573_p9 }
  0x23   : > { %p3333_p2 = scmp.ne.s32.totalorder %s3331_s8, %s3332_s27  ;;  %p3338_p0 = scmp.lt.s32.totalorder %s3331_s8, %s5209_s0 }
  0x24   : > { %p3339_p5 = scmp.lt.s32.totalorder %s3337_s12, %s3332_s27 }
  0x25   : > { %p3335_p12 = pnand %p3334_p10, %p3333_p2 }
  0x26   : > { %p3340_p7 = por %p3339_p5, %p3338_p0 }
  0x27   : > { %p3336_p13 = pneg %p3335_p12 }
  0x29   : > { %p3341_p11 = pnand %p3340_p7, %p3336_p13 }
  0x2b   : > { %3344 = shalt.err (!%p3341_p11)
}
  0x2c   : > { %s5254_s7 = smov 128   ;;  %244 = sbr.rel (%p3521_p8) target bundleno = 2007 (0x7d7), region = 40 }
  0x2d   : > { %2926 = dma.hbm_to_vmem [thread:$0]  (!%p3573_p9), %s231_s16, 2048, %s233_s23, %s221_s6, %s5254_s7, %s5254_s7, %s3442_s28  }
  0x31   : > { %s3593_s17 = sand.u32 1, %s3426_s19  }
  0x32   : > { %s2797_s27 = sshll.u32 %s3593_s17, 7  ;;  %s247_s8 = scalar_lea.sflag [#allocation3], %s3593_s17 }
  0x33   : > { %s3599_s11 = scalar_lea.vmem [#allocation2], %s2797_s27 }
  0x34   : > { %3405 = dma.done.wait (%p3508_p4), %s247_s8, 2048  }
  0x35   : > { %3407 = vsyncadd (%p3508_p4), %s247_s8, 4294965248 }
  0x36   : > { %3409 = dma.done.wait (%p44_p1), [#allocation6], 6192  }
  0x37   : > { %3411 = vsyncadd (%p44_p1), [#allocation6], 4294961104 }
  0x38   : > { %3413 = dma.done.wait (%p44_p1), [#allocation9], 2048  }
  0x39   : > { %3415 = vsyncadd (%p44_p1), [#allocation9], 4294965248  ;;  %v360_v0 = vld [vmem:[#allocation5 + $0x150] sm:$0xff]  ;;  %v363_v1 = vld [vmem:[#allocation5 + $0x168] sm:$0xff]  ;;  %s3443_s24 = smov 32   ;;  %s3444_s29 = smov 96  }
  0x3a   : > { %v361_v2 = vld [vmem:[#allocation5 + $0x158] sm:$0xff]  ;;  %v387_v3 = vpack.c.bf16 %v363_v1, %v360_v0  ;;  %v364_v4 = vld [vmem:[#allocation5 + $0x170] sm:$0xff]  ;;  %v354_v5 = vld [vmem:[#allocation5 + $0x120] sm:$0xff]  ;;  %s3445_s28 = smov 64   ;;  %vm756_vm0 = vcmask 261120   ;;  %s5113_s26 = scalar_lea.vmem [#allocation10], %s2797_s27 }
  0x3b   : > { %v357_v6 = vld [vmem:[#allocation5 + $0x138] sm:$0xff]  ;;  %v3613_v7 = vpack.c.bf16 %v364_v4, %v361_v2  ;;  %v355_v8 = vld [vmem:[#allocation5 + $0x128] sm:$0xff]  ;;  %v358_v9 = vld [vmem:[#allocation5 + $0x140] sm:$0xff]  ;;  %s2872_s6 = sshll.u32 %s3499_s22, 7  ;;  %s2682_s15 = sshll.u32 %s5113_s26, 4  ;;  %s2683_s15 = int_to_ptr.vmem [resolvable:$true] %s2682_s15 }
  0x3c   : > { %398 = vmatpush.bf16.msra.mxu0 %v387_v3  ;;  %2873 = vmatpush.bf16.msra.mxu3 %v387_v3  ;;  %v384_v10 = vpack.c.bf16 %v357_v6, %v354_v5  ;;  %v3616_v11 = vpack.c.bf16 %v358_v9, %v355_v8  ;;  %v348_v12 = vld [vmem:[#allocation5 + $0xf0] sm:$0xff]  ;;  %v351_v13 = vld [vmem:[#allocation5 + $0x108] sm:$0xff]  ;;  %v349_v14 = vld [vmem:[#allocation5 + $0xf8] sm:$0xff]  ;;  %s2681_s14 = scalar_lea.hbm %s5214_s5, %s2872_s6  ;;  %s2670_s22 = scalar_lea.sflag [#allocation4], %s3593_s17 }
  0x3d   : > { %2881 = vmatpush.bf16.msra.mxu1 %v3613_v7  ;;  %v352_v15 = vld [vmem:[#allocation5 + $0x110] sm:$0xff]  ;;  %v381_v16 = vpack.c.bf16 %v351_v13, %v348_v12  ;;  %v342_v18 = vld [vmem:[#allocation5 + $0xc0] sm:$0xff]  ;;  %v345_v19 = vld [vmem:[#allocation5 + $0xd8] sm:$0xff]  ;;  %s2684_s7 = sshll.u32 %s2681_s14, 4  ;;  %s2685_s7 = int_to_ptr.hbm [resolvable:$true] %s2684_s7 }
  0x3e   : > { %v382_v17 = vpack.c.bf16 %v352_v15, %v349_v14  ;;  %v343_v20 = vld [vmem:[#allocation5 + $0xc8] sm:$0xff]  ;;  %v346_v21 = vld [vmem:[#allocation5 + $0xe0] sm:$0xff]  ;;  %v378_v22 = vpack.c.bf16 %v345_v19, %v342_v18  ;;  %v336_v24 = vld [vmem:[#allocation5 + $0x90] sm:$0xff]  ;;  %s3374_s27 = sshra.s32 %s2685_s7, 4  ;;  %s3375_s27 = int_to_ptr.hbm [resolvable:$true] %s3374_s27 }
  0x3f   : > { %v379_v23 = vpack.c.bf16 %v346_v21, %v343_v20  ;;  %v339_v25 = vld [vmem:[#allocation5 + $0xa8] sm:$0xff]  ;;  %v337_v26 = vld [vmem:[#allocation5 + $0x98] sm:$0xff]  ;;  %v340_v27 = vld [vmem:[#allocation5 + $0xb0] sm:$0xff]  ;;  %s3376_s8 = scalar_lea.hbm %s3375_s27, 128  ;;  %p3381_p11 = scmp.lt.s32.totalorder %s3375_s27, %s5214_s5 }
  0x40   : > { %399 = vmatpush.bf16.msra.mxu0 %v384_v10  ;;  %2874 = vmatpush.bf16.msra.mxu3 %v384_v10  ;;  %v375_v28 = vpack.c.bf16 %v339_v25, %v336_v24  ;;  %v376_v29 = vpack.c.bf16 %v340_v27, %v337_v26  ;;  %v330_v30 = vld [vmem:[#allocation5 + $0x60] sm:$0xff]  ;;  %v333_v31 = vld [vmem:[#allocation5 + $0x78] sm:$0xff]  ;;  %v331_v32 = vld [vmem:[#allocation5 + $0x68] sm:$0xff]  ;;  %p3377_p1 = scmp.ne.s32.totalorder %s3375_s27, %s3376_s8 }
  0x41   : > { %2882 = vmatpush.bf16.msra.mxu1 %v3616_v11  ;;  %v334_v33 = vld [vmem:[#allocation5 + $0x80] sm:$0xff]  ;;  %v372_v34 = vpack.c.bf16 %v333_v31, %v330_v30  ;;  %v324_v36 = vld [vmem:[#allocation5 + $0x30] sm:$0xff]  ;;  %v327_v37 = vld [vmem:[#allocation5 + $0x48] sm:$0xff] }
  0x42   : > { %v373_v35 = vpack.c.bf16 %v334_v33, %v331_v32  ;;  %v325_v38 = vld [vmem:[#allocation5 + $0x38] sm:$0xff]  ;;  %v328_v39 = vld [vmem:[#allocation5 + $0x50] sm:$0xff]  ;;  %v369_v40 = vpack.c.bf16 %v327_v37, %v324_v36  ;;  %v318_v42 = vld [vmem:[#allocation5] sm:$0xff]  ;;  %p3378_p4 = pnand %p3377_p1, %p3563_p3 }
  0x43   : > { %v370_v41 = vpack.c.bf16 %v328_v39, %v325_v38  ;;  %v321_v43 = vld [vmem:[#allocation5 + $0x18] sm:$0xff]  ;;  %v319_v44 = vld [vmem:[#allocation5 + $0x8] sm:$0xff]  ;;  %v322_v45 = vld [vmem:[#allocation5 + $0x20] sm:$0xff] }
  0x44   : > { %400 = vmatpush.bf16.msra.mxu0 %v381_v16  ;;  %2875 = vmatpush.bf16.msra.mxu3 %v381_v16  ;;  %v294_v46 = vld [vmem:[%s3599_s11] sm:$0xff]  ;;  %v366_v47 = vpack.c.bf16 %v321_v43, %v318_v42  ;;  %v295_v48 = vld [vmem:[%s3599_s11 + $0x8] sm:$0xff]  ;;  %v367_v51 = vpack.c.bf16 %v322_v45, %v319_v44  ;;  %v296_v57 = vld [vmem:[%s3599_s11 + $0x10] sm:$0xff]  ;;  %p3379_p8 = pneg %p3378_p4 }
  0x45   : > { %2883 = vmatpush.bf16.msra.mxu1 %v382_v17  ;;  %v298_v49 = vld [vmem:[%s3599_s11 + $0x20] sm:$0xff]  ;;  %v299_v50 = vld [vmem:[%s3599_s11 + $0x28] sm:$0xff]  ;;  %v3625_v54 = vpack.c.bf16 %v295_v48, %v294_v46  ;;  %v297_v58 = vld [vmem:[%s3599_s11 + $0x18] sm:$0xff] }
  0x46   : > { %v302_v52 = vld [vmem:[%s3599_s11 + $0x40] sm:$0xff]  ;;  %v303_v53 = vld [vmem:[%s3599_s11 + $0x48] sm:$0xff]  ;;  %v3627_v55 = vpack.c.bf16 %v299_v50, %v298_v49  ;;  %v300_v59 = vld [vmem:[%s3599_s11 + $0x30] sm:$0xff]  ;;  %v3642_v63 = vpack.c.bf16 %v297_v58, %v296_v57 }
  0x47   : > { %v3629_v56 = vpack.c.bf16 %v303_v53, %v302_v52  ;;  %v301_v60 = vld [vmem:[%s3599_s11 + $0x38] sm:$0xff]  ;;  %v304_v61 = vld [vmem:[%s3599_s11 + $0x50] sm:$0xff]  ;;  %v306_v2 = vld [vmem:[%s3599_s11 + $0x60] sm:$0xff] }
  0x48   : > { %401 = vmatpush.bf16.msra.mxu0 %v378_v22  ;;  %2876 = vmatpush.bf16.msra.mxu3 %v378_v22  ;;  %v305_v62 = vld [vmem:[%s3599_s11 + $0x58] sm:$0xff]  ;;  %v3644_v0 = vpack.c.bf16 %v301_v60, %v300_v59  ;;  %v307_v3 = vld [vmem:[%s3599_s11 + $0x68] sm:$0xff]  ;;  %v308_v5 = vld [vmem:[%s3599_s11 + $0x70] sm:$0xff] }
  0x49   : > { %2884 = vmatpush.bf16.msra.mxu1 %v379_v23  ;;  %v3646_v1 = vpack.c.bf16 %v305_v62, %v304_v61  ;;  %v3653_v4 = vpack.c.bf16 %v307_v3, %v306_v2  ;;  %v309_v6 = vld [vmem:[%s3599_s11 + $0x78] sm:$0xff]  ;;  %v3669_v8 = vld [vmem:[#allocation7] sm:$0x7] }
  0x4a   : > { %v3672_v9 = vperm.slane %v3669_v8, 0 }
  0x4c   : > { %402 = vmatpush.bf16.msra.mxu0 %v375_v28  ;;  %2877 = vmatpush.bf16.msra.mxu3 %v375_v28 }
  0x4d   : > { %2885 = vmatpush.bf16.msra.mxu1 %v376_v29 }
  0x50   : > { %403 = vmatpush.bf16.msra.mxu0 %v372_v34  ;;  %2878 = vmatpush.bf16.msra.mxu3 %v372_v34 }
  0x51   : > { %2886 = vmatpush.bf16.msra.mxu1 %v373_v35 }
  0x54   : > { %404 = vmatpush.bf16.msra.mxu0 %v369_v40  ;;  %2879 = vmatpush.bf16.msra.mxu3 %v369_v40 }
  0x55   : > { %2887 = vmatpush.bf16.msra.mxu1 %v370_v41 }
  0x58   : > { %405 = vmatpush.bf16.msra.mxu0 %v366_v47  ;;  %2880 = vmatpush.bf16.msra.mxu3 %v366_v47 }
  0x59   : > { %2888 = vmatpush.bf16.msra.mxu1 %v367_v51 }
  0x5b   : > { %406 = vmatmul.bf16.vlgmr.msra.gmra.mxu0 %v3625_v54  ;;  %416 = vmatmul.bf16.vlgmr.msra.gmra.mxu3 %v3627_v55 }
  0x5c   : > { %447 = vmatpush.bf16.msrb.mxu0 %v3613_v7  ;;  %475 = vmatmul.bf16.vlgmr.msra.gmra.mxu1 %v3629_v56  ;;  %v3660_v7 = vpack.c.bf16 %v309_v6, %v308_v5 }
  0x60   : > { %448 = vmatpush.bf16.msrb.mxu0 %v3616_v11  ;;  %v3675_v11 = vperm.slane %v3669_v8, 1 }
  0x64   : > { %449 = vmatpush.bf16.msrb.mxu0 %v382_v17 }
  0x68   : > { %450 = vmatpush.bf16.msrb.mxu0 %v379_v23 }
  0x6b   : > { %411 = vmatmul.bf16.gmra.mxu0 %v3642_v63  ;;  %421 = vmatmul.bf16.gmra.mxu3 %v3644_v0 }
  0x6c   : > { %451 = vmatpush.bf16.msrb.mxu0 %v376_v29  ;;  %480 = vmatmul.bf16.gmra.mxu1 %v3646_v1 }
  0x70   : > { %452 = vmatpush.bf16.msrb.mxu0 %v373_v35 }
  0x74   : > { %453 = vmatpush.bf16.msrb.mxu0 %v370_v41 }
  0x78   : > { %454 = vmatpush.bf16.msrb.mxu0 %v367_v51 }
  0x7b   : > { %455 = vmatmul.bf16.vlgmr.msrb.gmra.mxu0 %v3625_v54  ;;  %426 = vmatmul.bf16.gmra.mxu3 %v3629_v56 }
  0x7c   : > { %485 = vmatmul.bf16.gmra.mxu1 %v3653_v4 }
  0x8b   : > { %460 = vmatmul.bf16.gmra.mxu0 %v3642_v63  ;;  %431 = vmatmul.bf16.gmra.mxu3 %v3646_v1 }
  0x8c   : > { %490 = vmatmul.bf16.gmra.mxu1 %v3660_v7 }
  0x9b   : > { %465 = vmatmul.bf16.gmra.mxu0 %v3627_v55  ;;  %436 = vmatmul.bf16.gmra.mxu3 %v3653_v4 }
  0xab   : > { %470 = vmatmul.bf16.gmra.mxu0 %v3644_v0  ;;  %441 = vmatmul.bf16.gmra.mxu3 %v3660_v7 }
  0xd8   : > { %v407_v10 = vpop.f32.mrf.mxu0 }
  0xd9   : > { %v476_v12 = vpop.f32.mrf.mxu1  ;;  %v408_v13 = vadd.f32 %v407_v10, %v3672_v9 }
  0xda   : > { %v477_v14 = vadd.f32 %v476_v12, %v3675_v11 }
  0xdb   : > { %v545_v16 = vmul.f32 0.17677669, %v408_v13 }
  0xdc   : > { %v585_v17 = vpack.c.bf16 %v477_v14, %v477_v14 }
  0xdd   : > { %v561_v22 = vpack.c.bf16 %v545_v16, %v545_v16 }
  0xde   : > { %v417_v15 = vpop.f32.mrf.mxu3  ;;  %v740_v24 = vunpack.c.l.b16 %v585_v17 }
  0xdf   : > { %v692_v29 = vunpack.c.l.b16 %v561_v22  ;;  %v418_v31 = vadd.f32 %v417_v15, %v3672_v9 }
  0xe0   : > { %v409_v18 = vpop.f32.mrf.mxu0 }
  0xe1   : > { %v410_v19 = vadd.f32 %v409_v18, %v3672_v9  ;;  %v478_v20 = vpop.f32.mrf.mxu1  ;;  %v549_v38 = vmul.f32 0.17677669, %v418_v31 }
  0xe2   : > { %v479_v21 = vadd.f32 %v478_v20, %v3675_v11 }
  0xe3   : > { %v546_v23 = vmul.f32 0.17677669, %v410_v19  ;;  %v565_v42 = vpack.c.bf16 %v549_v38, %v549_v38 }
  0xe4   : > { %v586_v25 = vpack.c.bf16 %v479_v21, %v479_v21 }
  0xe5   : > { %v562_v26 = vpack.c.bf16 %v546_v23, %v546_v23  ;;  %v696_v49 = vunpack.c.l.b16 %v565_v42 }
  0xe6   : > { %v741_v27 = vunpack.c.l.b16 %v586_v25  ;;  %v419_v28 = vpop.f32.mrf.mxu3 }
  0xe7   : > { %v693_v30 = vunpack.c.l.b16 %v562_v26  ;;  %v420_v34 = vadd.f32 %v419_v28, %v3672_v9 }
  0xe8   : > { %v3682_v32 = vpack.c.b16 %v741_v27, %v740_v24  ;;  %v412_v33 = vpop.f32.mrf.mxu0 }
  0xe9   : > { %v3685_v35 = vpack.c.b16 %v693_v30, %v692_v29  ;;  %v413_v36 = vadd.f32 %v412_v33, %v3672_v9  ;;  %v481_v37 = vpop.f32.mrf.mxu1  ;;  %v550_v39 = vmul.f32 0.17677669, %v420_v34 }
  0xea   : > { %2178 = vrot.lane.b32.xlu2 %v3682_v32, %s3443_s24  ;;  %1151 = vrot.lane.b32.xlu0 %v3682_v32, %s3444_s29  ;;  %v482_v52 = vadd.f32 %v481_v37, %v3675_v11 }
  0xeb   : > { %1675 = vrot.lane.b32.xlu1 %v3685_v35, %s3445_s28  ;;  %v547_v40 = vmul.f32 0.17677669, %v413_v36  ;;  %v566_v43 = vpack.c.bf16 %v550_v39, %v550_v39 }
  0xec   : > { %v587_v3 = vpack.c.bf16 %v482_v52, %v482_v52 }
  0xed   : > { %v563_v45 = vpack.c.bf16 %v547_v40, %v547_v40  ;;  %v697_v50 = vunpack.c.l.b16 %v566_v43 }
  0xee   : > { %v422_v41 = vpop.f32.mrf.mxu3  ;;  %v742_v15 = vunpack.c.l.b16 %v587_v3 }
  0xef   : > { %v694_v51 = vunpack.c.l.b16 %v563_v45  ;;  %v423_v58 = vadd.f32 %v422_v41, %v3672_v9  ;;  %v3705_v62 = vpack.c.b16 %v697_v50, %v696_v49 }
  0xf0   : > { %v414_v44 = vpop.f32.mrf.mxu0 }
  0xf1   : > { %v415_v46 = vadd.f32 %v414_v44, %v3672_v9  ;;  %v483_v47 = vpop.f32.mrf.mxu1  ;;  %v551_v12 = vmul.f32 0.17677669, %v423_v58 }
  0xf2   : > { %1699 = vrot.lane.b32.xlu0 %v3682_v32, %s3445_s28  ;;  %1127 = vrot.lane.b32.xlu2 %v3685_v35, %s3444_s29  ;;  %v484_v57 = vadd.f32 %v483_v47, %v3675_v11 }
  0xf3   : > { %v548_v48 = vmul.f32 0.17677669, %v415_v46  ;;  %2154 = vrot.lane.b32.xlu1 %v3685_v35, %s3443_s24  ;;  %v567_v17 = vpack.c.bf16 %v551_v12, %v551_v12 }
  0xf4   : > { %v588_v6 = vpack.c.bf16 %v484_v57, %v484_v57 }
  0xf5   : > { %v564_v53 = vpack.c.bf16 %v548_v48, %v548_v48  ;;  %v698_v25 = vunpack.c.l.b16 %v567_v17 }
  0xf6   : > { %v424_v59 = vpop.f32.mrf.mxu3  ;;  %v743_v16 = vunpack.c.l.b16 %v588_v6 }
  0xf7   : > { %v695_v60 = vunpack.c.l.b16 %v564_v53  ;;  %v425_v61 = vadd.f32 %v424_v59, %v3672_v9 }
  0xf8   : > { %v456_v2 = vpop.f32.mrf.mxu0  ;;  %v3716_v22 = vpack.c.b16 %v743_v16, %v742_v15 }
  0xf9   : > { %v3707_v5 = vpack.c.b16 %v695_v60, %v694_v51  ;;  %v486_v10 = vpop.f32.mrf.mxu1  ;;  %v552_v13 = vmul.f32 0.17677669, %v425_v61  ;;  %v457_v14 = vadd.f32 %v456_v2, %v3675_v11 }
  0xfa   : > { %1131 = vrot.lane.b32.xlu2 %v3705_v62, %s3444_s29  ;;  %v487_v29 = vadd.f32 %v486_v10, %v3675_v11 }
  0xfb   : > { %2158 = vrot.lane.b32.xlu1 %v3705_v62, %s3443_s24  ;;  %2156 = vrot.lane.b32.xlu0 %v3707_v5, %s3443_s24  ;;  %v568_v18 = vpack.c.bf16 %v552_v13, %v552_v13  ;;  %v577_v20 = vpack.c.bf16 %v457_v14, %v457_v14 }
  0xfc   : > { %v589_v39 = vpack.c.bf16 %v487_v29, %v487_v29  ;;  %v365_v29 = vld [vmem:[#allocation5 + $0x178] sm:$0xff] }
  0xfd   : > { %v699_v26 = vunpack.c.l.b16 %v568_v18  ;;  %v732_v27 = vunpack.c.l.b16 %v577_v20 }
  0xfe   : > { %v427_v19 = vpop.f32.mrf.mxu3  ;;  %v744_v45 = vunpack.c.l.b16 %v589_v39 }
  0xff   : > { %v428_v33 = vadd.f32 %v427_v19, %v3672_v9  ;;  %v3726_v34 = vpack.c.b16 %v699_v26, %v698_v25 }
 0x100   : > { %v458_v21 = vpop.f32.mrf.mxu0 }
 0x101   : > { %v459_v23 = vadd.f32 %v458_v21, %v3675_v11  ;;  %v488_v24 = vpop.f32.mrf.mxu1  ;;  %v553_v43 = vmul.f32 0.17677669, %v428_v33 }
 0x102   : > { %1679 = vrot.lane.b32.xlu2 %v3705_v62, %s3445_s28  ;;  %v489_v30 = vadd.f32 %v488_v24, %v3675_v11 }
 0x103   : > { %v578_v28 = vpack.c.bf16 %v459_v23, %v459_v23  ;;  %1153 = vrot.lane.b32.xlu1 %v3716_v22, %s3444_s29  ;;  %v569_v48 = vpack.c.bf16 %v553_v43, %v553_v43  ;;  %v356_v43 = vld [vmem:[#allocation5 + $0x130] sm:$0xff] }
 0x104   : > { %v590_v40 = vpack.c.bf16 %v489_v30, %v489_v30 }
 0x105   : > { %v733_v31 = vunpack.c.l.b16 %v578_v28  ;;  %v700_v53 = vunpack.c.l.b16 %v569_v48  ;;  %v362_v28 = vld [vmem:[#allocation5 + $0x160] sm:$0xff] }
 0x106   : > { %v429_v36 = vpop.f32.mrf.mxu3  ;;  %v745_v46 = vunpack.c.l.b16 %v590_v40  ;;  %v389_v30 = vpack.c.bf16 %v365_v29, %v362_v28  ;;  %v332_v28 = vld [vmem:[#allocation5 + $0x70] sm:$0xff]  ;;  %v335_v29 = vld [vmem:[#allocation5 + $0x88] sm:$0xff] }
 0x107   : > { %v3728_v37 = vpack.c.b16 %v733_v31, %v732_v27  ;;  %v430_v38 = vadd.f32 %v429_v36, %v3672_v9 }
 0x108   : > { %v461_v41 = vpop.f32.mrf.mxu0  ;;  %v3738_v50 = vpack.c.b16 %v745_v46, %v744_v45  ;;  %496 = vmatpush.bf16.msra.mxu2 %v389_v30  ;;  %v374_v30 = vpack.c.bf16 %v335_v29, %v332_v28 }
 0x109   : > { %v491_v42 = vpop.f32.mrf.mxu1  ;;  %1143 = vrot.lane.b32.xlu0 %v3728_v37, %s3444_s29  ;;  %v554_v44 = vmul.f32 0.17677669, %v430_v38  ;;  %v462_v13 = vadd.f32 %v461_v41, %v3675_v11  ;;  %v797_v41 = vsel %vm756_vm0, %v3716_v22, 0 }
 0x10a   : > { %1133 = vrot.lane.b32.xlu2 %v3726_v34, %s3444_s29  ;;  %v492_v47 = vadd.f32 %v491_v42, %v3675_v11  ;;  %v800_v23 = vsel %vm756_vm0, %v3738_v50, 0 }
 0x10b   : > { %1701 = vrot.lane.b32.xlu1 %v3716_v22, %s3445_s28  ;;  %v570_v49 = vpack.c.bf16 %v554_v44, %v554_v44  ;;  %v579_v17 = vpack.c.bf16 %v462_v13, %v462_v13  ;;  %v359_v44 = vld [vmem:[#allocation5 + $0x148] sm:$0xff] }
 0x10c   : > { %v591_v51 = vpack.c.bf16 %v492_v47, %v492_v47  ;;  %v386_v46 = vpack.c.bf16 %v359_v44, %v356_v43  ;;  %v320_v44 = vld [vmem:[#allocation5 + $0x10] sm:$0xff] }
 0x10d   : > { %v701_v58 = vunpack.c.l.b16 %v570_v49  ;;  %v734_v24 = vunpack.c.l.b16 %v579_v17  ;;  %v350_v49 = vld [vmem:[#allocation5 + $0x100] sm:$0xff] }
 0x10e   : > { %v432_v59 = vpop.f32.mrf.mxu3  ;;  %v746_v61 = vunpack.c.l.b16 %v591_v51  ;;  %v353_v51 = vld [vmem:[#allocation5 + $0x118] sm:$0xff]  ;;  %497 = vmatpush.bf16.msra.mxu2 %v386_v46 }
 0x10f   : > { %v3747_v3 = vpack.c.b16 %v701_v58, %v700_v53  ;;  %v433_v19 = vadd.f32 %v432_v59, %v3672_v9 }
 0x110   : > { %v463_v52 = vpop.f32.mrf.mxu0 }
 0x111   : > { %v493_v57 = vpop.f32.mrf.mxu1  ;;  %1691 = vrot.lane.b32.xlu0 %v3728_v37, %s3445_s28  ;;  %v464_v14 = vadd.f32 %v463_v52, %v3675_v11  ;;  %v555_v26 = vmul.f32 0.17677669, %v433_v19 }
 0x112   : > { %v494_v60 = vadd.f32 %v493_v57, %v3675_v11  ;;  %1155 = vrot.lane.b32.xlu2 %v3738_v50, %s3444_s29 }
 0x113   : > { %2180 = vrot.lane.b32.xlu1 %v3716_v22, %s3443_s24  ;;  %v580_v18 = vpack.c.bf16 %v464_v14, %v464_v14  ;;  %v571_v33 = vpack.c.bf16 %v555_v26, %v555_v26  ;;  %v383_v22 = vpack.c.bf16 %v353_v51, %v350_v49  ;;  %v782_v49 = vsel %vm756_vm0, %v3728_v37, 0 }
 0x114   : > { %v592_v2 = vpack.c.bf16 %v494_v60, %v494_v60 }
 0x115   : > { %v735_v25 = vunpack.c.l.b16 %v580_v18  ;;  %v702_v40 = vunpack.c.l.b16 %v571_v33  ;;  %498 = vmatpush.bf16.msra.mxu2 %v383_v22  ;;  %v341_v18 = vld [vmem:[#allocation5 + $0xb8] sm:$0xff]  ;;  %v326_v33 = vld [vmem:[#allocation5 + $0x40] sm:$0xff] }
 0x116   : > { %v747_v6 = vunpack.c.l.b16 %v592_v2  ;;  %v434_v16 = vpop.f32.mrf.mxu3  ;;  %v344_v2 = vld [vmem:[#allocation5 + $0xd0] sm:$0xff] }
 0x117   : > { %v435_v20 = vadd.f32 %v434_v16, %v3672_v9  ;;  %v3771_v31 = vpack.c.b16 %v735_v25, %v734_v24 }
 0x118   : > { %v3749_v10 = vpack.c.b16 %v747_v6, %v746_v61  ;;  %v466_v12 = vpop.f32.mrf.mxu0  ;;  %v794_v61 = vsel %vm756_vm0, %v3682_v32, 0  ;;  %v347_v6 = vld [vmem:[#allocation5 + $0xe8] sm:$0xff] }
 0x119   : > { %1135 = vrot.lane.b32.xlu0 %v3747_v3, %s3444_s29  ;;  %v556_v27 = vmul.f32 0.17677669, %v435_v20  ;;  %v467_v47 = vadd.f32 %v466_v12, %v3675_v11 }
 0x11a   : > { %v803_v15 = vsel %vm756_vm0, %v3749_v10, 0  ;;  %2170 = vrot.lane.b32.xlu2 %v3728_v37, %s3443_s24 }
 0x11b   : > { %805 = vmatpush.bf16.xpose.msrb.mxu3 %v803_v15  ;;  %1129 = vrot.lane.b32.xlu1 %v3707_v5, %s3444_s29  ;;  %v572_v36 = vpack.c.bf16 %v556_v27, %v556_v27  ;;  %v581_v57 = vpack.c.bf16 %v467_v47, %v467_v47  ;;  %v380_v15 = vpack.c.bf16 %v347_v6, %v344_v2 }
 0x11d   : > { %v703_v42 = vunpack.c.l.b16 %v572_v36  ;;  %v736_v16 = vunpack.c.l.b16 %v581_v57  ;;  %499 = vmatpush.bf16.msra.mxu2 %v380_v15  ;;  %v329_v36 = vld [vmem:[#allocation5 + $0x58] sm:$0xff] }
 0x11e   : > { %v437_v39 = vpop.f32.mrf.mxu3 }
 0x11f   : > { %v3784_v52 = vpack.c.b16 %v703_v42, %v702_v40  ;;  %v438_v20 = vadd.f32 %v437_v39, %v3672_v9  ;;  %v371_v40 = vpack.c.bf16 %v329_v36, %v326_v33 }
 0x120   : > { %v468_v21 = vpop.f32.mrf.mxu0 }
 0x121   : > { %2184 = vrot.lane.b32.xlu0 %v3749_v10, %s3443_s24  ;;  %v469_v48 = vadd.f32 %v468_v21, %v3675_v11  ;;  %v557_v26 = vmul.f32 0.17677669, %v438_v20 }
 0x122   : > { %1705 = vrot.lane.b32.xlu2 %v3749_v10, %s3445_s28 }
 0x123   : > { %806 = vmatpush.bf16.xpose.msrb.mxu3 %v800_v23  ;;  %1677 = vrot.lane.b32.xlu1 %v3707_v5, %s3445_s28  ;;  %v582_v58 = vpack.c.bf16 %v469_v48, %v469_v48  ;;  %v785_v48 = vsel %vm756_vm0, %v3771_v31, 0 }
 0x125   : > { %v737_v17 = vunpack.c.l.b16 %v582_v58 }
 0x126   : > { %v439_v14 = vpop.f32.mrf.mxu3 }
 0x127   : > { %v440_v21 = vadd.f32 %v439_v14, %v3672_v9  ;;  %v750_v24 = vpack.c.b16 %v737_v17, %v736_v16 }
 0x128   : > { %v471_v38 = vpop.f32.mrf.mxu0 }
 0x129   : > { %2172 = vrot.lane.b32.xlu0 %v3771_v31, %s3443_s24  ;;  %v472_v45 = vadd.f32 %v471_v38, %v3675_v11  ;;  %v558_v27 = vmul.f32 0.17677669, %v440_v21  ;;  %v573_v38 = vpack.c.bf16 %v557_v26, %v557_v26 }
 0x12a   : > { %1693 = vrot.lane.b32.xlu2 %v3771_v31, %s3445_s28 }
 0x12b   : > { %807 = vmatpush.bf16.xpose.msrb.mxu3 %v797_v41  ;;  %1681 = vrot.lane.b32.xlu1 %v3726_v34, %s3445_s28  ;;  %v583_v53 = vpack.c.bf16 %v472_v45, %v472_v45  ;;  %v574_v39 = vpack.c.bf16 %v558_v27, %v558_v27  ;;  %v788_v41 = vsel %vm756_vm0, %v750_v24, 0  ;;  %v704_v42 = vunpack.c.l.b16 %v573_v38  ;;  %v323_v45 = vld [vmem:[#allocation5 + $0x28] sm:$0xff] }
 0x12c   : > { %v368_v46 = vpack.c.bf16 %v323_v45, %v320_v44 }
 0x12d   : > { %v738_v12 = vunpack.c.l.b16 %v583_v53  ;;  %v705_v43 = vunpack.c.l.b16 %v574_v39 }
 0x12e   : > { %v442_v53 = vpop.f32.mrf.mxu3 }
 0x12f   : > { %v3804_v47 = vpack.c.b16 %v705_v43, %v704_v42 }
 0x130   : > { %v473_v59 = vpop.f32.mrf.mxu0 }
 0x131   : > { %v474_v60 = vadd.f32 %v473_v59, %v3675_v11  ;;  %v338_v11 = vld [vmem:[#allocation5 + $0xa0] sm:$0xff] }
 0x132   : > { %1137 = vrot.lane.b32.xlu2 %v3784_v52, %s3444_s29  ;;  %v377_v32 = vpack.c.bf16 %v341_v18, %v338_v11 }
 0x133   : > { %v584_v13 = vpack.c.bf16 %v474_v60, %v474_v60  ;;  %808 = vmatpush.bf16.xpose.msrb.mxu3 %v794_v61  ;;  %2160 = vrot.lane.b32.xlu1 %v3726_v34, %s3443_s24 }
 0x134   : > { %500 = vmatpush.bf16.msra.mxu2 %v377_v32 }
 0x135   : > { %v739_v19 = vunpack.c.l.b16 %v584_v13 }
 0x136   : > { %v444_v59 = vpop.f32.mrf.mxu3 }
 0x137   : > { %v751_v23 = vpack.c.b16 %v739_v19, %v738_v12  ;;  %v445_v61 = vadd.f32 %v444_v59, %v3672_v9 }
 0x138   : > { %501 = vmatpush.bf16.msra.mxu2 %v374_v30 }
 0x139   : > { %v791_v25 = vsel %vm756_vm0, %v751_v23, 0  ;;  %2176 = vrot.lane.b32.xlu0 %v751_v23, %s3443_s24 }
 0x13a   : > { %1695 = vrot.lane.b32.xlu2 %v750_v24, %s3445_s28 }
 0x13b   : > { %809 = vmatpush.bf16.xpose.msrb.mxu3 %v791_v25  ;;  %1703 = vrot.lane.b32.xlu1 %v3738_v50, %s3445_s28  ;;  %v609_v25 = vlaneseq }
 0x13c   : > { %502 = vmatpush.bf16.msra.mxu2 %v371_v40 }
 0x13d   : > { %v3903_v29 = vshrl.u32 %v609_v25, 7  ;;  %v3905_v30 = vand.u32 127, %v609_v25 }
 0x13f   : > { %vm628_vm1 = vcmp.ge.s32.totalorder %v3903_v29, %v3905_v30  ;;  %v3919_v42 = vadd.s32 8, %v3903_v29 }
 0x140   : > { %503 = vmatpush.bf16.msra.mxu2 %v368_v46 }
 0x141   : > { %vm5234_vm2 = vcmp.ge.s32.totalorder %v3919_v42, %v3905_v30 }
 0x142   : > { %2174 = vrot.lane.b32.xlu2 %v750_v24, %s3443_s24 }
 0x143   : > { %810 = vmatpush.bf16.xpose.msrb.mxu3 %v788_v41  ;;  %2182 = vrot.lane.b32.xlu1 %v3738_v50, %s3443_s24 }
 0x144   : > { %504 = vmatmul.bf16.vlgmr.msra.gmra.mxu2 %v3625_v54  ;;  %v3821_v54 = vpop.permute.xlu2 %2178 }
 0x14a   : > { %1139 = vrot.lane.b32.xlu2 %v3804_v47, %s3444_s29 }
 0x14b   : > { %811 = vmatpush.bf16.xpose.msrb.mxu3 %v785_v48  ;;  %1157 = vrot.lane.b32.xlu1 %v3749_v10, %s3444_s29 }
 0x14c   : > { %v3827_v37 = vpop.permute.xlu2 %1127 }
 0x152   : > { %1149 = vrot.lane.b32.xlu2 %v751_v23, %s3444_s29 }
 0x153   : > { %812 = vmatpush.bf16.xpose.msrb.mxu3 %v782_v49  ;;  %1145 = vrot.lane.b32.xlu1 %v3771_v31, %s3444_s29 }
 0x154   : > { %509 = vmatmul.bf16.gmra.mxu2 %v3642_v63 }
 0x15a   : > { %2802 = vmatmul.msk.bf16.vlgmr.msrb.gmra.mxu3 %vm756_vm0, %v3685_v35  ;;  %v3836_v35 = vpop.permute.xlu2 %1131 }
 0x15b   : > { %1147 = vrot.lane.b32.xlu1 %v750_v24, %s3444_s29 }
 0x15c   : > { %v1152_v27 = vpop.permute.xlu0 %1151 }
 0x15d   : > { %v3824_v50 = vpop.permute.xlu1 %1675  ;;  %v1196_v28 = vsel %vm756_vm0, %v1152_v27, 0  ;;  %v3982_v27 = vadd.s32 40, %v3903_v29 }
 0x15f   : > { %5264 = vst [vmem:[#allocation24_spill] sm:$0xff] %v3982_v27  ;;  %vm633_vm6 = vcmp.ge.s32.totalorder %v3982_v27, %v3905_v30 }
 0x162   : > { %v3839_v51 = vpop.permute.xlu2 %1679 }
 0x163   : > { %1697 = vrot.lane.b32.xlu1 %v751_v23, %s3445_s28 }
 0x164   : > { %514 = vmatmul.bf16.gmra.mxu2 %v3627_v55  ;;  %v443_v55 = vadd.f32 %v442_v53, %v3672_v9  ;;  %v1700_v45 = vpop.permute.xlu0 %1699 }
 0x165   : > { %v3829_v10 = vpop.permute.xlu1 %2154 }
 0x166   : > { %5255 = vst [vmem:[#allocation15_spill] sm:$0xff] %v3829_v10 }
 0x16a   : > { %2803 = vmatmul.msk.bf16.gmra.mxu3 %vm756_vm0, %v3707_v5  ;;  %v3846_v57 = vpop.permute.xlu2 %1133  ;;  %v559_v5 = vmul.f32 0.17677669, %v443_v55 }
 0x16c   : > { %v575_v60 = vpack.c.bf16 %v559_v5, %v559_v5 }
 0x16d   : > { %v3834_v63 = vpop.permute.xlu1 %2158  ;;  %v3939_v55 = vpop.permute.xlu0 %2156 }
 0x16e   : > { %5256 = vst [vmem:[#allocation16_spill] sm:$0xff] %v3834_v63  ;;  %v4093_v63 = vadd.s32 104, %v3903_v29 }
 0x16f   : > { %5261 = vst [vmem:[#allocation21_spill] sm:$0xff] %v3939_v55 }
 0x170   : > { %5272 = vst [vmem:[#allocation32_spill] sm:$0xff] %v4093_v63  ;;  %vm641_vm14 = vcmp.ge.s32.totalorder %v4093_v63, %v3905_v30 }
 0x172   : > { %v1156_v6 = vpop.permute.xlu2 %1155 }
 0x173   : > { %v1202_v20 = vsel %vm756_vm0, %v1156_v6, 0 }
 0x174   : > { %519 = vmatmul.bf16.gmra.mxu2 %v3644_v0  ;;  %v560_v0 = vmul.f32 0.17677669, %v445_v61  ;;  %v3949_v61 = vadd.s32 24, %v3903_v29 }
 0x175   : > { %v1154_v31 = vpop.permute.xlu1 %1153 }
 0x176   : > { %v576_v2 = vpack.c.bf16 %v560_v0, %v560_v0  ;;  %5262 = vst [vmem:[#allocation22_spill] sm:$0xff] %v3949_v61  ;;  %vm631_vm4 = vcmp.ge.s32.totalorder %v3949_v61, %v3905_v30 }
 0x178   : > { %v707_v12 = vunpack.c.l.b16 %v576_v2 }
 0x17a   : > { %2804 = vmatmul.msk.bf16.gmra.mxu3 %vm756_vm0, %v3705_v62  ;;  %v706_v62 = vunpack.c.l.b16 %v575_v60  ;;  %v3860_v15 = vpop.permute.xlu2 %2170 }
 0x17b   : > { %5258 = vst [vmem:[#allocation18_spill] sm:$0xff] %v3860_v15 }
 0x17c   : > { %v3856_v14 = vpack.c.b16 %v707_v12, %v706_v62  ;;  %v1144_v62 = vpop.permute.xlu0 %1143 }
 0x17d   : > { %v3843_v22 = vpop.permute.xlu1 %1701  ;;  %v1184_v12 = vsel %vm756_vm0, %v1144_v62, 0 }
 0x17e   : > { %5257 = vst [vmem:[#allocation17_spill] sm:$0xff] %v3856_v14  ;;  %1141 = vrot.lane.b32.xlu0 %v3856_v14, %s3444_s29 }
 0x184   : > { %524 = vmatmul.bf16.gmra.mxu2 %v3629_v56 }
 0x185   : > { %v3848_v58 = vpop.permute.xlu1 %2180 }
 0x18a   : > { %2805 = vmatmul.msk.bf16.gmra.mxu3 %vm756_vm0, %v3726_v34  ;;  %v3869_v34 = vpop.permute.xlu2 %1705 }
 0x18d   : > { %v3854_v13 = vpop.permute.xlu1 %1129 }
 0x192   : > { %v3874_v17 = vpop.permute.xlu2 %1693 }
 0x194   : > { %529 = vmatmul.bf16.gmra.mxu2 %v3646_v1 }
 0x195   : > { %v3862_v9 = vpop.permute.xlu1 %1677 }
 0x19a   : > { %2806 = vmatmul.msk.bf16.gmra.mxu3 %vm756_vm0, %v3747_v3  ;;  %v3880_v18 = vpop.permute.xlu2 %1137 }
 0x19d   : > { %v3867_v56 = vpop.permute.xlu1 %1681 }
 0x1a2   : > { %v3887_v19 = vpop.permute.xlu2 %1695 }
 0x1a4   : > { %534 = vmatmul.bf16.gmra.mxu2 %v3653_v4 }
 0x1a5   : > { %v3871_v16 = vpop.permute.xlu1 %2160 }
 0x1a6   : > { %5259 = vst [vmem:[#allocation19_spill] sm:$0xff] %v3871_v16 }
 0x1aa   : > { %2807 = vmatmul.msk.bf16.gmra.mxu3 %vm756_vm0, %v3784_v52  ;;  %v3891_v21 = vpop.permute.xlu2 %2174 }
 0x1ab   : > { %5260 = vst [vmem:[#allocation20_spill] sm:$0xff] %v3891_v21 }
 0x1ad   : > { %v3878_v11 = vpop.permute.xlu1 %1703 }
 0x1ae   : > { %v1750_v25 = vsel %vm756_vm0, %v3878_v11, 0  ;;  %v1747_v11 = vsel %vm756_vm0, %v3843_v22, 0  ;;  %v1744_v22 = vsel %vm756_vm0, %v1700_v45, 0  ;;  %v4027_v45 = vadd.s32 64, %v3903_v29 }
 0x1b0   : > { %5267 = vst [vmem:[#allocation27_spill] sm:$0xff] %v4027_v45  ;;  %vm636_vm9 = vcmp.ge.s32.totalorder %v4027_v45, %v3905_v30 }
 0x1b2   : > { %v3898_v24 = vpop.permute.xlu2 %1139 }
 0x1b4   : > { %539 = vmatmul.bf16.gmra.mxu2 %v3660_v7  ;;  %v1199_v7 = vsel %vm756_vm0, %v1154_v31, 0  ;;  %v3933_v31 = vadd.s32 16, %v3903_v29 }
 0x1b5   : > { %v3882_v1 = vpop.permute.xlu1 %2182 }
 0x1b6   : > { %vm630_vm3 = vcmp.ge.s32.totalorder %v3933_v31, %v3905_v30 }
 0x1ba   : > { %2808 = vmatmul.msk.bf16.gmra.mxu3 %vm756_vm0, %v3804_v47  ;;  %v1150_v36 = vpop.permute.xlu2 %1149 }
 0x1bb   : > { %v1193_v41 = vsel %vm756_vm0, %v1150_v36, 0  ;;  %v3997_v36 = vadd.s32 48, %v3903_v29 }
 0x1bd   : > { %v1158_v32 = vpop.permute.xlu1 %1157  ;;  %5265 = vst [vmem:[#allocation25_spill] sm:$0xff] %v3997_v36  ;;  %vm634_vm7 = vcmp.ge.s32.totalorder %v3997_v36, %v3905_v30 }
 0x1be   : > { %v1205_v4 = vsel %vm756_vm0, %v1158_v32, 0  ;;  %v1753_v32 = vsel %vm756_vm0, %v3869_v34, 0 }
 0x1bf   : > { %1207 = vmatpush.bf16.xpose.msrb.mxu1 %v1205_v4  ;;  %v3965_v4 = vadd.s32 32, %v3903_v29 }
 0x1c1   : > { %5263 = vst [vmem:[#allocation23_spill] sm:$0xff] %v3965_v4  ;;  %vm632_vm5 = vcmp.ge.s32.totalorder %v3965_v4, %v3905_v30 }
 0x1c5   : > { %v1146_v33 = vpop.permute.xlu1 %1145 }
 0x1c6   : > { %v1187_v60 = vsel %vm756_vm0, %v1146_v33, 0 }
 0x1c7   : > { %1208 = vmatpush.bf16.xpose.msrb.mxu1 %v1202_v20  ;;  %v3895_v23 = vpop.f32.mrf.mxu2 }
 0x1ca   : > { %2809 = vmatmul.msk.bf16.gmra.mxu3 %vm756_vm0, %v3856_v14 }
 0x1cd   : > { %v1148_v43 = vpop.permute.xlu1 %1147 }
 0x1ce   : > { %v1190_v49 = vsel %vm756_vm0, %v1148_v43, 0 }
 0x1cf   : > { %1209 = vmatpush.bf16.xpose.msrb.mxu1 %v1199_v7  ;;  %v3900_v26 = vpop.f32.mrf.mxu2 }
 0x1d7   : > { %1210 = vmatpush.bf16.xpose.msrb.mxu1 %v1196_v28  ;;  %v3909_v38 = vpop.f32.mrf.mxu2 }
 0x1dd   : > { %v814_v39 = vpop.f32.mrf.mxu3 }
 0x1de   : > { %v3914_v40 = vsel %vm628_vm1, %v814_v39, -inf }
 0x1df   : > { %870 = vmax.xlane.f32.xlu0 %v3914_v40  ;;  %1211 = vmatpush.bf16.xpose.msrb.mxu1 %v1193_v41  ;;  %v3923_v44 = vpop.f32.mrf.mxu2 }
 0x1e5   : > { %v816_v46 = vpop.f32.mrf.mxu3 }
 0x1e6   : > { %v3928_v48 = vsel %vm5234_vm2, %v816_v46, -inf  ;;  %v4013_v46 = vadd.s32 56, %v3903_v29 }
 0x1e7   : > { %872 = vmax.xlane.f32.xlu0 %v3928_v48  ;;  %1212 = vmatpush.bf16.xpose.msrb.mxu1 %v1190_v49  ;;  %v3937_v53 = vpop.f32.mrf.mxu2 }
 0x1e8   : > { %5266 = vst [vmem:[#allocation26_spill] sm:$0xff] %v4013_v46  ;;  %vm635_vm8 = vcmp.ge.s32.totalorder %v4013_v46, %v3905_v30 }
 0x1ed   : > { %v819_v5 = vpop.f32.mrf.mxu3 }
 0x1ee   : > { %v3944_v59 = vsel %vm630_vm3, %v819_v5, -inf  ;;  %v1698_v5 = vpop.permute.xlu1 %1697 }
 0x1ef   : > { %874 = vmax.xlane.f32.xlu1 %v3944_v59  ;;  %1213 = vmatpush.bf16.xpose.msrb.mxu1 %v1187_v60  ;;  %v3953_v0 = vpop.f32.mrf.mxu2  ;;  %v1741_v62 = vsel %vm756_vm0, %v1698_v5, 0 }
 0x1f5   : > { %v821_v2 = vpop.f32.mrf.mxu3 }
 0x1f6   : > { %v3958_v6 = vsel %vm631_vm4, %v821_v2, -inf }
 0x1f7   : > { %876 = vmax.xlane.f32.xlu1 %v3958_v6  ;;  %1214 = vmatpush.bf16.xpose.msrb.mxu1 %v1184_v12  ;;  %v3969_v20 = vpop.f32.mrf.mxu2 }
 0x1fd   : > { %v824_v7 = vpop.f32.mrf.mxu3 }
 0x1fe   : > { %2810 = vmatmul.msk.bf16.vlgmr.msrb.gmra.mxu1 %vm756_vm0, %v3827_v37  ;;  %v3976_v34 = vsel %vm632_vm5, %v824_v7, -inf  ;;  %v1738_v7 = vsel %vm756_vm0, %v3887_v19, 0  ;;  %v4055_v19 = vadd.s32 80, %v3903_v29 }
 0x1ff   : > { %1755 = vmatpush.bf16.xpose.msra.mxu1 %v1753_v32  ;;  %878 = vmax.xlane.f32.xlu2 %v3976_v34  ;;  %v3986_v28 = vpop.f32.mrf.mxu2 }
 0x200   : > { %5269 = vst [vmem:[#allocation29_spill] sm:$0xff] %v4055_v19  ;;  %vm638_vm11 = vcmp.ge.s32.totalorder %v4055_v19, %v3905_v30 }
 0x205   : > { %v826_v37 = vpop.f32.mrf.mxu3 }
 0x206   : > { %v3991_v33 = vsel %vm633_vm6, %v826_v37, -inf }
 0x207   : > { %1756 = vmatpush.bf16.xpose.msra.mxu1 %v1750_v25  ;;  %880 = vmax.xlane.f32.xlu2 %v3991_v33  ;;  %v4001_v39 = vpop.f32.mrf.mxu2  ;;  %v4042_v25 = vadd.s32 72, %v3903_v29 }
 0x209   : > { %5268 = vst [vmem:[#allocation28_spill] sm:$0xff] %v4042_v25  ;;  %vm637_vm10 = vcmp.ge.s32.totalorder %v4042_v25, %v3905_v30 }
 0x20d   : > { %v829_v41 = vpop.f32.mrf.mxu3 }
 0x20e   : > { %2811 = vmatmul.msk.bf16.gmra.mxu1 %vm756_vm0, %v3854_v13  ;;  %v4008_v43 = vsel %vm634_vm7, %v829_v41, -inf  ;;  %v1735_v41 = vsel %vm756_vm0, %v3874_v17, 0 }
 0x20f   : > { %1757 = vmatpush.bf16.xpose.msra.mxu1 %v1747_v11  ;;  %882 = vmax.xlane.f32.xlu0 %v4008_v43  ;;  %v4017_v49 = vpop.f32.mrf.mxu2 }
 0x215   : > { %v831_v13 = vpop.f32.mrf.mxu3 }
 0x216   : > { %v4022_v60 = vsel %vm635_vm8, %v831_v13, -inf  ;;  %v1692_v13 = vpop.permute.xlu0 %1691 }
 0x217   : > { %1758 = vmatpush.bf16.xpose.msra.mxu1 %v1744_v22  ;;  %884 = vmax.xlane.f32.xlu1 %v4022_v60  ;;  %v530_v2 = vpop.f32.mrf.mxu2  ;;  %v1732_v17 = vsel %vm756_vm0, %v1692_v13, 0 }
 0x21d   : > { %v834_v12 = vpop.f32.mrf.mxu3 }
 0x21e   : > { %2812 = vmatmul.msk.bf16.gmra.mxu1 %vm756_vm0, %v3836_v35  ;;  %v4036_v32 = vsel %vm636_vm9, %v834_v12, -inf  ;;  %v4069_v12 = vadd.s32 88, %v3903_v29 }
 0x21f   : > { %1759 = vmatpush.bf16.xpose.msra.mxu1 %v1741_v62  ;;  %886 = vmax.xlane.f32.xlu1 %v4036_v32  ;;  %v532_v37 = vpop.f32.mrf.mxu2 }
 0x220   : > { %5270 = vst [vmem:[#allocation30_spill] sm:$0xff] %v4069_v12  ;;  %vm639_vm12 = vcmp.ge.s32.totalorder %v4069_v12, %v3905_v30 }
 0x225   : > { %v836_v11 = vpop.f32.mrf.mxu3 }
 0x226   : > { %v4049_v35 = vsel %vm637_vm10, %v836_v11, -inf }
 0x227   : > { %1760 = vmatpush.bf16.xpose.msra.mxu1 %v1738_v7  ;;  %888 = vmax.xlane.f32.xlu2 %v4049_v35  ;;  %v535_v22 = vpop.f32.mrf.mxu2 }
 0x22d   : > { %v839_v5 = vpop.f32.mrf.mxu3 }
 0x22e   : > { %2813 = vmatmul.msk.bf16.gmra.mxu1 %vm756_vm0, %v3846_v57  ;;  %v4064_v62 = vsel %vm638_vm11, %v839_v5, -inf  ;;  %v394_v5 = vperm.slane %v3669_v8, 2 }
 0x22f   : > { %1761 = vmatpush.bf16.xpose.msra.mxu1 %v1735_v41  ;;  %890 = vmax.xlane.f32.xlu2 %v4064_v62  ;;  %v537_v7 = vpop.f32.mrf.mxu2  ;;  %v4080_v41 = vadd.s32 96, %v3903_v29 }
 0x230   : > { %v536_v8 = vadd.f32 %v535_v22, %v394_v5  ;;  %v538_v10 = vadd.f32 %v537_v7, %v394_v5  ;;  %v531_v19 = vadd.f32 %v530_v2, %v394_v5  ;;  %v526_v22 = vadd.f32 %v4001_v39, %v394_v5 }
 0x231   : > { %5271 = vst [vmem:[#allocation31_spill] sm:$0xff] %v4080_v41  ;;  %vm640_vm13 = vcmp.ge.s32.totalorder %v4080_v41, %v3905_v30  ;;  %v521_v46 = vadd.f32 %v3969_v20, %v394_v5 }
 0x232   : > { %v605_v25 = vpack.c.bf16 %v536_v8, %v536_v8  ;;  %v606_v36 = vpack.c.bf16 %v538_v10, %v538_v10  ;;  %v603_v2 = vpack.c.bf16 %v531_v19, %v531_v19  ;;  %v601_v63 = vpack.c.bf16 %v526_v22, %v526_v22 }
 0x233   : > { %v513_v22 = vadd.f32 %v3923_v44, %v394_v5 }
 0x234   : > { %v1051_v8 = vunpack.c.l.b16 %v606_v36  ;;  %v516_v36 = vadd.f32 %v3937_v53, %v394_v5  ;;  %v1046_v20 = vunpack.c.l.b16 %v601_v63  ;;  %v506_v63 = vadd.f32 %v3895_v23, %v394_v5 }
 0x235   : > { %v841_v11 = vpop.f32.mrf.mxu3 }
 0x236   : > { %v4076_v57 = vsel %vm639_vm12, %v841_v11, -inf }
 0x237   : > { %1762 = vmatpush.bf16.xpose.msra.mxu1 %v1732_v17  ;;  %892 = vmax.xlane.f32.xlu0 %v4076_v57  ;;  %v540_v13 = vpop.f32.mrf.mxu2  ;;  %v1136_v17 = vpop.permute.xlu0 %1135 }
 0x238   : > { %v541_v55 = vadd.f32 %v540_v13, %v394_v5 }
 0x23a   : > { %v607_v12 = vpack.c.bf16 %v541_v55, %v541_v55  ;;  %v528_v55 = vadd.f32 %v4017_v49, %v394_v5  ;;  %v599_v49 = vpack.c.bf16 %v521_v46, %v521_v46  ;;  %v596_v46 = vpack.c.bf16 %v513_v22, %v513_v22 }
 0x23c   : > { %v1052_v14 = vunpack.c.l.b16 %v607_v12  ;;  %v602_v12 = vpack.c.bf16 %v528_v55, %v528_v55  ;;  %v597_v55 = vpack.c.bf16 %v516_v36, %v516_v36 }
 0x23d   : > { %v844_v16 = vpop.f32.mrf.mxu3 }
 0x23e   : > { %2814 = vmatmul.msk.bf16.gmra.mxu1 %vm756_vm0, %v1136_v17  ;;  %v4089_v11 = vsel %vm640_vm13, %v844_v16, -inf  ;;  %v533_v17 = vadd.f32 %v532_v37, %v394_v5  ;;  %v1050_v37 = vunpack.c.l.b16 %v605_v25  ;;  %v1047_v19 = vunpack.c.l.b16 %v602_v12 }
 0x23f   : > { %894 = vmax.xlane.f32.xlu0 %v4089_v11  ;;  %v542_v45 = vpop.f32.mrf.mxu2  ;;  %v1041_v12 = vunpack.c.l.b16 %v596_v46 }
 0x240   : > { %v543_v41 = vadd.f32 %v542_v45, %v394_v5  ;;  %v604_v7 = vpack.c.bf16 %v533_v17, %v533_v17  ;;  %v4109_v39 = vpack.c.b16 %v1051_v8, %v1050_v37  ;;  %v4119_v17 = vpop.permute.xlu0 %2184  ;;  %v1042_v37 = vunpack.c.l.b16 %v597_v55 }
 0x241   : > { %v4155_v55 = vadd.s32 112, %v3903_v29  ;;  %v2232_v4 = vsel %vm756_vm0, %v4119_v17, 0 }
 0x242   : > { %v608_v13 = vpack.c.bf16 %v543_v41, %v543_v41  ;;  %v1048_v41 = vunpack.c.l.b16 %v603_v2  ;;  %v1049_v21 = vunpack.c.l.b16 %v604_v7  ;;  %v1044_v2 = vunpack.c.l.b16 %v599_v49 }
 0x243   : > { %v4123_v7 = vpack.c.b16 %v1047_v19, %v1046_v20  ;;  %5273 = vst [vmem:[#allocation33_spill] sm:$0xff] %v4155_v55  ;;  %vm5243_vm15 = vcmp.ge.s32.totalorder %v4155_v55, %v3905_v30 }
 0x244   : > { %v1053_v10 = vunpack.c.l.b16 %v608_v13  ;;  %v511_v13 = vadd.f32 %v3909_v38, %v394_v5  ;;  %v593_v38 = vpack.c.bf16 %v506_v63, %v506_v63 }
 0x245   : > { %v846_v16 = vpop.f32.mrf.mxu3 }
 0x246   : > { %v4100_v15 = vsel %vm641_vm14, %v846_v16, -inf  ;;  %v4105_v45 = vpack.c.b16 %v1053_v10, %v1052_v14  ;;  %v523_v16 = vadd.f32 %v3986_v28, %v394_v5  ;;  %v518_v14 = vadd.f32 %v3953_v0, %v394_v5 }
 0x247   : > { %896 = vmax.xlane.f32.xlu1 %v4100_v15  ;;  %v4116_v28 = vpack.c.b16 %v1049_v21, %v1048_v41  ;;  %v508_v21 = vadd.f32 %v3900_v26, %v394_v5  ;;  %v595_v0 = vpack.c.bf16 %v511_v13, %v511_v13  ;;  %v1038_v23 = vunpack.c.l.b16 %v593_v38 }
 0x248   : > { %1070 = vmatpush.bf16.msra.mxu0 %v4105_v45  ;;  %v600_v25 = vpack.c.bf16 %v523_v16, %v523_v16  ;;  %v4134_v36 = vpop.permute.xlu0 %2172  ;;  %v4177_v38 = vadd.s32 120, %v3903_v29 }
 0x249   : > { %v594_v44 = vpack.c.bf16 %v508_v21, %v508_v21  ;;  %v1040_v16 = vunpack.c.l.b16 %v595_v0 }
 0x24a   : > { %v1045_v53 = vunpack.c.l.b16 %v600_v25  ;;  %5274 = vst [vmem:[#allocation34_spill] sm:$0xff] %v4177_v38 }
 0x24b   : > { %v1039_v26 = vunpack.c.l.b16 %v594_v44  ;;  %v4138_v5 = vpack.c.b16 %v1041_v12, %v1040_v16 }
 0x24c   : > { %1071 = vmatpush.bf16.msra.mxu0 %v4109_v39  ;;  %v4128_v10 = vpack.c.b16 %v1045_v53, %v1044_v2 }
 0x24d   : > { %v849_v2 = vpop.f32.mrf.mxu3 }
 0x24e   : > { %2815 = vmatmul.msk.bf16.gmra.mxu1 %vm756_vm0, %v3880_v18  ;;  %v598_v18 = vpack.c.bf16 %v518_v14, %v518_v14  ;;  %v4141_v14 = vpack.c.b16 %v1039_v26, %v1038_v23 }
 0x250   : > { %1072 = vmatpush.bf16.msra.mxu0 %v4116_v28  ;;  %v1043_v8 = vunpack.c.l.b16 %v598_v18  ;;  %v4144_v49 = vpop.permute.xlu0 %2176 }
 0x252   : > { %v4131_v41 = vpack.c.b16 %v1043_v8, %v1042_v37 }
 0x254   : > { %1073 = vmatpush.bf16.msra.mxu0 %v4123_v7 }
 0x255   : > { %v851_v16 = vpop.f32.mrf.mxu3 }
 0x258   : > { %1074 = vmatpush.bf16.msra.mxu0 %v4128_v10  ;;  %v1142_v25 = vpop.permute.xlu0 %1141 }
 0x25c   : > { %1075 = vmatpush.bf16.msra.mxu0 %v4131_v41 }
 0x25e   : > { %2816 = vmatmul.msk.bf16.gmra.mxu1 %vm756_vm0, %v3898_v24 }
 0x260   : > { %1076 = vmatpush.bf16.msra.mxu0 %v4138_v5  ;;  %v871_v20 = vpop.xlane.xlu0 %870 }
 0x261   : > { %v902_v18 = vsub.f32 %v3914_v40, %v871_v20  ;;  %v4170_v40 = vsel %vm5243_vm15, %v849_v2, -inf }
 0x262   : > { %v875_v19 = vpop.xlane.xlu1 %874 }
 0x263   : > { %v918_v53 = vmul.f32 1.442695, %v902_v18 }
 0x264   : > { %1077 = vmatpush.bf16.msra.mxu0 %v4141_v14 }
 0x265   : > { %2984 = vpow2.f32 %v918_v53 }
 0x268   : > { %v873_v63 = vpop.xlane.xlu0 %872 }
 0x269   : > { %v903_v18 = vsub.f32 %v3928_v48, %v873_v63 }
 0x26a   : > { %v877_v21 = vpop.xlane.xlu1 %876 }
 0x26b   : > { %v920_v53 = vmul.f32 1.442695, %v903_v18 }
 0x26e   : > { %2817 = vmatmul.msk.bf16.gmra.mxu1 %vm756_vm0, %v1142_v25  ;;  %v4181_v25 = vpop.eup %2984 }
 0x272   : > { %v879_v24 = vpop.xlane.xlu2 %878 }
 0x27a   : > { %v881_v0 = vpop.xlane.xlu2 %880 }
 0x27b   : > { %v1216_v13 = vpop.f32.mrf.mxu1  ;;  %v907_v8 = vsub.f32 %v3991_v33, %v881_v0  ;;  %v906_v33 = vsub.f32 %v3976_v34, %v879_v24 }
 0x27c   : > { %v4151_v22 = vsel %vm628_vm1, %v1216_v13, -inf }
 0x27d   : > { %1272 = vmax.xlane.f32.xlu0 %v4151_v22  ;;  %v928_v12 = vmul.f32 1.442695, %v907_v8  ;;  %v926_v34 = vmul.f32 1.442695, %v906_v33 }
 0x27e   : > { %2834 = vmatmul.msk.bf16.vlgmr.msra.gmra.mxu1 %vm756_vm0, %v3824_v50  ;;  %v905_v50 = vsub.f32 %v3958_v6, %v877_v21 }
 0x280   : > { %v924_v44 = vmul.f32 1.442695, %v905_v50 }
 0x282   : > { %v883_v23 = vpop.xlane.xlu0 %882  ;;  %2986 = vpow2.f32 %v924_v44 }
 0x283   : > { %v1218_v46 = vpop.f32.mrf.mxu1  ;;  %2988 = vpow2.f32 %v928_v12  ;;  %v908_v13 = vsub.f32 %v4008_v43, %v883_v23 }
 0x284   : > { %v4165_v37 = vsel %vm5234_vm2, %v1218_v46, -inf  ;;  %vm643_vm2 = vcmp.ge.s32.totalorder %v4177_v38, %v3905_v30  ;;  %2990 = vpow2.f32 %v926_v34 }
 0x285   : > { %1274 = vmax.xlane.f32.xlu2 %v4165_v37  ;;  %898 = vmax.xlane.f32.xlu0 %v4170_v40  ;;  %v4194_v20 = vsel %vm643_vm2, %v851_v16, -inf  ;;  %v930_v24 = vmul.f32 1.442695, %v908_v13 }
 0x287   : > { %2992 = vpow2.f32 %v930_v24 }
 0x288   : > { %v4201_v2 = vpop.eup %2986  ;;  %2994 = vpow2.f32 %v920_v53 }
 0x289   : > { %v4203_v0 = vpop.eup %2988 }
 0x28a   : > { %v4214_v48 = vpop.eup %2990  ;;  %v885_v16 = vpop.xlane.xlu1 %884 }
 0x28b   : > { %v1221_v26 = vpop.f32.mrf.mxu1 }
 0x28c   : > { %v4186_v6 = vsel %vm630_vm3, %v1221_v26, -inf  ;;  %v909_v26 = vsub.f32 %v4022_v60, %v885_v16  ;;  %v647_v16 = vld [vmem:[#allocation8 + $0x18] sm:$0xff] }
 0x28d   : > { %950 = vadd.xlane.f32.xlu2 %v4181_v25  ;;  %1276 = vmax.xlane.f32.xlu1 %v4186_v6  ;;  %v4216_v63 = vpop.eup %2992 }
 0x28e   : > { %900 = vmax.xlane.f32.xlu0 %v4194_v20  ;;  %2835 = vmatmul.msk.bf16.gmra.mxu1 %vm756_vm0, %v3862_v9  ;;  %v904_v9 = vsub.f32 %v3944_v59, %v875_v19  ;;  %v4218_v50 = vpop.eup %2994 }
 0x290   : > { %v922_v43 = vmul.f32 1.442695, %v904_v9 }
 0x292   : > { %2996 = vpow2.f32 %v922_v43  ;;  %v887_v18 = vpop.xlane.xlu1 %886 }
 0x293   : > { %v1223_v21 = vpop.f32.mrf.mxu1  ;;  %v910_v24 = vsub.f32 %v4036_v32, %v887_v18  ;;  %v645_v18 = vld [vmem:[#allocation8 + $0x8] sm:$0xff] }
 0x294   : > { %v4208_v46 = vsel %vm631_vm4, %v1223_v21, -inf }
 0x295   : > { %5275 = vst [vmem:[#allocation35_spill] sm:$0xff] %v4208_v46  ;;  %960 = vadd.xlane.f32.xlu2 %v4203_v0  ;;  %956 = vadd.xlane.f32.xlu1 %v4201_v2  ;;  %v934_v21 = vmul.f32 1.442695, %v910_v24 }
 0x296   : > { %1278 = vmax.xlane.f32.xlu0 %v4208_v46 }
 0x298   : > { %v4230_v19 = vpop.eup %2996 }
 0x29b   : > { %v1226_v8 = vpop.f32.mrf.mxu1 }
 0x29c   : > { %v4228_v59 = vsel %vm632_vm5, %v1226_v8, -inf }
 0x29d   : > { %962 = vadd.xlane.f32.xlu2 %v4216_v63  ;;  %958 = vadd.xlane.f32.xlu1 %v4214_v48  ;;  %5276 = vst [vmem:[#allocation36_spill] sm:$0xff] %v4228_v59 }
 0x29e   : > { %952 = vadd.xlane.f32.xlu0 %v4218_v50  ;;  %2836 = vmatmul.msk.bf16.gmra.mxu1 %vm756_vm0, %v3839_v51  ;;  %v889_v51 = vpop.xlane.xlu2 %888 }
 0x29f   : > { %v911_v44 = vsub.f32 %v4049_v35, %v889_v51 }
 0x2a1   : > { %v936_v23 = vmul.f32 1.442695, %v911_v44  ;;  %v646_v44 = vld [vmem:[#allocation8 + $0x10] sm:$0xff] }
 0x2a3   : > { %2998 = vpow2.f32 %v936_v23  ;;  %v1228_v60 = vpop.f32.mrf.mxu1  ;;  %v662_v23 = vpack.c.bf16 %v646_v44, %v646_v44 }
 0x2a5   : > { %1280 = vmax.xlane.f32.xlu1 %v4228_v59 }
 0x2a6   : > { %954 = vadd.xlane.f32.xlu0 %v4230_v19  ;;  %v891_v33 = vpop.xlane.xlu2 %890 }
 0x2a7   : > { %v912_v13 = vsub.f32 %v4064_v62, %v891_v33  ;;  %v4258_v62 = vsel %vm633_vm6, %v1228_v60, -inf  ;;  %v1596_v33 = vunpack.c.l.b16 %v662_v23 }
 0x2a9   : > { %v938_v53 = vmul.f32 1.442695, %v912_v13  ;;  %v644_v13 = vld [vmem:[#allocation8] sm:$0xff] }
 0x2aa   : > { %v4243_v12 = vpop.xlane.xlu0 %892  ;;  %v660_v24 = vpack.c.bf16 %v644_v13, %v644_v13 }
 0x2ae   : > { %2837 = vmatmul.msk.bf16.gmra.mxu1 %vm756_vm0, %v3867_v56  ;;  %v932_v56 = vmul.f32 1.442695, %v909_v26  ;;  %v663_v26 = vpack.c.bf16 %v647_v16, %v647_v16 }
 0x2b0   : > { %3000 = vpow2.f32 %v932_v56  ;;  %v1597_v56 = vunpack.c.l.b16 %v663_v26 }
 0x2b1   : > { %3002 = vpow2.f32 %v938_v53  ;;  %v661_v53 = vpack.c.bf16 %v645_v18, %v645_v18 }
 0x2b2   : > { %v895_v34 = vpop.xlane.xlu0 %894  ;;  %3004 = vpow2.f32 %v934_v21 }
 0x2b3   : > { %v914_v35 = vsub.f32 %v4089_v11, %v895_v34  ;;  %v1599_v34 = vpack.c.b16 %v1597_v56, %v1596_v33  ;;  %v1595_v59 = vunpack.c.l.b16 %v661_v53 }
 0x2b5   : > { %1683 = vrot.lane.b32.xlu2 %v3747_v3, %s3445_s28  ;;  %v942_v43 = vmul.f32 1.442695, %v914_v35  ;;  %1632 = vmatpush.bf16.msrb.mxu0 %v1599_v34 }
 0x2b7   : > { %3006 = vpow2.f32 %v942_v43  ;;  %v1594_v43 = vunpack.c.l.b16 %v660_v24 }
 0x2b9   : > { %v1598_v27 = vpack.c.b16 %v1595_v59, %v1594_v43  ;;  %v4292_v59 = vpop.f32.mrf.mxu1 }
 0x2ba   : > { %2162 = vrot.lane.b32.xlu0 %v3747_v3, %s3443_s24  ;;  %v4247_v3 = vpop.eup %2998  ;;  %v897_v23 = vpop.xlane.xlu1 %896 }
 0x2bb   : > { %v4252_v9 = vpop.eup %3000  ;;  %1633 = vmatpush.bf16.msrb.mxu0 %v1598_v27 }
 0x2bc   : > { %v4261_v32 = vpop.eup %3002 }
 0x2bd   : > { %v4264_v11 = vpop.eup %3004 }
 0x2be   : > { %1685 = vrot.lane.b32.xlu1 %v3784_v52, %s3445_s28  ;;  %v4267_v8 = vpop.eup %3006 }
 0x2c1   : > { %v1233_v53 = vpop.f32.mrf.mxu1 }
 0x2de   : > { %968 = vadd.xlane.f32.xlu2 %v4247_v3 }
 0x2e4   : > { %964 = vadd.xlane.f32.xlu0 %v4252_v9 }
 0x2e6   : > { %1282 = vmax.xlane.f32.xlu2 %v4258_v62 }
 0x2e8   : > { %970 = vadd.xlane.f32.xlu1 %v4261_v32 }
 0x2ec   : > { %966 = vadd.xlane.f32.xlu0 %v4264_v11 }
 0x2ee   : > { %974 = vadd.xlane.f32.xlu2 %v4267_v8 }
 0x2f0   : > { %v4270_v51 = vpop.xlane.xlu0 %1272 }
 0x2f8   : > { %v4272_v35 = vpop.xlane.xlu2 %1274  ;;  %v899_v21 = vpop.xlane.xlu0 %898 }
 0x2f9   : > { %v916_v60 = vsub.f32 %v4170_v40, %v899_v21 }
 0x2fb   : > { %v946_v46 = vmul.f32 1.442695, %v916_v60 }
 0x2fd   : > { %3008 = vpow2.f32 %v946_v46 }
 0x300   : > { %1438 = vrot.lane.b32.xlu0 %v4105_v45, %s3444_s29  ;;  %v951_v44 = vpop.xlane.xlu2 %950  ;;  %v4288_v46 = vpop.xlane.xlu1 %1276 }
 0x301   : > { %v4277_v16 = vpop.xlane.xlu0 %900  ;;  %3010 = vrcp.f32 %v951_v44  ;;  %v4305_v44 = vpop.f32.mrf.mxu1 }
 0x303   : > { %v4279_v26 = vpop.eup %3008 }
 0x304   : > { %978 = vadd.xlane.f32.xlu1 %v4279_v26 }
 0x306   : > { %1430 = vrot.lane.b32.xlu2 %v4128_v10, %s3444_s29 }
 0x307   : > { %v3011_v18 = vpop.eup %3010 }
 0x308   : > { %1436 = vrot.lane.b32.xlu0 %v4109_v39, %s3444_s29  ;;  %v961_v40 = vpop.xlane.xlu2 %960  ;;  %v957_v13 = vpop.xlane.xlu1 %956  ;;  %v998_v21 = vmul.f32 %v3011_v18, %v4181_v25  ;;  %v2229_v25 = vsel %vm756_vm0, %v3882_v1, 0  ;;  %v1304_v18 = vsub.f32 %v4151_v22, %v4270_v51  ;;  %v2226_v1 = vsel %vm756_vm0, %v3848_v58, 0 }
 0x309   : > { %v4286_v27 = vpop.xlane.xlu0 %1278 }
 0x30a   : > { %5277 = vst [vmem:[#allocation37_spill] sm:$0xff] %v4286_v27 }
 0x30e   : > { %1687 = vrot.lane.b32.xlu2 %v3804_v47, %s3445_s28 }
 0x310   : > { %1434 = vrot.lane.b32.xlu0 %v4116_v28, %s3444_s29  ;;  %v4296_v33 = vpop.xlane.xlu2 %962  ;;  %v959_v61 = vpop.xlane.xlu1 %958 }
 0x311   : > { %v953_v56 = vpop.xlane.xlu0 %952 }
 0x312   : > { %3012 = vrcp.f32 %v953_v56 }
 0x318   : > { %v1684_v34 = vpop.permute.xlu2 %1683  ;;  %v3013_v24 = vpop.eup %3012 }
 0x319   : > { %2838 = vmatmul.msk.bf16.gmra.mxu1 %vm756_vm0, %v1684_v34  ;;  %v999_v60 = vmul.f32 %v3013_v24, %v4218_v50  ;;  %v955_v43 = vpop.xlane.xlu0 %954  ;;  %v4311_v17 = vpop.xlane.xlu1 %1280 }
 0x31a   : > { %3014 = vrcp.f32 %v955_v43 }
 0x31b   : > { %v1014_v27 = vpack.c.bf16 %v999_v60, %v998_v21  ;;  %3016 = vrcp.f32 %v957_v13  ;;  %v1320_v13 = vmul.f32 1.442695, %v1304_v18  ;;  %v4317_v21 = vpop.f32.mrf.mxu1  ;;  %v5278_v18 = vld [vmem:[#allocation20_spill] sm:$0xff] }
 0x31c   : > { %3018 = vrcp.f32 %v959_v61 }
 0x31d   : > { %1078 = vmatmul.bf16.vlgmr.msra.gmra.mxu0 %v1014_v27  ;;  %1432 = vrot.lane.b32.xlu1 %v4123_v7, %s3444_s29  ;;  %3020 = vpow2.f32 %v1320_v13  ;;  %v5280_v13 = vld [vmem:[#allocation17_spill] sm:$0xff] }
 0x31e   : > { %2234 = vmatpush.bf16.xpose.msra.mxu0 %v2232_v4  ;;  %v913_v4 = vsub.f32 %v4076_v57, %v4243_v12  ;;  %3022 = vrcp.f32 %v961_v40  ;;  %v2223_v12 = vsel %vm756_vm0, %v3821_v54, 0 }
 0x320   : > { %v3015_v56 = vpop.eup %3014  ;;  %v940_v60 = vmul.f32 1.442695, %v913_v4 }
 0x321   : > { %v3017_v50 = vpop.eup %3016  ;;  %v1000_v27 = vmul.f32 %v3015_v56, %v4230_v19  ;;  %v2220_v56 = vsel %vm756_vm0, %v4144_v49, 0 }
 0x322   : > { %v1001_v34 = vmul.f32 %v3017_v50, %v4201_v2  ;;  %3024 = vpow2.f32 %v940_v60  ;;  %v915_v2 = vsub.f32 %v4100_v15, %v897_v23  ;;  %v3019_v57 = vpop.eup %3018  ;;  %v917_v23 = vsub.f32 %v4194_v20, %v4277_v16 }
 0x323   : > { %v4323_v19 = vpop.eup %3020  ;;  %v4328_v58 = vpop.f32.mrf.mxu1  ;;  %v1002_v61 = vmul.f32 %v3019_v57, %v4214_v48  ;;  %v4349_v20 = vsel %vm635_vm8, %v1233_v53, -inf }
 0x324   : > { %v1015_v24 = vpack.c.bf16 %v1001_v34, %v1000_v27  ;;  %v3023_v51 = vpop.eup %3022  ;;  %v944_v43 = vmul.f32 1.442695, %v915_v2  ;;  %v2214_v34 = vsel %vm756_vm0, %v4134_v36, 0 }
 0x325   : > { %v1003_v15 = vmul.f32 %v3023_v51, %v4203_v0  ;;  %v2217_v0 = vsel %vm756_vm0, %v5278_v18, 0 }
 0x326   : > { %2235 = vmatpush.bf16.xpose.msra.mxu0 %v2229_v25  ;;  %3026 = vpow2.f32 %v944_v43  ;;  %v948_v25 = vmul.f32 1.442695, %v917_v23 }
 0x327   : > { %v1016_v54 = vpack.c.bf16 %v1003_v15, %v1002_v61 }
 0x328   : > { %v4331_v40 = vpop.eup %3024  ;;  %3028 = vpow2.f32 %v948_v25 }
 0x329   : > { %3030 = vrcp.f32 %v4296_v33 }
 0x32b   : > { %v4341_v48 = vpop.f32.mrf.mxu1 }
 0x32c   : > { %v4339_v50 = vpop.eup %3026  ;;  %v4359_v4 = vpop.permute.xlu0 %2162 }
 0x32d   : > { %1083 = vmatmul.bf16.gmra.mxu0 %v1015_v24 }
 0x32e   : > { %2236 = vmatpush.bf16.xpose.msra.mxu0 %v2226_v1  ;;  %v4352_v49 = vpop.eup %3028  ;;  %v5281_v1 = vld [vmem:[#allocation18_spill] sm:$0xff] }
 0x32f   : > { %v2211_v60 = vsel %vm756_vm0, %v5281_v1, 0  ;;  %v3031_v36 = vpop.eup %3030 }
 0x330   : > { %v1686_v22 = vpop.permute.xlu1 %1685 }
 0x331   : > { %2839 = vmatmul.msk.bf16.gmra.mxu1 %vm756_vm0, %v1686_v22 }
 0x333   : > { %v4355_v16 = vpop.f32.mrf.mxu1 }
 0x336   : > { %2237 = vmatpush.bf16.xpose.msra.mxu0 %v2223_v12  ;;  %v1004_v12 = vmul.f32 %v3031_v36, %v4216_v63 }
 0x337   : > { %1352 = vadd.xlane.f32.xlu2 %v4323_v19 }
 0x33a   : > { %972 = vadd.xlane.f32.xlu0 %v4331_v40 }
 0x33b   : > { %v4363_v53 = vpop.f32.mrf.mxu1 }
 0x33d   : > { %1088 = vmatmul.bf16.gmra.mxu0 %v1016_v54 }
 0x33e   : > { %2238 = vmatpush.bf16.xpose.msra.mxu0 %v2220_v56 }
 0x342   : > { %976 = vadd.xlane.f32.xlu0 %v4339_v50 }
 0x343   : > { %v1251_v43 = vpop.f32.mrf.mxu1 }
 0x346   : > { %2239 = vmatpush.bf16.xpose.msra.mxu0 %v2217_v0 }
 0x347   : > { %1286 = vmax.xlane.f32.xlu1 %v4349_v20 }
 0x34a   : > { %980 = vadd.xlane.f32.xlu0 %v4352_v49 }
 0x34e   : > { %2240 = vmatpush.bf16.xpose.msra.mxu0 %v2214_v34 }
 0x34f   : > { %1689 = vrot.lane.b32.xlu2 %v5280_v13, %s3445_s28 }
 0x351   : > { %v969_v24 = vpop.xlane.xlu2 %968 }
 0x356   : > { %2241 = vmatpush.bf16.xpose.msra.mxu0 %v2211_v60  ;;  %v1305_v60 = vsub.f32 %v4165_v37, %v4272_v35  ;;  %v4411_v35 = vsel %vm637_vm10, %v4317_v21, -inf }
 0x357   : > { %v965_v22 = vpop.xlane.xlu0 %964 }
 0x358   : > { %3032 = vrcp.f32 %v965_v22  ;;  %v1322_v36 = vmul.f32 1.442695, %v1305_v60 }
 0x359   : > { %v4368_v2 = vpop.xlane.xlu2 %1282 }
 0x35e   : > { %v3033_v57 = vpop.eup %3032  ;;  %2164 = vrot.lane.b32.xlu0 %v3784_v52, %s3443_s24  ;;  %v4378_v52 = vpop.f32.mrf.mxu1 }
 0x35f   : > { %v1005_v51 = vmul.f32 %v3033_v57, %v4252_v9  ;;  %v967_v61 = vpop.xlane.xlu0 %966 }
 0x360   : > { %1428 = vrot.lane.b32.xlu1 %v4131_v41, %s3444_s29  ;;  %3034 = vrcp.f32 %v967_v61 }
 0x361   : > { %v975_v33 = vpop.xlane.xlu2 %974  ;;  %v1017_v15 = vpack.c.bf16 %v1005_v51, %v1004_v12  ;;  %3036 = vrcp.f32 %v969_v24  ;;  %v4401_v12 = vsel %vm634_vm7, %v4292_v59, -inf }
 0x362   : > { %3038 = vpow2.f32 %v1322_v36  ;;  %v4452_v36 = vsel %vm636_vm9, %v4305_v44, -inf }
 0x363   : > { %1093 = vmatmul.bf16.gmra.mxu0 %v1017_v15 }
 0x366   : > { %v3035_v54 = vpop.eup %3034  ;;  %v1764_v34 = vpop.f32.mrf.mxu1 }
 0x367   : > { %v3037_v63 = vpop.eup %3036  ;;  %v1006_v9 = vmul.f32 %v3035_v54, %v4264_v11  ;;  %v4386_v24 = vsel %vm628_vm1, %v1764_v34, -inf  ;;  %v971_v11 = vpop.xlane.xlu1 %970 }
 0x368   : > { %1424 = vrot.lane.b32.xlu1 %v4141_v14, %s3444_s29  ;;  %v1007_v56 = vmul.f32 %v3037_v63, %v4247_v3  ;;  %v4392_v3 = vsel %vm5243_vm15, %v1251_v43, -inf  ;;  %v4404_v43 = vpop.eup %3038  ;;  %3040 = vrcp.f32 %v971_v11  ;;  %vm5289_vm15 = vcmp.ge.s32.totalorder %v3919_v42, %v3905_v30 }
 0x369   : > { %v1431_v23 = vpop.permute.xlu2 %1430 }
 0x36a   : > { %v1018_v18 = vpack.c.bf16 %v1007_v56, %v1006_v9 }
 0x36e   : > { %v3041_v15 = vpop.eup %3040 }
 0x36f   : > { %v1008_v63 = vmul.f32 %v3041_v15, %v4261_v32  ;;  %v4463_v15 = vsel %vm638_vm11, %v4328_v58, -inf  ;;  %v1309_v58 = vsub.f32 %v4258_v62, %v4368_v2 }
 0x371   : > { %v1688_v25 = vpop.permute.xlu2 %1687 }
 0x372   : > { %v1439_v0 = vpop.permute.xlu0 %1438  ;;  %2840 = vmatmul.msk.bf16.gmra.mxu1 %vm756_vm0, %v1688_v25 }
 0x373   : > { %1098 = vmatmul.bf16.gmra.mxu0 %v1018_v18  ;;  %1448 = vmatpush.bf16.msrb.mxu2 %v1439_v0 }
 0x377   : > { %v979_v51 = vpop.xlane.xlu1 %978 }
 0x378   : > { %1820 = vmax.xlane.f32.xlu2 %v4386_v24 }
 0x37a   : > { %v1437_v1 = vpop.permute.xlu0 %1436 }
 0x37b   : > { %1449 = vmatpush.bf16.msrb.mxu2 %v1437_v1 }
 0x380   : > { %1300 = vmax.xlane.f32.xlu2 %v4392_v3 }
 0x382   : > { %v1435_v22 = vpop.permute.xlu0 %1434 }
 0x383   : > { %1450 = vmatpush.bf16.msrb.mxu2 %v1435_v22 }
 0x388   : > { %1284 = vmax.xlane.f32.xlu0 %v4401_v12 }
 0x38f   : > { %v1433_v61 = vpop.permute.xlu1 %1432 }
 0x390   : > { %1354 = vadd.xlane.f32.xlu0 %v4404_v43  ;;  %1451 = vmatpush.bf16.msrb.mxu2 %v1433_v61 }
 0x392   : > { %1290 = vmax.xlane.f32.xlu1 %v4411_v35 }
 0x394   : > { %1452 = vmatpush.bf16.msrb.mxu2 %v1431_v23 }
 0x398   : > { %1982 = vrot.lane.b32.xlu2 %v4116_v28, %s3445_s28 }
 0x39a   : > { %v1079_v1 = vpop.f32.mrf.mxu0 }
 0x3a0   : > { %1980 = vrot.lane.b32.xlu2 %v4123_v7, %s3445_s28 }
 0x3a2   : > { %v1081_v61 = vpop.f32.mrf.mxu0 }
 0x3a4   : > { %1426 = vrot.lane.b32.xlu0 %v4138_v5, %s3444_s29  ;;  %s3380_s29 = scalar_lea.hbm %s5214_s5, 256 }
 0x3a5   : > { %p3382_p9 = scmp.lt.s32.totalorder %s3380_s29, %s3376_s8 }
 0x3a7   : > { %p3383_p2 = por %p3382_p9, %p3381_p11 }
 0x3a8   : > { %1978 = vrot.lane.b32.xlu2 %v4128_v10, %s3445_s28 }
 0x3a9   : > { %p3384_p10 = pnand %p3383_p2, %p3379_p8 }
 0x3aa   : > { %v4422_v59 = vpop.xlane.xlu2 %1352 }
 0x3ab   : > { %2168 = vrot.lane.b32.xlu1 %v5280_v13, %s3443_s24 }
 0x3ac   : > { %2166 = vrot.lane.b32.xlu0 %v3804_v47, %s3443_s24 }
 0x3ad   : > { %v973_v21 = vpop.xlane.xlu0 %972 }
 0x3ae   : > { %3042 = vrcp.f32 %v973_v21  ;;  %v1306_v21 = vsub.f32 %v4186_v6, %v4288_v46  ;;  %v1119_v6 = vpack.c.bf16 %v1081_v61, %v1079_v1 }
 0x3b0   : > { %1974 = vrot.lane.b32.xlu2 %v4138_v5, %s3445_s28  ;;  %v1324_v44 = vmul.f32 1.442695, %v1306_v21 }
 0x3b2   : > { %v1690_v23 = vpop.permute.xlu2 %1689 }
 0x3b3   : > { %2841 = vmatmul.msk.bf16.gmra.mxu1 %vm756_vm0, %v1690_v23  ;;  %v1766_v23 = vpop.f32.mrf.mxu1 }
 0x3b4   : > { %v3043_v54 = vpop.eup %3042 }
 0x3b5   : > { %v1009_v9 = vmul.f32 %v3043_v54, %v4331_v40  ;;  %v977_v56 = vpop.xlane.xlu0 %976 }
 0x3b6   : > { %3044 = vrcp.f32 %v977_v56 }
 0x3b7   : > { %v1019_v25 = vpack.c.bf16 %v1009_v9, %v1008_v63  ;;  %3046 = vrcp.f32 %v975_v33  ;;  %v4470_v63 = vsel %vm639_vm12, %v4341_v48, -inf  ;;  %v4483_v48 = vsel %vm641_vm14, %v4363_v53, -inf }
 0x3b8   : > { %2463 = vrot.lane.b32.xlu2 %v4109_v39, %s3443_s24  ;;  %v4497_v53 = vsel %vm5289_vm15, %v1766_v23, -inf }
 0x3b9   : > { %1103 = vmatmul.bf16.gmra.mxu0 %v1019_v25 }
 0x3ba   : > { %v4439_v40 = vpop.xlane.xlu1 %1286 }
 0x3bb   : > { %v1769_v56 = vpop.f32.mrf.mxu1 }
 0x3bc   : > { %v3045_v47 = vpop.eup %3044 }
 0x3bd   : > { %v3047_v13 = vpop.eup %3046  ;;  %v1011_v18 = vmul.f32 %v3045_v47, %v4339_v50  ;;  %v981_v32 = vpop.xlane.xlu0 %980  ;;  %v4446_v50 = vsel %vm640_vm13, %v4355_v16, -inf  ;;  %v1330_v47 = vmul.f32 1.442695, %v1309_v58 }
 0x3be   : > { %v1010_v0 = vmul.f32 %v3047_v13, %v4267_v8  ;;  %3048 = vrcp.f32 %v981_v32  ;;  %v4491_v13 = vsel %vm630_vm3, %v1769_v56, -inf  ;;  %v4512_v32 = vsel %vm643_vm2, %v4378_v52, -inf }
 0x3bf   : > { %3050 = vrcp.f32 %v979_v51 }
 0x3c0   : > { %2459 = vrot.lane.b32.xlu2 %v4123_v7, %s3443_s24  ;;  %v1020_v34 = vpack.c.bf16 %v1011_v18, %v1010_v0  ;;  %3052 = vpow2.f32 %v1324_v44 }
 0x3c1   : > { %3054 = vpow2.f32 %v1330_v47 }
 0x3c4   : > { %v3049_v11 = vpop.eup %3048 }
 0x3c5   : > { %v3051_v60 = vpop.eup %3050  ;;  %v1013_v22 = vmul.f32 %v3049_v11, %v4352_v49 }
 0x3c6   : > { %v1012_v51 = vmul.f32 %v3051_v60, %v4279_v26  ;;  %v1084_v26 = vpop.f32.mrf.mxu0  ;;  %v4473_v46 = vpop.eup %3052 }
 0x3c7   : > { %v4502_v18 = vpop.eup %3054 }
 0x3c8   : > { %v1021_v49 = vpack.c.bf16 %v1013_v22, %v1012_v51 }
 0x3c9   : > { %1108 = vmatmul.bf16.gmra.mxu0 %v1020_v34 }
 0x3ce   : > { %v1086_v9 = vpop.f32.mrf.mxu0 }
 0x3cf   : > { %v1120_v2 = vpack.c.bf16 %v1086_v9, %v1084_v26 }
 0x3d0   : > { %v4506_v0 = vpop.permute.xlu0 %2164 }
 0x3d2   : > { %v1429_v33 = vpop.permute.xlu1 %1428 }
 0x3d3   : > { %1453 = vmatpush.bf16.msrb.mxu2 %v1429_v33 }
 0x3d5   : > { %1296 = vmax.xlane.f32.xlu1 %v4446_v50 }
 0x3d6   : > { %1288 = vmax.xlane.f32.xlu0 %v4452_v36  ;;  %v1089_v62 = vpop.f32.mrf.mxu0 }
 0x3d9   : > { %1113 = vmatmul.bf16.gmra.mxu0 %v1021_v49 }
 0x3da   : > { %v1425_v26 = vpop.permute.xlu1 %1424 }
 0x3de   : > { %1292 = vmax.xlane.f32.xlu0 %v4463_v15  ;;  %v1091_v34 = vpop.f32.mrf.mxu0 }
 0x3df   : > { %v1121_v60 = vpack.c.bf16 %v1091_v34, %v1089_v62 }
 0x3e6   : > { %1294 = vmax.xlane.f32.xlu0 %v4470_v63  ;;  %v1094_v11 = vpop.f32.mrf.mxu0 }
 0x3e9   : > { %2826 = vmatmul.msk.bf16.vlgmr.msrb.gmra.mxu0 %vm756_vm0, %v1119_v6  ;;  %1356 = vadd.xlane.f32.xlu2 %v4473_v46  ;;  %v1771_v6 = vpop.f32.mrf.mxu1 }
 0x3ea   : > { %v4539_v62 = vsel %vm631_vm4, %v1771_v6, -inf }
 0x3eb   : > { %v4518_v22 = vpop.xlane.xlu2 %1820 }
 0x3ee   : > { %1298 = vmax.xlane.f32.xlu0 %v4483_v48  ;;  %1986 = vrot.lane.b32.xlu1 %v4105_v45, %s3445_s28  ;;  %v1096_v51 = vpop.f32.mrf.mxu0 }
 0x3ef   : > { %v1122_v49 = vpack.c.bf16 %v1096_v51, %v1094_v11 }
 0x3f1   : > { %1824 = vmax.xlane.f32.xlu2 %v4491_v13 }
 0x3f3   : > { %v4525_v21 = vpop.xlane.xlu2 %1300 }
 0x3f6   : > { %1822 = vmax.xlane.f32.xlu0 %v4497_v53  ;;  %1972 = vrot.lane.b32.xlu1 %v4141_v14, %s3445_s28  ;;  %v1099_v23 = vpop.f32.mrf.mxu0 }
 0x3f9   : > { %2827 = vmatmul.msk.bf16.gmra.mxu0 %vm756_vm0, %v1120_v2  ;;  %1362 = vadd.xlane.f32.xlu2 %v4502_v18 }
 0x3fb   : > { %v1285_v1 = vpop.xlane.xlu0 %1284  ;;  %v4532_v58 = vpop.permute.xlu2 %1982 }
 0x3fe   : > { %1302 = vmax.xlane.f32.xlu0 %v4512_v32  ;;  %2461 = vrot.lane.b32.xlu1 %v4116_v28, %s3443_s24  ;;  %v1101_v9 = vpop.f32.mrf.mxu0 }
 0x3ff   : > { %v1123_v56 = vpack.c.bf16 %v1101_v9, %v1099_v23 }
 0x403   : > { %v1355_v33 = vpop.xlane.xlu0 %1354 }
 0x404   : > { %3056 = vrcp.f32 %v1355_v33 }
 0x405   : > { %3058 = vrcp.f32 %v4422_v59 }
 0x409   : > { %2828 = vmatmul.msk.bf16.gmra.mxu0 %vm756_vm0, %v1121_v60 }
 0x40a   : > { %v3057_v52 = vpop.eup %3056 }
 0x40b   : > { %v3059_v61 = vpop.eup %3058  ;;  %v1401_v44 = vmul.f32 %v3057_v52, %v4404_v43  ;;  %v1774_v43 = vpop.f32.mrf.mxu1 }
 0x40c   : > { %v1400_v59 = vmul.f32 %v3059_v61, %v4323_v19  ;;  %v4546_v19 = vpop.permute.xlu2 %1980  ;;  %v4551_v34 = vsel %vm632_vm5, %v1774_v43, -inf }
 0x411   : > { %2455 = vrot.lane.b32.xlu2 %v4131_v41, %s3443_s24 }
 0x412   : > { %1984 = vrot.lane.b32.xlu0 %v4109_v39, %s3445_s28  ;;  %v1416_v39 = vpack.c.bf16 %v1401_v44, %v1400_v59  ;;  %v5293_v59 = vld [vmem:[#allocation37_spill] sm:$0xff] }
 0x413   : > { %v1776_v11 = vpop.f32.mrf.mxu1 }
 0x414   : > { %v4554_v60 = vpop.permute.xlu2 %1978 }
 0x416   : > { %v1427_v28 = vpop.permute.xlu0 %1426 }
 0x417   : > { %1454 = vmatpush.bf16.msrb.mxu2 %v1427_v28 }
 0x419   : > { %2829 = vmatmul.msk.bf16.gmra.mxu0 %vm756_vm0, %v1122_v49 }
 0x41a   : > { %1976 = vrot.lane.b32.xlu0 %v4131_v41, %s3445_s28  ;;  %v1310_v41 = vsub.f32 %v4401_v12, %v1285_v1  ;;  %v4563_v1 = vpop.xlane.xlu1 %1290 }
 0x41b   : > { %1455 = vmatpush.bf16.msrb.mxu2 %v1425_v26  ;;  %v1779_v52 = vpop.f32.mrf.mxu1 }
 0x41c   : > { %v4567_v49 = vpop.permute.xlu2 %1974  ;;  %v4572_v44 = vsel %vm634_vm7, %v1779_v52, -inf }
 0x41e   : > { %1456 = vmatmul.bf16.vlgmr.msrb.gmra.mxu2 %v1416_v39  ;;  %v4576_v23 = vpop.permute.xlu0 %2166  ;;  %v5294_v39 = vld [vmem:[#allocation35_spill] sm:$0xff] }
 0x41f   : > { %v1307_v6 = vsub.f32 %v5294_v39, %v5293_v59  ;;  %v5295_v59 = vld [vmem:[#allocation36_spill] sm:$0xff] }
 0x420   : > { %v1308_v39 = vsub.f32 %v5295_v59, %v4311_v17 }
 0x422   : > { %2465 = vrot.lane.b32.xlu0 %v4105_v45, %s3443_s24  ;;  %v1332_v45 = vmul.f32 1.442695, %v1310_v41  ;;  %v4574_v26 = vpop.permute.xlu1 %2168  ;;  %v1326_v41 = vmul.f32 1.442695, %v1307_v6  ;;  %v1328_v7 = vmul.f32 1.442695, %v1308_v39 }
 0x423   : > { %v1781_v9 = vpop.f32.mrf.mxu1 }
 0x424   : > { %3060 = vpow2.f32 %v1332_v45 }
 0x425   : > { %3062 = vpow2.f32 %v1326_v41 }
 0x428   : > { %1826 = vmax.xlane.f32.xlu1 %v4539_v62 }
 0x429   : > { %2830 = vmatmul.msk.bf16.gmra.mxu0 %vm756_vm0, %v1123_v56  ;;  %v4585_v56 = vsel %vm635_vm8, %v1781_v9, -inf }
 0x42a   : > { %2457 = vrot.lane.b32.xlu0 %v4128_v10, %s3443_s24  ;;  %v4559_v10 = vsel %vm633_vm6, %v1776_v11, -inf  ;;  %v4561_v12 = vpop.eup %3060 }
 0x42b   : > { %v1784_v55 = vpop.f32.mrf.mxu1  ;;  %v4603_v17 = vpop.eup %3062 }
 0x42c   : > { %v4597_v25 = vsel %vm636_vm9, %v1784_v55, -inf  ;;  %v1311_v55 = vsub.f32 %v4349_v20, %v4439_v40  ;;  %v1313_v40 = vsub.f32 %v4411_v35, %v4563_v1 }
 0x430   : > { %1828 = vmax.xlane.f32.xlu1 %v4551_v34 }
 0x436   : > { %v1104_v33 = vpop.f32.mrf.mxu0 }
 0x438   : > { %1830 = vmax.xlane.f32.xlu1 %v4559_v10 }
 0x43a   : > { %1364 = vadd.xlane.f32.xlu2 %v4561_v12 }
 0x43e   : > { %v1106_v28 = vpop.f32.mrf.mxu0 }
 0x43f   : > { %v1124_v61 = vpack.c.bf16 %v1106_v28, %v1104_v33  ;;  %v4588_v33 = vpop.permute.xlu2 %2463 }
 0x440   : > { %1832 = vmax.xlane.f32.xlu1 %v4572_v44 }
 0x441   : > { %2831 = vmatmul.msk.bf16.gmra.mxu0 %vm756_vm0, %v1124_v61 }
 0x446   : > { %v1109_v43 = vpop.f32.mrf.mxu0 }
 0x447   : > { %v4605_v41 = vpop.permute.xlu2 %2459 }
 0x448   : > { %1834 = vmax.xlane.f32.xlu1 %v4585_v56  ;;  %v1297_v45 = vpop.xlane.xlu1 %1296 }
 0x449   : > { %v1289_v11 = vpop.xlane.xlu0 %1288  ;;  %v1316_v52 = vsub.f32 %v4446_v50, %v1297_v45 }
 0x44a   : > { %v1312_v28 = vsub.f32 %v4452_v36, %v1289_v11  ;;  %v1318_v36 = vsub.f32 %v4392_v3, %v4525_v21  ;;  %v1334_v3 = vmul.f32 1.442695, %v1311_v55  ;;  %v1786_v21 = vpop.f32.mrf.mxu1 }
 0x44b   : > { %v1344_v38 = vmul.f32 1.442695, %v1316_v52  ;;  %v4627_v59 = vsel %vm637_vm10, %v1786_v21, -inf }
 0x44c   : > { %v1336_v61 = vmul.f32 1.442695, %v1312_v28  ;;  %v1348_v45 = vmul.f32 1.442695, %v1318_v36 }
 0x44e   : > { %v1111_v9 = vpop.f32.mrf.mxu0  ;;  %3064 = vpow2.f32 %v1336_v61 }
 0x44f   : > { %v1125_v6 = vpack.c.bf16 %v1111_v9, %v1109_v43  ;;  %3066 = vpow2.f32 %v1344_v38 }
 0x450   : > { %1836 = vmax.xlane.f32.xlu1 %v4597_v25  ;;  %3068 = vpow2.f32 %v1328_v7 }
 0x451   : > { %2832 = vmatmul.msk.bf16.gmra.mxu0 %vm756_vm0, %v1125_v6  ;;  %v1293_v50 = vpop.xlane.xlu0 %1292  ;;  %3070 = vpow2.f32 %v1348_v45  ;;  %v1338_v6 = vmul.f32 1.442695, %v1313_v40 }
 0x452   : > { %3072 = vpow2.f32 %v1334_v3 }
 0x454   : > { %1358 = vadd.xlane.f32.xlu0 %v4603_v17  ;;  %v4608_v43 = vpop.eup %3064 }
 0x455   : > { %1368 = vadd.xlane.f32.xlu2 %v4608_v43  ;;  %v4613_v52 = vpop.eup %3066 }
 0x456   : > { %v1114_v11 = vpop.f32.mrf.mxu0  ;;  %v4617_v61 = vpop.eup %3068 }
 0x457   : > { %v4630_v9 = vpop.eup %3070 }
 0x458   : > { %1376 = vadd.xlane.f32.xlu1 %v4613_v52  ;;  %v4634_v35 = vpop.eup %3072 }
 0x459   : > { %v1295_v38 = vpop.xlane.xlu0 %1294 }
 0x45a   : > { %v1315_v28 = vsub.f32 %v4470_v63, %v1295_v38 }
 0x45c   : > { %v1342_v7 = vmul.f32 1.442695, %v1315_v28  ;;  %1360 = vadd.xlane.f32.xlu0 %v4617_v61  ;;  %v4620_v20 = vpop.xlane.xlu2 %1356 }
 0x45d   : > { %1838 = vmax.xlane.f32.xlu2 %v4627_v59 }
 0x45e   : > { %3074 = vpow2.f32 %v1342_v7  ;;  %v1116_v63 = vpop.f32.mrf.mxu0 }
 0x45f   : > { %v1126_v39 = vpack.c.bf16 %v1116_v63, %v1114_v11  ;;  %3076 = vpow2.f32 %v1338_v6  ;;  %v1314_v11 = vsub.f32 %v4463_v15, %v1293_v50 }
 0x460   : > { %1380 = vadd.xlane.f32.xlu1 %v4630_v9  ;;  %v1987_v36 = vpop.permute.xlu1 %1986 }
 0x461   : > { %2833 = vmatmul.msk.bf16.gmra.mxu0 %vm756_vm0, %v1126_v39  ;;  %v1299_v55 = vpop.xlane.xlu0 %1298  ;;  %1996 = vmatpush.bf16.msrb.mxu1 %v1987_v36  ;;  %v1340_v28 = vmul.f32 1.442695, %v1314_v11 }
 0x462   : > { %2889 = vmatpush.bf16.msra.mxu2 %v1987_v36  ;;  %v1317_v15 = vsub.f32 %v4483_v48, %v1299_v55  ;;  %v5298_v36 = vld [vmem:[#allocation15_spill] sm:$0xff] }
 0x464   : > { %v4636_v1 = vpop.eup %3074  ;;  %1366 = vadd.xlane.f32.xlu0 %v4634_v35  ;;  %v1825_v45 = vpop.xlane.xlu2 %1824  ;;  %v1346_v6 = vmul.f32 1.442695, %v1317_v15 }
 0x465   : > { %v1854_v3 = vsub.f32 %v4491_v13, %v1825_v45  ;;  %1374 = vadd.xlane.f32.xlu2 %v4636_v1  ;;  %v4645_v63 = vpop.eup %3076 }
 0x466   : > { %v4642_v38 = vpop.f32.mrf.mxu0 }
 0x467   : > { %5296 = vst [vmem:[#allocation20_spill] sm:$0xff] %v4642_v38  ;;  %v1872_v21 = vmul.f32 1.442695, %v1854_v3  ;;  %v648_v38 = vld [vmem:[#allocation8 + $0x20] sm:$0xff] }
 0x469   : > { %3078 = vpow2.f32 %v1872_v21  ;;  %v1823_v7 = vpop.xlane.xlu0 %1822 }
 0x46a   : > { %v1853_v40 = vsub.f32 %v4497_v53, %v1823_v7  ;;  %3080 = vpow2.f32 %v1340_v28  ;;  %v1852_v28 = vsub.f32 %v4386_v24, %v4518_v22  ;;  %v649_v24 = vld [vmem:[#allocation8 + $0x28] sm:$0xff] }
 0x46c   : > { %v1870_v39 = vmul.f32 1.442695, %v1853_v40  ;;  %1370 = vadd.xlane.f32.xlu0 %v4645_v63  ;;  %v650_v40 = vld [vmem:[#allocation8 + $0x30] sm:$0xff]  ;;  %v1868_v15 = vmul.f32 1.442695, %v1852_v28  ;;  %v665_v28 = vpack.c.bf16 %v649_v24, %v649_v24 }
 0x46e   : > { %3082 = vpow2.f32 %v1870_v39  ;;  %v4649_v13 = vpop.f32.mrf.mxu0  ;;  %v651_v39 = vld [vmem:[#allocation8 + $0x38] sm:$0xff] }
 0x46f   : > { %5297 = vst [vmem:[#allocation26_spill] sm:$0xff] %v4649_v13  ;;  %v4651_v50 = vpop.eup %3078  ;;  %3084 = vpow2.f32 %v1346_v6  ;;  %v5301_v6 = vld [vmem:[#allocation21_spill] sm:$0xff] }
 0x470   : > { %1904 = vadd.xlane.f32.xlu2 %v4651_v50  ;;  %v4656_v45 = vpop.eup %3080 }
 0x471   : > { %2850 = vmatmul.msk.bf16.vlgmr.msra.gmra.mxu0 %vm756_vm0, %v5298_v36  ;;  %v1303_v53 = vpop.xlane.xlu0 %1302  ;;  %v667_v36 = vpack.c.bf16 %v651_v39, %v651_v39  ;;  %v1510_v39 = vunpack.c.l.b16 %v665_v28  ;;  %v5303_v28 = vld [vmem:[#allocation19_spill] sm:$0xff] }
 0x472   : > { %v1319_v48 = vsub.f32 %v4512_v32, %v1303_v53  ;;  %v666_v32 = vpack.c.bf16 %v650_v40, %v650_v40 }
 0x474   : > { %v4658_v11 = vpop.eup %3082  ;;  %1372 = vadd.xlane.f32.xlu0 %v4656_v45  ;;  %v1350_v3 = vmul.f32 1.442695, %v1319_v48  ;;  %v1511_v48 = vunpack.c.l.b16 %v666_v32  ;;  %v1973_v32 = vpop.permute.xlu1 %1972 }
 0x475   : > { %1902 = vadd.xlane.f32.xlu1 %v4658_v11  ;;  %v4665_v21 = vpop.eup %3084 }
 0x476   : > { %v4663_v55 = vpop.f32.mrf.mxu0  ;;  %3086 = vpow2.f32 %v1350_v3  ;;  %v664_v3 = vpack.c.bf16 %v648_v38, %v648_v38 }
 0x477   : > { %5299 = vst [vmem:[#allocation17_spill] sm:$0xff] %v4663_v55  ;;  %v1512_v55 = vunpack.c.l.b16 %v667_v36  ;;  %3088 = vpow2.f32 %v1868_v15 }
 0x478   : > { %v1509_v40 = vunpack.c.l.b16 %v664_v3 }
 0x479   : > { %v1514_v22 = vpack.c.b16 %v1512_v55, %v1511_v48 }
 0x47b   : > { %1547 = vmatpush.bf16.msra.mxu3 %v1514_v22 }
 0x47c   : > { %1378 = vadd.xlane.f32.xlu0 %v4665_v21  ;;  %v4674_v53 = vpop.eup %3086  ;;  %v2462_v55 = vpop.permute.xlu1 %2461 }
 0x47d   : > { %v4681_v36 = vpop.eup %3088 }
 0x47e   : > { %v4670_v7 = vpop.f32.mrf.mxu0 }
 0x47f   : > { %5300 = vst [vmem:[#allocation18_spill] sm:$0xff] %v4670_v7 }
 0x481   : > { %2851 = vmatmul.msk.bf16.gmra.mxu0 %vm756_vm0, %v5301_v6  ;;  %v1513_v6 = vpack.c.b16 %v1510_v39, %v1509_v40 }
 0x483   : > { %1548 = vmatpush.bf16.msra.mxu3 %v1513_v6 }
 0x484   : > { %1382 = vadd.xlane.f32.xlu0 %v4674_v53  ;;  %v1985_v13 = vpop.permute.xlu0 %1984 }
 0x485   : > { %1997 = vmatpush.bf16.msrb.mxu1 %v1985_v13  ;;  %2890 = vmatpush.bf16.msra.mxu2 %v1985_v13  ;;  %v5302_v13 = vld [vmem:[#allocation16_spill] sm:$0xff] }
 0x486   : > { %v4677_v7 = vpop.f32.mrf.mxu0 }
 0x489   : > { %1998 = vmatpush.bf16.msrb.mxu1 %v4532_v58  ;;  %2891 = vmatpush.bf16.msra.mxu2 %v4532_v58 }
 0x48c   : > { %1900 = vadd.xlane.f32.xlu0 %v4681_v36  ;;  %v1977_v58 = vpop.permute.xlu0 %1976 }
 0x48d   : > { %1999 = vmatpush.bf16.msrb.mxu1 %v4546_v19  ;;  %2892 = vmatpush.bf16.msra.mxu2 %v4546_v19 }
 0x48e   : > { %v4686_v38 = vpop.f32.mrf.mxu0 }
 0x491   : > { %2000 = vmatpush.bf16.msrb.mxu1 %v4554_v60  ;;  %2893 = vmatpush.bf16.msra.mxu2 %v4554_v60 }
 0x492   : > { %2852 = vmatmul.msk.bf16.gmra.mxu0 %vm756_vm0, %v5302_v13 }
 0x494   : > { %v2466_v48 = vpop.permute.xlu0 %2465 }
 0x495   : > { %2001 = vmatpush.bf16.msrb.mxu1 %v1977_v58  ;;  %2894 = vmatpush.bf16.msra.mxu2 %v1977_v58 }
 0x496   : > { %v4692_v15 = vpop.f32.mrf.mxu0 }
 0x499   : > { %2002 = vmatpush.bf16.msrb.mxu1 %v4567_v49  ;;  %2895 = vmatpush.bf16.msra.mxu2 %v4567_v49  ;;  %v1363_v49 = vpop.xlane.xlu2 %1362 }
 0x49b   : > { %v1827_v19 = vpop.xlane.xlu1 %1826 }
 0x49c   : > { %v1855_v24 = vsub.f32 %v4539_v62, %v1827_v19 }
 0x49d   : > { %2003 = vmatpush.bf16.msrb.mxu1 %v1973_v32  ;;  %2896 = vmatpush.bf16.msra.mxu2 %v1973_v32  ;;  %v2458_v32 = vpop.permute.xlu0 %2457 }
 0x49e   : > { %v1874_v60 = vmul.f32 1.442695, %v1855_v24  ;;  %v4697_v3 = vpop.f32.mrf.mxu0 }
 0x4a0   : > { %3090 = vpow2.f32 %v1874_v60 }
 0x4a1   : > { %2475 = vmatpush.bf16.msra.mxu1 %v2466_v48  ;;  %v1457_v22 = vpop.f32.mrf.mxu2  ;;  %v2456_v13 = vpop.permute.xlu2 %2455  ;;  %3092 = vrcp.f32 %v4620_v20 }
 0x4a2   : > { %2853 = vmatmul.msk.bf16.gmra.mxu0 %vm756_vm0, %v5303_v28 }
 0x4a3   : > { %v4713_v58 = vpop.xlane.xlu1 %1828 }
 0x4a5   : > { %2476 = vmatpush.bf16.msra.mxu1 %v4588_v33 }
 0x4a6   : > { %v4702_v40 = vpop.eup %3090  ;;  %v4706_v6 = vpop.f32.mrf.mxu0 }
 0x4a7   : > { %1906 = vadd.xlane.f32.xlu0 %v4702_v40 }
 0x4a9   : > { %2477 = vmatpush.bf16.msra.mxu1 %v2462_v55  ;;  %v1459_v62 = vpop.f32.mrf.mxu2 }
 0x4aa   : > { %v1497_v39 = vpack.c.bf16 %v1459_v62, %v1457_v22 }
 0x4ab   : > { %v4717_v19 = vpop.xlane.xlu1 %1830 }
 0x4ac   : > { %2818 = vmatmul.msk.bf16.vlgmr.msra.gmra.mxu3 %vm756_vm0, %v1497_v39 }
 0x4ad   : > { %2478 = vmatpush.bf16.msra.mxu1 %v4605_v41 }
 0x4ae   : > { %v4711_v33 = vpop.f32.mrf.mxu0 }
 0x4b1   : > { %2479 = vmatpush.bf16.msra.mxu1 %v2458_v32 }
 0x4b2   : > { %2854 = vmatmul.msk.bf16.gmra.mxu0 %vm756_vm0, %v4359_v4  ;;  %v3093_v4 = vpop.eup %3092 }
 0x4b3   : > { %v4724_v24 = vpop.xlane.xlu1 %1832  ;;  %v1402_v62 = vmul.f32 %v3093_v4, %v4473_v46 }
 0x4b5   : > { %2480 = vmatpush.bf16.msra.mxu1 %v2456_v13 }
 0x4be   : > { %v4715_v55 = vpop.f32.mrf.mxu0 }
 0x4bf   : > { %5304 = vst [vmem:[#allocation25_spill] sm:$0xff] %v4715_v55 }
 0x4c2   : > { %2855 = vmatmul.msk.bf16.gmra.mxu0 %vm756_vm0, %v4506_v0  ;;  %v4732_v0 = vpop.xlane.xlu1 %1834 }
 0x4c3   : > { %v1859_v37 = vsub.f32 %v4585_v56, %v4732_v0 }
 0x4c6   : > { %v4722_v41 = vpop.f32.mrf.mxu0 }
 0x4c7   : > { %5305 = vst [vmem:[#allocation28_spill] sm:$0xff] %v4722_v41  ;;  %v1359_v48 = vpop.xlane.xlu0 %1358 }
 0x4c8   : > { %3094 = vrcp.f32 %v1359_v48 }
 0x4ca   : > { %v4739_v46 = vpop.xlane.xlu1 %1836 }
 0x4ce   : > { %v3095_v60 = vpop.eup %3094  ;;  %v4726_v22 = vpop.f32.mrf.mxu0 }
 0x4cf   : > { %5306 = vst [vmem:[#allocation27_spill] sm:$0xff] %v4726_v22  ;;  %v1361_v28 = vpop.xlane.xlu0 %1360  ;;  %v1403_v39 = vmul.f32 %v3095_v60, %v4603_v17  ;;  %v1365_v60 = vpop.xlane.xlu2 %1364 }
 0x4d0   : > { %3096 = vrcp.f32 %v1361_v28 }
 0x4d1   : > { %v1417_v32 = vpack.c.bf16 %v1403_v39, %v1402_v62  ;;  %3098 = vrcp.f32 %v1363_v49 }
 0x4d2   : > { %2856 = vmatmul.msk.bf16.gmra.mxu0 %vm756_vm0, %v4576_v23  ;;  %v1377_v62 = vpop.xlane.xlu1 %1376 }
 0x4d3   : > { %1461 = vmatmul.bf16.gmra.mxu2 %v1417_v32 }
 0x4d6   : > { %v4734_v20 = vpop.f32.mrf.mxu0  ;;  %v3097_v48 = vpop.eup %3096 }
 0x4d7   : > { %v1367_v13 = vpop.xlane.xlu0 %1366  ;;  %v3099_v41 = vpop.eup %3098  ;;  %v1404_v22 = vmul.f32 %v3097_v48, %v4617_v61 }
 0x4d8   : > { %v1405_v4 = vmul.f32 %v3099_v41, %v4502_v18  ;;  %3100 = vrcp.f32 %v1367_v13 }
 0x4d9   : > { %3102 = vrcp.f32 %v1365_v60 }
 0x4da   : > { %v1418_v23 = vpack.c.bf16 %v1405_v4, %v1404_v22  ;;  %v4754_v13 = vpop.xlane.xlu1 %1380 }
 0x4de   : > { %v4737_v55 = vpop.f32.mrf.mxu0  ;;  %v3101_v61 = vpop.eup %3100 }
 0x4df   : > { %5307 = vst [vmem:[#allocation29_spill] sm:$0xff] %v4737_v55  ;;  %v1371_v17 = vpop.xlane.xlu0 %1370  ;;  %v3103_v39 = vpop.eup %3102  ;;  %v1407_v32 = vmul.f32 %v3101_v61, %v4634_v35 }
 0x4e0   : > { %v1369_v55 = vpop.xlane.xlu2 %1368  ;;  %v1406_v41 = vmul.f32 %v3103_v39, %v4561_v12  ;;  %3104 = vrcp.f32 %v1371_v17 }
 0x4e1   : > { %3106 = vrcp.f32 %v1369_v55 }
 0x4e2   : > { %2857 = vmatmul.msk.bf16.gmra.mxu0 %vm756_vm0, %v4574_v26  ;;  %v1419_v22 = vpack.c.bf16 %v1407_v32, %v1406_v41 }
 0x4e3   : > { %1466 = vmatmul.bf16.gmra.mxu2 %v1418_v23 }
 0x4e6   : > { %v4744_v49 = vpop.f32.mrf.mxu0  ;;  %v3105_v12 = vpop.eup %3104 }
 0x4e7   : > { %v1373_v28 = vpop.xlane.xlu0 %1372  ;;  %v3107_v61 = vpop.eup %3106  ;;  %v1409_v39 = vmul.f32 %v3105_v12, %v4645_v63 }
 0x4e8   : > { %v4762_v29 = vpop.xlane.xlu2 %1838  ;;  %v1903_v60 = vpop.xlane.xlu1 %1902  ;;  %v1408_v42 = vmul.f32 %v3107_v61, %v4608_v43 }
 0x4e9   : > { %3108 = vrcp.f32 %v1903_v60 }
 0x4ee   : > { %v2243_v48 = vpop.f32.mrf.mxu0 }
 0x4ef   : > { %v4750_v18 = vsel %vm628_vm1, %v2243_v48, -inf  ;;  %v1379_v26 = vpop.xlane.xlu0 %1378  ;;  %v1420_v48 = vpack.c.bf16 %v1409_v39, %v1408_v42 }
 0x4f0   : > { %2299 = vmax.xlane.f32.xlu0 %v4750_v18  ;;  %v1375_v41 = vpop.xlane.xlu2 %1374 }
 0x4f3   : > { %1471 = vmatmul.bf16.gmra.mxu2 %v1419_v22  ;;  %v3109_v22 = vpop.eup %3108 }
 0x4f4   : > { %v1949_v31 = vmul.f32 %v3109_v22, %v4658_v11 }
 0x4f6   : > { %v2245_v4 = vpop.f32.mrf.mxu0 }
 0x4f7   : > { %v1383_v35 = vpop.xlane.xlu0 %1382  ;;  %v4759_v23 = vsel %vm5289_vm15, %v2245_v4, -inf }
 0x4f8   : > { %2301 = vmax.xlane.f32.xlu2 %v4759_v23 }
 0x4fe   : > { %v2248_v32 = vpop.f32.mrf.mxu0 }
 0x4ff   : > { %v1901_v17 = vpop.xlane.xlu0 %1900  ;;  %v4768_v55 = vsel %vm630_vm3, %v2248_v32, -inf }
 0x500   : > { %3110 = vrcp.f32 %v1901_v17  ;;  %2303 = vmax.xlane.f32.xlu2 %v4768_v55 }
 0x501   : > { %3112 = vrcp.f32 %v1373_v28 }
 0x502   : > { %3114 = vrcp.f32 %v1375_v41 }
 0x503   : > { %1476 = vmatmul.bf16.gmra.mxu2 %v1420_v48  ;;  %3116 = vrcp.f32 %v1379_v26 }
 0x504   : > { %2451 = vrot.lane.b32.xlu0 %v4141_v14, %s3443_s24  ;;  %3118 = vrcp.f32 %v1377_v62 }
 0x506   : > { %v3111_v63 = vpop.eup %3110  ;;  %v2250_v4 = vpop.f32.mrf.mxu0 }
 0x507   : > { %v1948_v12 = vmul.f32 %v3111_v63, %v4681_v36  ;;  %v4779_v43 = vsel %vm631_vm4, %v2250_v4, -inf  ;;  %v3113_v61 = vpop.eup %3112  ;;  %v1905_v36 = vpop.xlane.xlu2 %1904 }
 0x508   : > { %2305 = vmax.xlane.f32.xlu1 %v4779_v43  ;;  %v3115_v28 = vpop.eup %3114  ;;  %v1410_v14 = vmul.f32 %v3113_v61, %v4656_v45  ;;  %3120 = vrcp.f32 %v1905_v36  ;;  %v1789_v4 = vpop.f32.mrf.mxu1 }
 0x509   : > { %v1964_v60 = vpack.c.bf16 %v1949_v31, %v1948_v12  ;;  %v1411_v32 = vmul.f32 %v3115_v28, %v4636_v1  ;;  %v3117_v1 = vpop.eup %3116  ;;  %v4810_v57 = vsel %vm638_vm11, %v1789_v4, -inf }
 0x50a   : > { %v3119_v42 = vpop.eup %3118  ;;  %v1413_v48 = vmul.f32 %v3117_v1, %v4665_v21 }
 0x50b   : > { %2004 = vmatmul.bf16.vlgmr.msrb.gmra.mxu1 %v1964_v60  ;;  %v1421_v47 = vpack.c.bf16 %v1411_v32, %v1410_v14  ;;  %v1412_v26 = vmul.f32 %v3119_v42, %v4613_v52  ;;  %v1857_v60 = vsub.f32 %v4559_v10, %v4717_v19 }
 0x50d   : > { %v1422_v51 = vpack.c.bf16 %v1413_v48, %v1412_v26 }
 0x50e   : > { %v3121_v62 = vpop.eup %3120 }
 0x50f   : > { %v2253_v39 = vpop.f32.mrf.mxu0  ;;  %v1950_v31 = vmul.f32 %v3121_v62, %v4651_v50 }
 0x510   : > { %v4787_v11 = vsel %vm632_vm5, %v2253_v39, -inf  ;;  %v1791_v28 = vpop.f32.mrf.mxu1 }
 0x511   : > { %2307 = vmax.xlane.f32.xlu2 %v4787_v11  ;;  %v4826_v39 = vsel %vm639_vm12, %v1791_v28, -inf }
 0x513   : > { %1481 = vmatmul.bf16.gmra.mxu2 %v1421_v47 }
 0x517   : > { %v2255_v17 = vpop.f32.mrf.mxu0 }
 0x518   : > { %v4793_v45 = vsel %vm633_vm6, %v2255_v17, -inf }
 0x519   : > { %2309 = vmax.xlane.f32.xlu1 %v4793_v45 }
 0x51a   : > { %v1907_v2 = vpop.xlane.xlu0 %1906 }
 0x51b   : > { %3122 = vrcp.f32 %v1907_v2  ;;  %v1856_v2 = vsub.f32 %v4551_v34, %v4713_v58 }
 0x51c   : > { %3124 = vrcp.f32 %v1383_v35  ;;  %v1878_v35 = vmul.f32 1.442695, %v1857_v60 }
 0x51d   : > { %3126 = vrcp.f32 %v4754_v13  ;;  %v1876_v48 = vmul.f32 1.442695, %v1856_v2 }
 0x51e   : > { %3128 = vpow2.f32 %v1878_v35 }
 0x51f   : > { %v2258_v41 = vpop.f32.mrf.mxu0 }
 0x520   : > { %v4801_v22 = vsel %vm634_vm7, %v2258_v41, -inf }
 0x521   : > { %2311 = vmax.xlane.f32.xlu2 %v4801_v22  ;;  %v3123_v63 = vpop.eup %3122 }
 0x522   : > { %v1951_v12 = vmul.f32 %v3123_v63, %v4702_v40  ;;  %v3125_v52 = vpop.eup %3124 }
 0x523   : > { %1486 = vmatmul.bf16.gmra.mxu2 %v1422_v51  ;;  %v3127_v50 = vpop.eup %3126  ;;  %v1415_v13 = vmul.f32 %v3125_v52, %v4674_v53 }
 0x524   : > { %v1965_v21 = vpack.c.bf16 %v1951_v12, %v1950_v31  ;;  %v1414_v14 = vmul.f32 %v3127_v50, %v4630_v9  ;;  %v4831_v27 = vpop.eup %3128 }
 0x526   : > { %2009 = vmatmul.bf16.gmra.mxu1 %v1965_v21  ;;  %v1423_v10 = vpack.c.bf16 %v1415_v13, %v1414_v14  ;;  %v1794_v21 = vpop.f32.mrf.mxu1 }
 0x527   : > { %v2260_v61 = vpop.f32.mrf.mxu0 }
 0x528   : > { %v4818_v40 = vsel %vm635_vm8, %v2260_v61, -inf }
 0x529   : > { %1840 = vmax.xlane.f32.xlu2 %v4810_v57 }
 0x52e   : > { %2313 = vmax.xlane.f32.xlu0 %v4818_v40 }
 0x52f   : > { %v2263_v19 = vpop.f32.mrf.mxu0 }
 0x530   : > { %v4837_v9 = vsel %vm636_vm9, %v2263_v19, -inf }
 0x531   : > { %1842 = vmax.xlane.f32.xlu2 %v4826_v39 }
 0x532   : > { %2453 = vrot.lane.b32.xlu1 %v4138_v5, %s3443_s24 }
 0x533   : > { %1491 = vmatmul.bf16.gmra.mxu2 %v1423_v10  ;;  %v1796_v10 = vpop.f32.mrf.mxu1 }
 0x537   : > { %v2265_v42 = vpop.f32.mrf.mxu0 }
 0x539   : > { %1910 = vadd.xlane.f32.xlu2 %v4831_v27 }
 0x53b   : > { %v1799_v0 = vpop.f32.mrf.mxu1 }
 0x556   : > { %v1462_v53 = vpop.f32.mrf.mxu2 }
 0x55c   : > { %2315 = vmax.xlane.f32.xlu1 %v4837_v9 }
 0x55e   : > { %v1464_v32 = vpop.f32.mrf.mxu2 }
 0x55f   : > { %v1498_v47 = vpack.c.bf16 %v1464_v32, %v1462_v53  ;;  %v1882_v53 = vmul.f32 1.442695, %v1859_v37 }
 0x561   : > { %2819 = vmatmul.msk.bf16.gmra.mxu3 %vm756_vm0, %v1498_v47 }
 0x563   : > { %v2300_v36 = vpop.xlane.xlu0 %2299 }
 0x564   : > { %v2331_v5 = vsub.f32 %v4750_v18, %v2300_v36  ;;  %v2268_v18 = vpop.f32.mrf.mxu0  ;;  %v4887_v36 = vsel %vm640_vm13, %v1794_v21, -inf }
 0x565   : > { %v4882_v47 = vsel %vm638_vm11, %v2268_v18, -inf }
 0x566   : > { %v2347_v17 = vmul.f32 1.442695, %v2331_v5  ;;  %v1467_v1 = vpop.f32.mrf.mxu2 }
 0x568   : > { %3130 = vpow2.f32 %v2347_v17 }
 0x569   : > { %3132 = vpow2.f32 %v1876_v48 }
 0x56b   : > { %v2302_v8 = vpop.xlane.xlu2 %2301 }
 0x56c   : > { %v2332_v41 = vsub.f32 %v4759_v23, %v2302_v8  ;;  %v2270_v60 = vpop.f32.mrf.mxu0 }
 0x56d   : > { %v4867_v35 = vsel %vm639_vm12, %v2270_v60, -inf }
 0x56e   : > { %v4845_v26 = vpop.eup %3130  ;;  %v2349_v62 = vmul.f32 1.442695, %v2332_v41  ;;  %v1469_v51 = vpop.f32.mrf.mxu2 }
 0x56f   : > { %v1499_v63 = vpack.c.bf16 %v1469_v51, %v1467_v1  ;;  %2379 = vadd.xlane.f32.xlu1 %v4845_v26  ;;  %v4850_v58 = vpop.eup %3132 }
 0x570   : > { %3134 = vpow2.f32 %v2349_v62 }
 0x571   : > { %2820 = vmatmul.msk.bf16.gmra.mxu3 %vm756_vm0, %v1499_v63 }
 0x573   : > { %v2304_v4 = vpop.xlane.xlu2 %2303 }
 0x574   : > { %v2333_v34 = vsub.f32 %v4768_v55, %v2304_v4  ;;  %v4862_v55 = vsel %vm637_vm10, %v2265_v42, -inf  ;;  %v4899_v42 = vsel %vm641_vm14, %v1796_v10, -inf  ;;  %v2273_v62 = vpop.f32.mrf.mxu0 }
 0x575   : > { %v4923_v60 = vsel %vm640_vm13, %v2273_v62, -inf }
 0x576   : > { %v4852_v31 = vpop.eup %3134  ;;  %v2351_v23 = vmul.f32 1.442695, %v2333_v34  ;;  %v1472_v12 = vpop.f32.mrf.mxu2 }
 0x577   : > { %2381 = vadd.xlane.f32.xlu0 %v4852_v31  ;;  %1908 = vadd.xlane.f32.xlu1 %v4850_v58 }
 0x578   : > { %3136 = vpow2.f32 %v2351_v23 }
 0x57b   : > { %v2306_v52 = vpop.xlane.xlu1 %2305 }
 0x57c   : > { %v2334_v61 = vsub.f32 %v4779_v43, %v2306_v52  ;;  %v1858_v43 = vsub.f32 %v4572_v44, %v4724_v24  ;;  %v2452_v52 = vpop.permute.xlu0 %2451 }
 0x57e   : > { %v4857_v50 = vpop.eup %3136  ;;  %v2353_v28 = vmul.f32 1.442695, %v2334_v61  ;;  %v1474_v13 = vpop.f32.mrf.mxu2  ;;  %v1880_v54 = vmul.f32 1.442695, %v1858_v43  ;;  %v1861_v43 = vsub.f32 %v4627_v59, %v4762_v29  ;;  %v653_v29 = vld [vmem:[#allocation8 + $0x48] sm:$0xff] }
 0x57f   : > { %v1500_v14 = vpack.c.bf16 %v1474_v13, %v1472_v12  ;;  %2383 = vadd.xlane.f32.xlu2 %v4857_v50  ;;  %2317 = vmax.xlane.f32.xlu0 %v4862_v55 }
 0x580   : > { %3138 = vpow2.f32 %v2353_v28  ;;  %2321 = vmax.xlane.f32.xlu1 %v4867_v35  ;;  %v1886_v24 = vmul.f32 1.442695, %v1861_v43 }
 0x581   : > { %2821 = vmatmul.msk.bf16.gmra.mxu3 %vm756_vm0, %v1500_v14  ;;  %3140 = vpow2.f32 %v1880_v54 }
 0x582   : > { %3142 = vpow2.f32 %v1882_v53 }
 0x584   : > { %v2308_v19 = vpop.xlane.xlu2 %2307 }
 0x585   : > { %v2335_v56 = vsub.f32 %v4787_v11, %v2308_v19 }
 0x586   : > { %v4877_v32 = vpop.eup %3138  ;;  %v1477_v44 = vpop.f32.mrf.mxu2 }
 0x587   : > { %2385 = vadd.xlane.f32.xlu2 %v4877_v32  ;;  %2319 = vmax.xlane.f32.xlu0 %v4882_v47  ;;  %v2355_v16 = vmul.f32 1.442695, %v2335_v56  ;;  %v4894_v1 = vpop.eup %3140  ;;  %v654_v56 = vld [vmem:[#allocation8 + $0x50] sm:$0xff] }
 0x588   : > { %1844 = vmax.xlane.f32.xlu1 %v4887_v36  ;;  %v4901_v8 = vpop.eup %3142  ;;  %v670_v2 = vpack.c.bf16 %v654_v56, %v654_v56 }
 0x589   : > { %3144 = vpow2.f32 %v2355_v16  ;;  %v655_v16 = vld [vmem:[#allocation8 + $0x58] sm:$0xff] }
 0x58a   : > { %v671_v59 = vpack.c.bf16 %v655_v16, %v655_v16 }
 0x58c   : > { %v2310_v5 = vpop.xlane.xlu1 %2309  ;;  %v2060_v62 = vunpack.c.l.b16 %v671_v59 }
 0x58d   : > { %v2336_v17 = vsub.f32 %v4793_v45, %v2310_v5  ;;  %v1801_v45 = vpop.f32.mrf.mxu1  ;;  %v652_v5 = vld [vmem:[#allocation8 + $0x40] sm:$0xff] }
 0x58e   : > { %v1479_v48 = vpop.f32.mrf.mxu2  ;;  %v4915_v12 = vsel %vm643_vm2, %v1801_v45, -inf }
 0x58f   : > { %v2357_v41 = vmul.f32 1.442695, %v2336_v17  ;;  %v1501_v11 = vpack.c.bf16 %v1479_v48, %v1477_v44  ;;  %1846 = vmax.xlane.f32.xlu2 %v4899_v42  ;;  %1912 = vadd.xlane.f32.xlu0 %v4894_v1  ;;  %v4908_v18 = vpop.eup %3144  ;;  %v1860_v44 = vsub.f32 %v4597_v25, %v4739_v46  ;;  %v668_v48 = vpack.c.bf16 %v652_v5, %v652_v5 }
 0x590   : > { %1914 = vadd.xlane.f32.xlu1 %v4901_v8  ;;  %v669_v46 = vpack.c.bf16 %v653_v29, %v653_v29 }
 0x591   : > { %3146 = vpow2.f32 %v2357_v41  ;;  %2822 = vmatmul.msk.bf16.gmra.mxu3 %vm756_vm0, %v1501_v11  ;;  %v5311_v41 = vld [vmem:[#allocation33_spill] sm:$0xff]  ;;  %v2059_v11 = vunpack.c.l.b16 %v670_v2  ;;  %v2057_v45 = vunpack.c.l.b16 %v668_v48 }
 0x592   : > { %vm5312_vm1 = vcmp.ge.s32.totalorder %v5311_v41, %v3905_v30 }
 0x593   : > { %vm5313_vm3 = vmmov %vm5312_vm1 }
 0x594   : > { %v2312_v51 = vpop.xlane.xlu2 %2311 }
 0x595   : > { %v2337_v63 = vsub.f32 %v4801_v22, %v2312_v51  ;;  %v2275_v22 = vpop.f32.mrf.mxu0  ;;  %v2058_v51 = vunpack.c.l.b16 %v669_v46  ;;  %v2005_v56 = vpop.f32.mrf.mxu1 }
 0x596   : > { %v1482_v4 = vpop.f32.mrf.mxu2  ;;  %v4930_v13 = vsel %vm641_vm14, %v2275_v22, -inf }
 0x597   : > { %v4910_v34 = vpop.eup %3146  ;;  %v2359_v21 = vmul.f32 1.442695, %v2337_v63  ;;  %2387 = vadd.xlane.f32.xlu2 %v4908_v18  ;;  %v1884_v63 = vmul.f32 1.442695, %v1860_v44 }
 0x598   : > { %2389 = vadd.xlane.f32.xlu0 %v4910_v34  ;;  %1850 = vmax.xlane.f32.xlu1 %v4915_v12 }
 0x599   : > { %3148 = vpow2.f32 %v2359_v21  ;;  %v2061_v21 = vpack.c.b16 %v2058_v51, %v2057_v45 }
 0x59d   : > { %v2278_v54 = vpop.f32.mrf.mxu0 }
 0x59e   : > { %v1484_v61 = vpop.f32.mrf.mxu2  ;;  %v4949_v25 = vsel %vm5313_vm3, %v2278_v54, -inf }
 0x59f   : > { %v4925_v28 = vpop.eup %3148  ;;  %v1502_v14 = vpack.c.bf16 %v1484_v61, %v1482_v4  ;;  %2323 = vmax.xlane.f32.xlu2 %v4923_v60  ;;  %v2062_v4 = vpack.c.b16 %v2060_v62, %v2059_v11 }
 0x5a0   : > { %2325 = vmax.xlane.f32.xlu0 %v4930_v13  ;;  %2391 = vadd.xlane.f32.xlu1 %v4925_v28 }
 0x5a1   : > { %2823 = vmatmul.msk.bf16.gmra.mxu3 %vm756_vm0, %v1502_v14  ;;  %v2314_v37 = vpop.xlane.xlu0 %2313 }
 0x5a2   : > { %v2338_v10 = vsub.f32 %v4818_v40, %v2314_v37  ;;  %v4944_v40 = vsel %vm5312_vm1, %v1799_v0, -inf  ;;  %2095 = vmatpush.bf16.msrb.mxu3 %v2062_v4 }
 0x5a4   : > { %v2361_v53 = vmul.f32 1.442695, %v2338_v10  ;;  %v2454_v19 = vpop.permute.xlu1 %2453 }
 0x5a5   : > { %2481 = vmatpush.bf16.msra.mxu1 %v2454_v19  ;;  %v2280_v54 = vpop.f32.mrf.mxu0 }
 0x5a6   : > { %3150 = vpow2.f32 %v2361_v53  ;;  %v1487_v17 = vpop.f32.mrf.mxu2  ;;  %2096 = vmatpush.bf16.msrb.mxu3 %v2061_v21  ;;  %v4967_v19 = vsel %vm643_vm2, %v2280_v54, -inf }
 0x5a7   : > { %3152 = vpow2.f32 %v1886_v24 }
 0x5a8   : > { %1848 = vmax.xlane.f32.xlu0 %v4944_v40  ;;  %2327 = vmax.xlane.f32.xlu1 %v4949_v25  ;;  %3154 = vpow2.f32 %v1884_v63 }
 0x5a9   : > { %2482 = vmatpush.bf16.msra.mxu1 %v2452_v52  ;;  %v1841_v52 = vpop.xlane.xlu2 %1840 }
 0x5aa   : > { %v1862_v37 = vsub.f32 %v4810_v57, %v1841_v52  ;;  %v2007_v57 = vpop.f32.mrf.mxu1 }
 0x5ab   : > { %v2045_v5 = vpack.c.bf16 %v2007_v57, %v2005_v56 }
 0x5ac   : > { %v4953_v0 = vpop.eup %3150  ;;  %v1888_v53 = vmul.f32 1.442695, %v1862_v37 }
 0x5ad   : > { %2393 = vadd.xlane.f32.xlu2 %v4953_v0  ;;  %v4956_v61 = vpop.eup %3152 }
 0x5ae   : > { %v1489_v22 = vpop.f32.mrf.mxu2  ;;  %v4960_v43 = vpop.eup %3154  ;;  %3156 = vpow2.f32 %v1888_v53 }
 0x5af   : > { %v1503_v14 = vpack.c.bf16 %v1489_v22, %v1487_v17 }
 0x5b0   : > { %1918 = vadd.xlane.f32.xlu0 %v4956_v61 }
 0x5b1   : > { %2824 = vmatmul.msk.bf16.gmra.mxu3 %vm756_vm0, %v1503_v14  ;;  %v1843_v30 = vpop.xlane.xlu2 %1842 }
 0x5b2   : > { %v2010_v23 = vpop.f32.mrf.mxu1  ;;  %v1863_v29 = vsub.f32 %v4826_v39, %v1843_v30 }
 0x5b4   : > { %v4971_v16 = vpop.eup %3156  ;;  %v1890_v48 = vmul.f32 1.442695, %v1863_v29 }
 0x5b5   : > { %1916 = vadd.xlane.f32.xlu2 %v4960_v43 }
 0x5b6   : > { %v1492_v10 = vpop.f32.mrf.mxu2 }
 0x5b9   : > { %v1911_v45 = vpop.xlane.xlu2 %1910 }
 0x5ba   : > { %v2012_v46 = vpop.f32.mrf.mxu1 }
 0x5bb   : > { %v2046_v11 = vpack.c.bf16 %v2012_v46, %v2010_v23 }
 0x5bd   : > { %2329 = vmax.xlane.f32.xlu2 %v4967_v19 }
 0x5be   : > { %v1494_v44 = vpop.f32.mrf.mxu2 }
 0x5bf   : > { %v1504_v24 = vpack.c.bf16 %v1494_v44, %v1492_v10 }
 0x5c1   : > { %2825 = vmatmul.msk.bf16.gmra.mxu3 %vm756_vm0, %v1504_v24 }
 0x5c5   : > { %1920 = vadd.xlane.f32.xlu2 %v4971_v16 }
 0x5cf   : > { %v2316_v17 = vpop.xlane.xlu1 %2315 }
 0x5d0   : > { %v2339_v2 = vsub.f32 %v4837_v9, %v2316_v17 }
 0x5d1   : > { %2842 = vmatmul.msk.bf16.vlgmr.msrb.gmra.mxu3 %vm756_vm0, %v2045_v5 }
 0x5d2   : > { %v2363_v59 = vmul.f32 1.442695, %v2339_v2 }
 0x5d4   : > { %3158 = vpow2.f32 %v2363_v59 }
 0x5d5   : > { %3160 = vpow2.f32 %v1890_v48 }
 0x5d6   : > { %3162 = vrcp.f32 %v1911_v45 }
 0x5da   : > { %v4977_v41 = vpop.eup %3158 }
 0x5db   : > { %2395 = vadd.xlane.f32.xlu0 %v4977_v41  ;;  %v4981_v62 = vpop.eup %3160 }
 0x5dc   : > { %v3163_v63 = vpop.eup %3162 }
 0x5dd   : > { %v1953_v14 = vmul.f32 %v3163_v63, %v4831_v27 }
 0x5e1   : > { %2843 = vmatmul.msk.bf16.gmra.mxu3 %vm756_vm0, %v2046_v11 }
 0x5e2   : > { %v2380_v9 = vpop.xlane.xlu1 %2379 }
 0x5e3   : > { %1922 = vadd.xlane.f32.xlu0 %v4981_v62  ;;  %3164 = vrcp.f32 %v2380_v9 }
 0x5e9   : > { %v3165_v4 = vpop.eup %3164 }
 0x5ea   : > { %v1909_v39 = vpop.xlane.xlu1 %1908  ;;  %v2382_v51 = vpop.xlane.xlu0 %2381  ;;  %v2427_v54 = vmul.f32 %v3165_v4, %v4845_v26 }
 0x5eb   : > { %3166 = vrcp.f32 %v1909_v39 }
 0x5ec   : > { %3168 = vrcp.f32 %v2382_v51 }
 0x5f1   : > { %v3167_v21 = vpop.eup %3166 }
 0x5f2   : > { %v3169_v22 = vpop.eup %3168  ;;  %v1952_v52 = vmul.f32 %v3167_v21, %v4850_v58  ;;  %v2384_v37 = vpop.xlane.xlu2 %2383 }
 0x5f3   : > { %v2318_v10 = vpop.xlane.xlu0 %2317  ;;  %v2428_v53 = vmul.f32 %v3169_v22, %v4852_v31  ;;  %v2322_v44 = vpop.xlane.xlu1 %2321 }
 0x5f4   : > { %v2340_v24 = vsub.f32 %v4862_v55, %v2318_v10  ;;  %v1966_v56 = vpack.c.bf16 %v1953_v14, %v1952_v52  ;;  %v2342_v57 = vsub.f32 %v4867_v35, %v2322_v44 }
 0x5f5   : > { %v2443_v5 = vpack.c.bf16 %v2428_v53, %v2427_v54 }
 0x5f6   : > { %v2365_v17 = vmul.f32 1.442695, %v2340_v24  ;;  %v2369_v2 = vmul.f32 1.442695, %v2342_v57  ;;  %2014 = vmatmul.bf16.vlgmr.msra.gmra.mxu2 %v1966_v56 }
 0x5f7   : > { %2483 = vmatmul.bf16.vlgmr.msra.gmra.mxu1 %v2443_v5 }
 0x5f8   : > { %3170 = vpow2.f32 %v2365_v17 }
 0x5f9   : > { %3172 = vpow2.f32 %v2369_v2 }
 0x5fa   : > { %3174 = vrcp.f32 %v2384_v37  ;;  %v2386_v27 = vpop.xlane.xlu2 %2385 }
 0x5fb   : > { %v2320_v58 = vpop.xlane.xlu0 %2319  ;;  %3176 = vrcp.f32 %v2386_v27  ;;  %v1845_v26 = vpop.xlane.xlu1 %1844 }
 0x5fc   : > { %v2341_v31 = vsub.f32 %v4882_v47, %v2320_v58  ;;  %v1864_v30 = vsub.f32 %v4887_v36, %v1845_v26 }
 0x5fe   : > { %v4992_v55 = vpop.eup %3170  ;;  %v2367_v23 = vmul.f32 1.442695, %v2341_v31  ;;  %v1892_v59 = vmul.f32 1.442695, %v1864_v30 }
 0x5ff   : > { %v4994_v35 = vpop.eup %3172  ;;  %2397 = vadd.xlane.f32.xlu1 %v4992_v55 }
 0x600   : > { %v3175_v29 = vpop.eup %3174  ;;  %3178 = vpow2.f32 %v2367_v23  ;;  %2401 = vadd.xlane.f32.xlu2 %v4994_v35 }
 0x601   : > { %3180 = vpow2.f32 %v1892_v59  ;;  %v3177_v48 = vpop.eup %3176  ;;  %v2429_v47 = vmul.f32 %v3175_v29, %v4857_v50 }
 0x602   : > { %v1847_v46 = vpop.xlane.xlu2 %1846  ;;  %v2430_v36 = vmul.f32 %v3177_v48, %v4877_v32 }
 0x603   : > { %v1913_v11 = vpop.xlane.xlu0 %1912  ;;  %v1865_v9 = vsub.f32 %v4899_v42, %v1847_v46  ;;  %v1915_v45 = vpop.xlane.xlu1 %1914 }
 0x604   : > { %3182 = vrcp.f32 %v1913_v11  ;;  %v2444_v39 = vpack.c.bf16 %v2430_v36, %v2429_v47 }
 0x605   : > { %3184 = vrcp.f32 %v1915_v45  ;;  %v1894_v63 = vmul.f32 1.442695, %v1865_v9 }
 0x606   : > { %v5001_v51 = vpop.eup %3178 }
 0x607   : > { %v5003_v4 = vpop.eup %3180  ;;  %2399 = vadd.xlane.f32.xlu1 %v5001_v51  ;;  %3186 = vpow2.f32 %v1894_v63  ;;  %2488 = vmatmul.bf16.gmra.mxu1 %v2444_v39 }
 0x608   : > { %1924 = vadd.xlane.f32.xlu0 %v5003_v4 }
 0x60a   : > { %v3183_v50 = vpop.eup %3182  ;;  %v2388_v32 = vpop.xlane.xlu2 %2387 }
 0x60b   : > { %v3185_v21 = vpop.eup %3184  ;;  %v1954_v42 = vmul.f32 %v3183_v50, %v4894_v1  ;;  %3188 = vrcp.f32 %v2388_v32  ;;  %v1851_v22 = vpop.xlane.xlu1 %1850 }
 0x60c   : > { %v2390_v14 = vpop.xlane.xlu0 %2389  ;;  %v1955_v52 = vmul.f32 %v3185_v21, %v4901_v8  ;;  %v1867_v27 = vsub.f32 %v4915_v12, %v1851_v22 }
 0x60d   : > { %3190 = vrcp.f32 %v2390_v14  ;;  %v5009_v37 = vpop.eup %3186 }
 0x60e   : > { %v1967_v10 = vpack.c.bf16 %v1955_v52, %v1954_v42  ;;  %v1898_v26 = vmul.f32 1.442695, %v1867_v27 }
 0x60f   : > { %1926 = vadd.xlane.f32.xlu1 %v5009_v37 }
 0x610   : > { %2019 = vmatmul.bf16.gmra.mxu2 %v1967_v10  ;;  %v658_v10 = vld [vmem:[#allocation8 + $0x70] sm:$0xff] }
 0x611   : > { %v3189_v54 = vpop.eup %3188 }
 0x612   : > { %v2324_v44 = vpop.xlane.xlu2 %2323  ;;  %v2431_v24 = vmul.f32 %v3189_v54, %v4908_v18  ;;  %v659_v54 = vld [vmem:[#allocation8 + $0x78] sm:$0xff] }
 0x613   : > { %v3191_v53 = vpop.eup %3190  ;;  %v2343_v56 = vsub.f32 %v4923_v60, %v2324_v44  ;;  %v2392_v1 = vpop.xlane.xlu1 %2391  ;;  %v675_v44 = vpack.c.bf16 %v659_v54, %v659_v54 }
 0x614   : > { %v2326_v57 = vpop.xlane.xlu0 %2325  ;;  %v2432_v5 = vmul.f32 %v3191_v53, %v4910_v34  ;;  %v674_v53 = vpack.c.bf16 %v658_v10, %v658_v10 }
 0x615   : > { %v2344_v8 = vsub.f32 %v4930_v13, %v2326_v57  ;;  %v2371_v17 = vmul.f32 1.442695, %v2343_v56 }
 0x616   : > { %v2445_v2 = vpack.c.bf16 %v2432_v5, %v2431_v24  ;;  %v2539_v24 = vunpack.c.l.b16 %v675_v44 }
 0x617   : > { %v2373_v58 = vmul.f32 1.442695, %v2344_v8  ;;  %3192 = vpow2.f32 %v2371_v17 }
 0x618   : > { %2493 = vmatmul.bf16.gmra.mxu1 %v2445_v2 }
 0x619   : > { %3194 = vpow2.f32 %v2373_v58 }
 0x61a   : > { %3196 = vpow2.f32 %v1898_v26 }
 0x61b   : > { %v2328_v31 = vpop.xlane.xlu1 %2327  ;;  %3198 = vrcp.f32 %v2392_v1 }
 0x61c   : > { %v1849_v30 = vpop.xlane.xlu0 %1848  ;;  %v2345_v18 = vsub.f32 %v4949_v25, %v2328_v31 }
 0x61d   : > { %v1866_v60 = vsub.f32 %v4944_v40, %v1849_v30  ;;  %v5019_v23 = vpop.eup %3192 }
 0x61e   : > { %v2375_v13 = vmul.f32 1.442695, %v2345_v18  ;;  %2403 = vadd.xlane.f32.xlu2 %v5019_v23 }
 0x61f   : > { %v5021_v34 = vpop.eup %3194  ;;  %v1896_v59 = vmul.f32 1.442695, %v1866_v60 }
 0x620   : > { %2405 = vadd.xlane.f32.xlu0 %v5021_v34  ;;  %3200 = vpow2.f32 %v2375_v13  ;;  %v2394_v12 = vpop.xlane.xlu2 %2393  ;;  %v5025_v29 = vpop.eup %3196 }
 0x621   : > { %3202 = vpow2.f32 %v1896_v59  ;;  %v3199_v40 = vpop.eup %3198 }
 0x622   : > { %3204 = vrcp.f32 %v2394_v12  ;;  %v2433_v36 = vmul.f32 %v3199_v40, %v4925_v28 }
 0x624   : > { %v1919_v25 = vpop.xlane.xlu0 %1918 }
 0x625   : > { %3206 = vrcp.f32 %v1919_v25 }
 0x626   : > { %v5027_v48 = vpop.eup %3200  ;;  %1930 = vadd.xlane.f32.xlu2 %v5025_v29 }
 0x627   : > { %v5030_v46 = vpop.eup %3202 }
 0x628   : > { %2407 = vadd.xlane.f32.xlu0 %v5027_v48  ;;  %v3205_v11 = vpop.eup %3204  ;;  %1928 = vadd.xlane.f32.xlu1 %v5030_v46  ;;  %v1917_v47 = vpop.xlane.xlu2 %1916 }
 0x629   : > { %3208 = vrcp.f32 %v1917_v47  ;;  %v2434_v9 = vmul.f32 %v3205_v11, %v4953_v0 }
 0x62b   : > { %v2446_v45 = vpack.c.bf16 %v2434_v9, %v2433_v36  ;;  %v3207_v39 = vpop.eup %3206 }
 0x62c   : > { %v1957_v32 = vmul.f32 %v3207_v39, %v4956_v61  ;;  %v2538_v61 = vunpack.c.l.b16 %v674_v53 }
 0x62d   : > { %2498 = vmatmul.bf16.gmra.mxu1 %v2446_v45 }
 0x62f   : > { %v3209_v63 = vpop.eup %3208 }
 0x630   : > { %v2330_v50 = vpop.xlane.xlu2 %2329  ;;  %v1956_v21 = vmul.f32 %v3209_v63, %v4960_v43 }
 0x631   : > { %v2346_v42 = vsub.f32 %v4967_v19, %v2330_v50  ;;  %v2541_v19 = vpack.c.b16 %v2539_v24, %v2538_v61 }
 0x632   : > { %v1968_v22 = vpack.c.bf16 %v1957_v32, %v1956_v21 }
 0x633   : > { %v2377_v14 = vmul.f32 1.442695, %v2346_v42  ;;  %2574 = vmatpush.bf16.msrb.mxu2 %v2541_v19 }
 0x634   : > { %2024 = vmatmul.bf16.gmra.mxu2 %v1968_v22 }
 0x635   : > { %3210 = vpow2.f32 %v2377_v14  ;;  %v5051_v14 = vpop.f32.mrf.mxu3 }
 0x638   : > { %v1921_v0 = vpop.xlane.xlu2 %1920 }
 0x639   : > { %3212 = vrcp.f32 %v1921_v0 }
 0x63b   : > { %v5039_v52 = vpop.eup %3210 }
 0x63c   : > { %2409 = vadd.xlane.f32.xlu1 %v5039_v52 }
 0x63f   : > { %v3213_v56 = vpop.eup %3212 }
 0x640   : > { %v1958_v57 = vmul.f32 %v3213_v56, %v4971_v16  ;;  %v656_v16 = vld [vmem:[#allocation8 + $0x60] sm:$0xff] }
 0x641   : > { %v672_v59 = vpack.c.bf16 %v656_v16, %v656_v16 }
 0x643   : > { %v2536_v11 = vunpack.c.l.b16 %v672_v59 }
 0x64e   : > { %v2396_v28 = vpop.xlane.xlu0 %2395 }
 0x656   : > { %v1923_v43 = vpop.xlane.xlu0 %1922 }
 0x657   : > { %3214 = vrcp.f32 %v1923_v43 }
 0x658   : > { %3216 = vrcp.f32 %v2396_v28 }
 0x65d   : > { %v3215_v1 = vpop.eup %3214 }
 0x65e   : > { %v1959_v5 = vmul.f32 %v3215_v1, %v4981_v62  ;;  %v3217_v2 = vpop.eup %3216  ;;  %v657_v62 = vld [vmem:[#allocation8 + $0x68] sm:$0xff] }
 0x65f   : > { %v2435_v31 = vmul.f32 %v3217_v2, %v4977_v41  ;;  %v673_v12 = vpack.c.bf16 %v657_v62, %v657_v62 }
 0x660   : > { %v1969_v8 = vpack.c.bf16 %v1959_v5, %v1958_v57 }
 0x661   : > { %v2537_v47 = vunpack.c.l.b16 %v673_v12 }
 0x662   : > { %2029 = vmatmul.bf16.gmra.mxu2 %v1969_v8 }
 0x663   : > { %v2540_v41 = vpack.c.b16 %v2537_v47, %v2536_v11 }
 0x665   : > { %2575 = vmatpush.bf16.msrb.mxu2 %v2540_v41 }
 0x672   : > { %v2398_v17 = vpop.xlane.xlu1 %2397 }
 0x673   : > { %3218 = vrcp.f32 %v2398_v17  ;;  %v2402_v60 = vpop.xlane.xlu2 %2401 }
 0x674   : > { %v2484_v19 = vpop.f32.mrf.mxu1 }
 0x679   : > { %v3219_v27 = vpop.eup %3218  ;;  %v2015_v58 = vpop.f32.mrf.mxu2 }
 0x67a   : > { %v2400_v26 = vpop.xlane.xlu1 %2399  ;;  %v2436_v30 = vmul.f32 %v3219_v27, %v4992_v55 }
 0x67b   : > { %v1925_v13 = vpop.xlane.xlu0 %1924  ;;  %3220 = vrcp.f32 %v2400_v26 }
 0x67c   : > { %v2447_v18 = vpack.c.bf16 %v2436_v30, %v2435_v31  ;;  %3222 = vrcp.f32 %v2402_v60  ;;  %v2486_v17 = vpop.f32.mrf.mxu1 }
 0x67d   : > { %3224 = vrcp.f32 %v1925_v13  ;;  %v2524_v30 = vpack.c.bf16 %v2486_v17, %v2484_v19 }
 0x67e   : > { %2503 = vmatmul.bf16.gmra.mxu1 %v2447_v18 }
 0x681   : > { %v2017_v25 = vpop.f32.mrf.mxu2  ;;  %v3221_v9 = vpop.eup %3220 }
 0x682   : > { %v1927_v40 = vpop.xlane.xlu1 %1926  ;;  %v2047_v36 = vpack.c.bf16 %v2017_v25, %v2015_v58  ;;  %v3223_v55 = vpop.eup %3222  ;;  %v2437_v39 = vmul.f32 %v3221_v9, %v5001_v51 }
 0x683   : > { %3226 = vrcp.f32 %v1927_v40  ;;  %v3225_v45 = vpop.eup %3224  ;;  %v2438_v32 = vmul.f32 %v3223_v55, %v4994_v35  ;;  %v5053_v51 = vpop.f32.mrf.mxu3 }
 0x684   : > { %2844 = vmatmul.msk.bf16.gmra.mxu3 %vm756_vm0, %v2047_v36  ;;  %v1960_v50 = vmul.f32 %v3225_v45, %v5003_v4  ;;  %v2489_v58 = vpop.f32.mrf.mxu1 }
 0x685   : > { %v2448_v22 = vpack.c.bf16 %v2438_v32, %v2437_v39 }
 0x689   : > { %v3227_v63 = vpop.eup %3226 }
 0x68a   : > { %v1961_v21 = vmul.f32 %v3227_v63, %v5009_v37 }
 0x68b   : > { %v5058_v1 = vpop.f32.mrf.mxu3 }
 0x68c   : > { %v1970_v42 = vpack.c.bf16 %v1961_v21, %v1960_v50  ;;  %v2491_v16 = vpop.f32.mrf.mxu1 }
 0x68d   : > { %v2525_v25 = vpack.c.bf16 %v2491_v16, %v2489_v58 }
 0x68e   : > { %2034 = vmatmul.bf16.gmra.mxu2 %v1970_v42  ;;  %2508 = vmatmul.bf16.gmra.mxu1 %v2448_v22 }
 0x691   : > { %v2404_v28 = vpop.xlane.xlu2 %2403 }
 0x692   : > { %3228 = vrcp.f32 %v2404_v28 }
 0x693   : > { %v2020_v0 = vpop.f32.mrf.mxu2  ;;  %v2406_v10 = vpop.xlane.xlu0 %2405 }
 0x694   : > { %3230 = vrcp.f32 %v2406_v10 }
 0x695   : > { %v2494_v40 = vpop.f32.mrf.mxu1 }
 0x698   : > { %v3229_v54 = vpop.eup %3228 }
 0x699   : > { %v1931_v4 = vpop.xlane.xlu2 %1930  ;;  %v2439_v37 = vmul.f32 %v3229_v54, %v5019_v23 }
 0x69a   : > { %v3231_v53 = vpop.eup %3230  ;;  %3232 = vrcp.f32 %v1931_v4 }
 0x69b   : > { %v2022_v35 = vpop.f32.mrf.mxu2  ;;  %v2440_v44 = vmul.f32 %v3231_v53, %v5021_v34  ;;  %v1929_v61 = vpop.xlane.xlu1 %1928 }
 0x69c   : > { %v2048_v43 = vpack.c.bf16 %v2022_v35, %v2020_v0  ;;  %3234 = vrcp.f32 %v1929_v61  ;;  %v5062_v34 = vpop.f32.mrf.mxu3  ;;  %v2408_v2 = vpop.xlane.xlu0 %2407 }
 0x69d   : > { %v2449_v24 = vpack.c.bf16 %v2440_v44, %v2439_v37  ;;  %3236 = vrcp.f32 %v2408_v2  ;;  %v2496_v47 = vpop.f32.mrf.mxu1  ;;  %v5314_v2 = vld [vmem:[#allocation20_spill] sm:$0xff] }
 0x69e   : > { %2845 = vmatmul.msk.bf16.gmra.mxu3 %vm756_vm0, %v2048_v43 }
 0x69f   : > { %2513 = vmatmul.bf16.gmra.mxu1 %v2449_v24 }
 0x6a0   : > { %v3233_v56 = vpop.eup %3232 }
 0x6a1   : > { %v1963_v57 = vmul.f32 %v3233_v56, %v5025_v29 }
 0x6a2   : > { %v3235_v5 = vpop.eup %3234 }
 0x6a3   : > { %v1962_v23 = vmul.f32 %v3235_v5, %v5030_v46  ;;  %v3237_v26 = vpop.eup %3236 }
 0x6a4   : > { %v5064_v31 = vpop.f32.mrf.mxu3  ;;  %v2441_v46 = vmul.f32 %v3237_v26, %v5027_v48  ;;  %v2526_v48 = vpack.c.bf16 %v2496_v47, %v2494_v40 }
 0x6a5   : > { %v1971_v8 = vpack.c.bf16 %v1963_v57, %v1962_v23 }
 0x6a7   : > { %2039 = vmatmul.bf16.gmra.mxu2 %v1971_v8 }
 0x6ac   : > { %v5069_v62 = vpop.f32.mrf.mxu3 }
 0x6af   : > { %v2410_v27 = vpop.xlane.xlu1 %2409 }
 0x6b0   : > { %3238 = vrcp.f32 %v2410_v27  ;;  %v1636_v27 = vadd.f32 %v5314_v2, %v5051_v14 }
 0x6b4   : > { %v5073_v11 = vpop.f32.mrf.mxu3 }
 0x6b6   : > { %v3239_v18 = vpop.eup %3238 }
 0x6b7   : > { %2858 = vmatmul.msk.bf16.vlgmr.msrb.gmra.mxu2 %vm756_vm0, %v2524_v30  ;;  %v2025_v29 = vpop.f32.mrf.mxu2  ;;  %v2442_v60 = vmul.f32 %v3239_v18, %v5039_v52  ;;  %v2499_v52 = vpop.f32.mrf.mxu1  ;;  %v5106_v30 = vld [vmem:[%s5213_s4] ss:$0 sm:$0xff] }
 0x6b9   : > { %v2450_v13 = vpack.c.bf16 %v2442_v60, %v2441_v46  ;;  %v5315_v60 = vld [vmem:[#allocation26_spill] sm:$0xff] }
 0x6bb   : > { %2518 = vmatmul.bf16.gmra.mxu1 %v2450_v13  ;;  %v1638_v13 = vadd.f32 %v5315_v60, %v5053_v51 }
 0x6bc   : > { %v5075_v36 = vpop.f32.mrf.mxu3 }
 0x6bf   : > { %v2027_v59 = vpop.f32.mrf.mxu2  ;;  %v2501_v9 = vpop.f32.mrf.mxu1 }
 0x6c0   : > { %v2049_v12 = vpack.c.bf16 %v2027_v59, %v2025_v29  ;;  %v2527_v55 = vpack.c.bf16 %v2501_v9, %v2499_v52 }
 0x6c2   : > { %2846 = vmatmul.msk.bf16.gmra.mxu3 %vm756_vm0, %v2049_v12 }
 0x6c4   : > { %v5078_v41 = vpop.f32.mrf.mxu3 }
 0x6c7   : > { %2859 = vmatmul.msk.bf16.gmra.mxu2 %vm756_vm0, %v2525_v25 }
 0x6cc   : > { %v5080_v39 = vpop.f32.mrf.mxu3 }
 0x6d4   : > { %v5083_v21 = vpop.f32.mrf.mxu3 }
 0x6d7   : > { %2860 = vmatmul.msk.bf16.gmra.mxu2 %vm756_vm0, %v2526_v48  ;;  %v5316_v48 = vld [vmem:[#allocation17_spill] sm:$0xff] }
 0x6d8   : > { %v1641_v51 = vadd.f32 %v5316_v48, %v5058_v1  ;;  %v1646_v1 = vadd.f32 %v4677_v7, %v5064_v31  ;;  %v1651_v7 = vadd.f32 %v4692_v15, %v5073_v11  ;;  %v1656_v11 = vadd.f32 %v4706_v6, %v5078_v41  ;;  %v5318_v6 = vld [vmem:[#allocation25_spill] sm:$0xff] }
 0x6d9   : > { %v1661_v41 = vadd.f32 %v5318_v6, %v5083_v21  ;;  %v5320_v21 = vld [vmem:[#allocation27_spill] sm:$0xff] }
 0x6dc   : > { %v5086_v32 = vpop.f32.mrf.mxu3 }
 0x6e4   : > { %v5088_v0 = vpop.f32.mrf.mxu3 }
 0x6e5   : > { %v2030_v45 = vpop.f32.mrf.mxu2 }
 0x6e7   : > { %2861 = vmatmul.msk.bf16.gmra.mxu2 %vm756_vm0, %v2527_v55 }
 0x6ec   : > { %v5091_v54 = vpop.f32.mrf.mxu3 }
 0x6ed   : > { %v2032_v63 = vpop.f32.mrf.mxu2 }
 0x6ee   : > { %v2050_v50 = vpack.c.bf16 %v2032_v63, %v2030_v45 }
 0x6f0   : > { %2847 = vmatmul.msk.bf16.gmra.mxu3 %vm756_vm0, %v2050_v50  ;;  %v5317_v50 = vld [vmem:[#allocation18_spill] sm:$0xff] }
 0x6f4   : > { %v5094_v35 = vpop.f32.mrf.mxu3 }
 0x6fb   : > { %v2504_v42 = vpop.f32.mrf.mxu1 }
 0x6fc   : > { %v5097_v24 = vpop.f32.mrf.mxu3 }
 0x703   : > { %v2506_v22 = vpop.f32.mrf.mxu1 }
 0x704   : > { %v2528_v28 = vpack.c.bf16 %v2506_v22, %v2504_v42  ;;  %v2098_v5 = vpop.f32.mrf.mxu3  ;;  %v1643_v42 = vadd.f32 %v5317_v50, %v5062_v34  ;;  %v1648_v34 = vadd.f32 %v4686_v38, %v5069_v62  ;;  %v1653_v38 = vadd.f32 %v4697_v3, %v5075_v36 }
 0x705   : > { %v2138_v26 = vadd.f32 %v2098_v5, %v1636_v27  ;;  %v1658_v3 = vadd.f32 %v4711_v33, %v5080_v39  ;;  %v5319_v33 = vld [vmem:[#allocation28_spill] sm:$0xff] }
 0x706   : > { %2862 = vmatmul.msk.bf16.gmra.mxu2 %vm756_vm0, %v2528_v28  ;;  %v1663_v39 = vadd.f32 %v5319_v33, %v5086_v32  ;;  %v1668_v32 = vadd.f32 %v4734_v20, %v5091_v54 }
 0x70b   : > { %v2509_v10 = vpop.f32.mrf.mxu1 }
 0x70c   : > { %v2100_v17 = vpop.f32.mrf.mxu3 }
 0x70d   : > { %v2139_v59 = vadd.f32 %v2100_v17, %v1638_v13 }
 0x711   : > { %v2035_v53 = vpop.f32.mrf.mxu2 }
 0x713   : > { %v2511_v4 = vpop.f32.mrf.mxu1 }
 0x714   : > { %v2529_v37 = vpack.c.bf16 %v2511_v4, %v2509_v10  ;;  %v2103_v14 = vpop.f32.mrf.mxu3 }
 0x715   : > { %v2140_v52 = vadd.f32 %v2103_v14, %v1641_v51 }
 0x716   : > { %2863 = vmatmul.msk.bf16.gmra.mxu2 %vm756_vm0, %v2529_v37 }
 0x719   : > { %v2037_v44 = vpop.f32.mrf.mxu2 }
 0x71a   : > { %v2051_v43 = vpack.c.bf16 %v2037_v44, %v2035_v53 }
 0x71c   : > { %v2514_v61 = vpop.f32.mrf.mxu1  ;;  %2848 = vmatmul.msk.bf16.gmra.mxu3 %vm756_vm0, %v2051_v43  ;;  %v2105_v9 = vpop.f32.mrf.mxu3 }
 0x71d   : > { %v2141_v22 = vadd.f32 %v2105_v9, %v1643_v42 }
 0x724   : > { %v2516_v19 = vpop.f32.mrf.mxu1  ;;  %v2108_v28 = vpop.f32.mrf.mxu3 }
 0x725   : > { %v2530_v56 = vpack.c.bf16 %v2516_v19, %v2514_v61  ;;  %v2142_v37 = vadd.f32 %v2108_v28, %v1646_v1 }
 0x727   : > { %2864 = vmatmul.msk.bf16.gmra.mxu2 %vm756_vm0, %v2530_v56 }
 0x72a   : > { %v2040_v57 = vpop.f32.mrf.mxu2 }
 0x72c   : > { %v2110_v61 = vpop.f32.mrf.mxu3 }
 0x72d   : > { %v2143_v56 = vadd.f32 %v2110_v61, %v1648_v34 }
 0x732   : > { %v2042_v23 = vpop.f32.mrf.mxu2 }
 0x733   : > { %v2052_v8 = vpack.c.bf16 %v2042_v23, %v2040_v57 }
 0x734   : > { %v2113_v23 = vpop.f32.mrf.mxu3 }
 0x735   : > { %2849 = vmatmul.msk.bf16.gmra.mxu3 %vm756_vm0, %v2052_v8  ;;  %v2144_v31 = vadd.f32 %v2113_v23, %v1651_v7  ;;  %v1673_v23 = vadd.f32 %v4744_v49, %v5097_v24 }
 0x738   : > { %v2519_v58 = vpop.f32.mrf.mxu1 }
 0x73a   : > { %v2577_v18 = vpop.f32.mrf.mxu2 }
 0x73b   : > { %v2617_v29 = vadd.f32 %v2577_v18, %v2138_v26 }
 0x73d   : > { %v2637_v46 = vadd.f32 %v5106_v30, %v2617_v29 }
 0x73f   : > { %2653 = vst [vmem:[%s5113_s26] sm:$0xff] %v2637_v46 }
 0x740   : > { %v2521_v16 = vpop.f32.mrf.mxu1 }
 0x741   : > { %v2531_v12 = vpack.c.bf16 %v2521_v16, %v2519_v58  ;;  %v2115_v58 = vpop.f32.mrf.mxu3 }
 0x742   : > { %v2579_v25 = vpop.f32.mrf.mxu2  ;;  %v2145_v62 = vadd.f32 %v2115_v58, %v1653_v38 }
 0x743   : > { %v2618_v40 = vadd.f32 %v2579_v25, %v2139_v59  ;;  %2865 = vmatmul.msk.bf16.gmra.mxu2 %vm756_vm0, %v2531_v12 }
 0x745   : > { %v2638_v47 = vadd.f32 %v5106_v30, %v2618_v40 }
 0x747   : > { %2654 = vst [vmem:[%s5113_s26 + $0x8] sm:$0xff] %v2638_v47 }
 0x749   : > { %v2118_v15 = vpop.f32.mrf.mxu3 }
 0x74a   : > { %v2582_v55 = vpop.f32.mrf.mxu2  ;;  %v2146_v46 = vadd.f32 %v2118_v15, %v1656_v11 }
 0x74b   : > { %v2619_v45 = vadd.f32 %v2582_v55, %v2140_v52 }
 0x74d   : > { %v2639_v63 = vadd.f32 %v5106_v30, %v2619_v45 }
 0x74f   : > { %2655 = vst [vmem:[%s5113_s26 + $0x10] sm:$0xff] %v2639_v63 }
 0x751   : > { %v2120_v13 = vpop.f32.mrf.mxu3 }
 0x752   : > { %v2584_v10 = vpop.f32.mrf.mxu2  ;;  %v2147_v36 = vadd.f32 %v2120_v13, %v1658_v3 }
 0x753   : > { %v2620_v53 = vadd.f32 %v2584_v10, %v2141_v22  ;;  %v1666_v22 = vadd.f32 %v5320_v21, %v5088_v0 }
 0x755   : > { %v2640_v4 = vadd.f32 %v5106_v30, %v2620_v53 }
 0x757   : > { %2656 = vst [vmem:[%s5113_s26 + $0x18] sm:$0xff] %v2640_v4 }
 0x75a   : > { %v2587_v44 = vpop.f32.mrf.mxu2 }
 0x75b   : > { %v2621_v43 = vadd.f32 %v2587_v44, %v2142_v37 }
 0x75d   : > { %v2641_v19 = vadd.f32 %v5106_v30, %v2621_v43 }
 0x75f   : > { %2657 = vst [vmem:[%s5113_s26 + $0x20] sm:$0xff] %v2641_v19  ;;  %v5321_v19 = vld [vmem:[#allocation29_spill] sm:$0xff] }
 0x760   : > { %v1671_v34 = vadd.f32 %v5321_v19, %v5094_v35 }
 0x762   : > { %v2589_v57 = vpop.f32.mrf.mxu2 }
 0x763   : > { %v2622_v5 = vadd.f32 %v2589_v57, %v2143_v56 }
 0x765   : > { %v2642_v8 = vadd.f32 %v5106_v30, %v2622_v5 }
 0x767   : > { %2658 = vst [vmem:[%s5113_s26 + $0x28] sm:$0xff] %v2642_v8 }
 0x76a   : > { %v2592_v17 = vpop.f32.mrf.mxu2 }
 0x76b   : > { %v2623_v2 = vadd.f32 %v2592_v17, %v2144_v31 }
 0x76d   : > { %v2643_v27 = vadd.f32 %v5106_v30, %v2623_v2 }
 0x76f   : > { %2659 = vst [vmem:[%s5113_s26 + $0x30] sm:$0xff] %v2643_v27 }
 0x772   : > { %v2594_v26 = vpop.f32.mrf.mxu2 }
 0x773   : > { %v2624_v18 = vadd.f32 %v2594_v26, %v2145_v62  ;;  %v2123_v12 = vpop.f32.mrf.mxu3 }
 0x774   : > { %v2148_v47 = vadd.f32 %v2123_v12, %v1661_v41 }
 0x775   : > { %v2644_v29 = vadd.f32 %v5106_v30, %v2624_v18 }
 0x777   : > { %2660 = vst [vmem:[%s5113_s26 + $0x38] sm:$0xff] %v2644_v29 }
 0x77b   : > { %v2125_v52 = vpop.f32.mrf.mxu3 }
 0x77c   : > { %v2149_v55 = vadd.f32 %v2125_v52, %v1663_v39 }
 0x789   : > { %v2597_v60 = vpop.f32.mrf.mxu2 }
 0x78a   : > { %v2625_v14 = vadd.f32 %v2597_v60, %v2146_v46 }
 0x78c   : > { %v2645_v16 = vadd.f32 %v5106_v30, %v2625_v14 }
 0x78e   : > { %2661 = vst [vmem:[%s5113_s26 + $0x40] sm:$0xff] %v2645_v16 }
 0x791   : > { %v2599_v59 = vpop.f32.mrf.mxu2 }
 0x792   : > { %v2626_v25 = vadd.f32 %v2599_v59, %v2147_v36 }
 0x794   : > { %v2646_v40 = vadd.f32 %v5106_v30, %v2626_v25 }
 0x796   : > { %2662 = vst [vmem:[%s5113_s26 + $0x48] sm:$0xff] %v2646_v40 }
 0x799   : > { %v2602_v48 = vpop.f32.mrf.mxu2 }
 0x79a   : > { %v2627_v51 = vadd.f32 %v2602_v48, %v2148_v47 }
 0x79c   : > { %v2647_v9 = vadd.f32 %v5106_v30, %v2627_v51 }
 0x79e   : > { %2663 = vst [vmem:[%s5113_s26 + $0x50] sm:$0xff] %v2647_v9 }
 0x79f   : > { %v2128_v50 = vpop.f32.mrf.mxu3 }
 0x7a0   : > { %v2150_v28 = vadd.f32 %v2128_v50, %v1666_v22 }
 0x7a1   : > { %v2604_v45 = vpop.f32.mrf.mxu2 }
 0x7a2   : > { %v2628_v63 = vadd.f32 %v2604_v45, %v2149_v55 }
 0x7a4   : > { %v2648_v42 = vadd.f32 %v5106_v30, %v2628_v63 }
 0x7a6   : > { %2664 = vst [vmem:[%s5113_s26 + $0x58] sm:$0xff] %v2648_v42 }
 0x7a7   : > { %v2130_v1 = vpop.f32.mrf.mxu3 }
 0x7a8   : > { %v2151_v37 = vadd.f32 %v2130_v1, %v1668_v32 }
 0x7aa   : > { %v2607_v10 = vpop.f32.mrf.mxu2 }
 0x7ab   : > { %v2629_v53 = vadd.f32 %v2607_v10, %v2150_v28 }
 0x7ad   : > { %v2649_v4 = vadd.f32 %v5106_v30, %v2629_v53 }
 0x7af   : > { %2665 = vst [vmem:[%s5113_s26 + $0x60] sm:$0xff] %v2649_v4 }
 0x7b2   : > { %v2609_v44 = vpop.f32.mrf.mxu2 }
 0x7b3   : > { %v2630_v43 = vadd.f32 %v2609_v44, %v2151_v37 }
 0x7b5   : > { %v2650_v61 = vadd.f32 %v5106_v30, %v2630_v43 }
 0x7b7   : > { %2666 = vst [vmem:[%s5113_s26 + $0x68] sm:$0xff] %v2650_v61 }
 0x7b8   : > { %v2133_v0 = vpop.f32.mrf.mxu3 }
 0x7b9   : > { %v2152_v56 = vadd.f32 %v2133_v0, %v1671_v34 }
 0x7c0   : > { %v2135_v54 = vpop.f32.mrf.mxu3 }
 0x7c1   : > { %v2153_v8 = vadd.f32 %v2135_v54, %v1673_v23 }
 0x7c6   : > { %v2612_v57 = vpop.f32.mrf.mxu2 }
 0x7c7   : > { %v2631_v5 = vadd.f32 %v2612_v57, %v2152_v56 }
 0x7c9   : > { %v2651_v20 = vadd.f32 %v5106_v30, %v2631_v5 }
 0x7cb   : > { %2667 = vst [vmem:[%s5113_s26 + $0x70] sm:$0xff] %v2651_v20 }
 0x7ce   : > { %v2614_v35 = vpop.f32.mrf.mxu2 }
 0x7cf   : > { %v2632_v7 = vadd.f32 %v2614_v35, %v2153_v8 }
 0x7d1   : > { %v2652_v31 = vadd.f32 %v5106_v30, %v2632_v7 }
 0x7d3   : > { %2668 = vst [vmem:[%s5113_s26 + $0x78] sm:$0xff] %v2652_v31 }
 0x7d4   : > { %3387 = shalt.err (!%p3384_p10)
}
 0x7d5   : > { %s3446_s17 = smov 128   ;;  %s3447_s23 = smov 8  }
 0x7d6   : > { %2911 = dma.vmem_to_hbm [thread:$0]  (%p3563_p3), %s2683_s15, 2048, %s2685_s7, %s2670_s22, %s3446_s17, %s3446_s17, %s3447_s23  }
 0x7d7 PF: > { %s2699_s26 = sand.u32 1, %s3422_s18   ;;  %p5322_p12 = scmp.ge.s32.totalorder %s3434_s21, 2 }
 0x7d8   : > { %s2700_s6 = scalar_lea.sflag [#allocation4], %s2699_s26 }
 0x7d9   : > { %p2928_p13 = pnand %p5322_p12, %p3513_p6 }
 0x7db   : > { %p2929_p0 = pneg %p2928_p13 }
 0x7dd   : > { %3417 = dma.done.wait (%p2929_p0), %s2700_s6, 2048  }
 0x7de   : > { %3419 = vsyncadd (%p2929_p0), %s2700_s6, 4294965248  ;;  %p20_p5 = scmp.ge.s32.totalorder %s3550_s30, 4   ;;  %s5323_s18 = smov %s3426_s19 }
 0x7df   : > { %s5324_s19 = smov %s3430_s20  ;;  %s5325_s20 = smov %s3559_s9 }
 0x7e0   : > { %s5326_s21 = smov %s3550_s30  ;;  %22 = sbr.rel (!%p20_p5) target bundleno = 7 (0x7), region = 97 }
 0x7e5   :  { %2706 = vsyncpa [#allocation3], 1 }
 0x7e6   :  { %2708 = vsyncpa [#allocation3 + $0x1], 1 }
 0x7e7   :  { %2709 = vsyncpa [#allocation6], 1 }
 0x7e8   :  { %2710 = vsyncpa [#allocation9], 1 }
 0x7e9   :  { %2711 = vsyncpa [#allocation4], 1 }
 0x7ea   :  { %2713 = vsyncpa [#allocation4 + $0x1], 1 }

</bundles_post_ra>
